<compile_context>
chip_gen: v7x
topology: tpu7x:2x2x1
jax: 0.10.0
libtpu: 0.0.40
codegen_flags: <defaults>
</compile_context>

<pallas_src>
import math
import functools

import jax
import jax.numpy as jnp
import numpy as np
from jax import lax
from jax.experimental import pallas as pl
from jax.experimental.pallas import tpu as pltpu


# ---------------------------------------------------------------------------
# Shared math helpers (pure jnp: used by the Pallas kernel body AND by the
# plain-JAX reference so numerics match tightly).
# ---------------------------------------------------------------------------
def _mm(x, w):
    """(M, K) @ (K, N) with bf16 MXU operands and f32 accumulation."""
    return jnp.dot(x.astype(jnp.bfloat16), w.astype(jnp.bfloat16),
                   preferred_element_type=jnp.float32)


def _mm_t(a, b):
    """(M, K) x (L, K) -> (M, L): contract last dims (q @ k^T scores)."""
    return lax.dot_general(a.astype(jnp.bfloat16), b.astype(jnp.bfloat16),
                           (((1,), (1,)), ((), ())),
                           preferred_element_type=jnp.float32)


def _layernorm(x, gamma, beta, eps=1e-5):
    mu = jnp.mean(x, axis=-1, keepdims=True)
    var = jnp.mean((x - mu) ** 2, axis=-1, keepdims=True)
    return (x - mu) * lax.rsqrt(var + eps) * gamma + beta


def _softmax_last(x):
    m = jnp.max(x, axis=-1, keepdims=True)
    e = jnp.exp(x - m)
    return e / jnp.sum(e, axis=-1, keepdims=True)


def _attn_core(q, k, v, out_wT, out_b, num_heads, need_weights):
    """Per-head attention on already-projected q (Lq,D), k/v (Lk,D).

    The output projection is distributed over heads (== concat + matmul),
    so no concatenate / relayout is needed. Softmax kept in f32.
    """
    D = q.shape[-1]
    hd = D // num_heads
    scale = 1.0 / math.sqrt(hd)
    out = None
    w_sum = None
    for h in range(num_heads):
        cols = slice(h * hd, (h + 1) * hd)
        s = _mm_t(q[:, cols], k[:, cols]) * scale          # (Lq, Lk) f32
        p = _softmax_last(s)                               # (Lq, Lk) f32
        term = _mm(_mm(p, v[:, cols]), out_wT[cols, :])    # (Lq, D)  f32
        out = term if out is None else out + term
        if need_weights:
            w_sum = p if w_sum is None else w_sum + p
    out = out + out_b
    if need_weights:
        return out, w_sum * (1.0 / num_heads)
    return out, None


def _ffn(x, w1T, b1, w2T, b2):
    h = jnp.maximum(_mm(x, w1T) + b1, 0.0)
    return _mm(h, w2T) + b2


# ---------------------------------------------------------------------------
# Pallas kernel: single grid step, whole (folded) batch resident in VMEM.
# ---------------------------------------------------------------------------
def _tb_kernel(xp_ref, xl_ref,
               sa_qkv_wT_ref, sa_qkv_b_ref, sa_out_wT_ref, sa_out_b_ref,
               ca_q_wT_ref, ca_q_b_ref, ca_kv_wT_ref, ca_kv_b_ref,
               ca_out_wT_ref, ca_out_b_ref,
               n1_g_ref, n1_b_ref, n2_g_ref, n2_b_ref,
               w1T_ref, b1_ref, w2T_ref, b2_ref,
               pooled_ref, cw_ref,
               *, num_heads, batch, seq_p, seq_l):
    D = xp_ref.shape[-1]

    xp = xp_ref[...]                                   # (B*Sp, D) f32
    xl = xl_ref[...]                                   # (B*Sl, D) f32

    # ---- protein self-attention: fused QKV projection over the folded batch ----
    qkv = _mm(xp, sa_qkv_wT_ref[...]) + sa_qkv_b_ref[...]          # (B*Sp, 3D)
    q1, k1, v1 = qkv[:, :D], qkv[:, D:2 * D], qkv[:, 2 * D:]

    sa_rows = []
    for b in range(batch):
        rp = slice(b * seq_p, (b + 1) * seq_p)
        o, _ = _attn_core(q1[rp], k1[rp], v1[rp],
                          sa_out_wT_ref[...], sa_out_b_ref[...],
                          num_heads, need_weights=False)
        sa_rows.append(o)
    sa = jnp.concatenate(sa_rows, axis=0) if batch > 1 else sa_rows[0]

    h1 = _layernorm(sa, n1_g_ref[...], n1_b_ref[...])

    # ---- cross attention: protein queries, ligand keys/values (K/V fused) ----
    q2 = _mm(h1, ca_q_wT_ref[...]) + ca_q_b_ref[...]               # (B*Sp, D)
    kv2 = _mm(xl, ca_kv_wT_ref[...]) + ca_kv_b_ref[...]            # (B*Sl, 2D)
    k2, v2 = kv2[:, :D], kv2[:, D:]

    ca_rows = []
    for b in range(batch):
        rp = slice(b * seq_p, (b + 1) * seq_p)
        rl = slice(b * seq_l, (b + 1) * seq_l)
        o, w = _attn_core(q2[rp], k2[rl], v2[rl],
                          ca_out_wT_ref[...], ca_out_b_ref[...],
                          num_heads, need_weights=True)
        ca_rows.append(o)
        cw_ref[b] = w                                              # (Sp, Sl)
    ca = jnp.concatenate(ca_rows, axis=0) if batch > 1 else ca_rows[0]

    h2 = _layernorm(ca, n2_g_ref[...], n2_b_ref[...])

    # ---- feed-forward over the folded batch ----
    y = _ffn(h2, w1T_ref[...], b1_ref[...], w2T_ref[...], b2_ref[...])   # (B*Sp, D)

    # ---- per-batch mean pool over the sequence (output linear done in wrapper) ----
    pooled = [jnp.mean(y[b * seq_p:(b + 1) * seq_p], axis=0, keepdims=True)
              for b in range(batch)]
    pooled_ref[...] = jnp.concatenate(pooled, axis=0) if batch > 1 else pooled[0]


# ---------------------------------------------------------------------------
# Parameter prep: PyTorch layout -> kernel layout (transposed, fused, bf16).
# ---------------------------------------------------------------------------
def _prepare_params(p):
    D = p["sa_out_w"].shape[0]
    bf = lambda w: w.T.astype(jnp.bfloat16)              # pre-transposed bf16 weight
    r2 = lambda b: b.reshape(1, -1).astype(jnp.float32)  # 2-D f32 bias / LN param
    return {
        "sa_qkv_wT": bf(p["sa_in_w"]),        "sa_qkv_b": r2(p["sa_in_b"]),
        "sa_out_wT": bf(p["sa_out_w"]),       "sa_out_b": r2(p["sa_out_b"]),
        "ca_q_wT":   bf(p["ca_in_w"][:D]),    "ca_q_b":   r2(p["ca_in_b"][:D]),
        "ca_kv_wT":  bf(p["ca_in_w"][D:]),    "ca_kv_b":  r2(p["ca_in_b"][D:]),
        "ca_out_wT": bf(p["ca_out_w"]),       "ca_out_b": r2(p["ca_out_b"]),
        "n1_g": r2(p["n1_g"]), "n1_b": r2(p["n1_b"]),
        "n2_g": r2(p["n2_g"]), "n2_b": r2(p["n2_b"]),
        "w1T": bf(p["w1"]), "b1": r2(p["b1"]),
        "w2T": bf(p["w2"]), "b2": r2(p["b2"]),
    }


def transformer_block_pallas(protein, ligand, params, num_heads):
    B, Sp, D = protein.shape
    _, Sl, _ = ligand.shape
    kp = _prepare_params(params)

    # Fold batch into rows on the XLA side (free): kernel sees 2-D slabs.
    xp = protein.reshape(B * Sp, D)
    xl = ligand.reshape(B * Sl, D)

    kernel_args = [
        xp, xl,
        kp["sa_qkv_wT"], kp["sa_qkv_b"], kp["sa_out_wT"], kp["sa_out_b"],
        kp["ca_q_wT"], kp["ca_q_b"], kp["ca_kv_wT"], kp["ca_kv_b"],
        kp["ca_out_wT"], kp["ca_out_b"],
        kp["n1_g"], kp["n1_b"], kp["n2_g"], kp["n2_b"],
        kp["w1T"], kp["b1"], kp["w2T"], kp["b2"],
    ]

    def full_spec(a):
        nd = a.ndim
        return pl.BlockSpec(a.shape, lambda i, _nd=nd: (0,) * _nd)

    in_specs = [full_spec(a) for a in kernel_args]
    out_shape = (jax.ShapeDtypeStruct((B, D), jnp.float32),        # pooled features
                 jax.ShapeDtypeStruct((B, Sp, Sl), jnp.float32))   # cross-attn weights
    out_specs = (pl.BlockSpec((B, D), lambda i: (0, 0)),
                 pl.BlockSpec((B, Sp, Sl), lambda i: (0, 0, 0)))

    kernel = functools.partial(_tb_kernel, num_heads=num_heads,
                               batch=B, seq_p=Sp, seq_l=Sl)
    pooled, cross_w = pl.pallas_call(
        kernel,
        out_shape=out_shape,
        grid_spec=pltpu.PrefetchScalarGridSpec(
            num_scalar_prefetch=0,
            grid=(1,),
            in_specs=in_specs,
            out_specs=out_specs,
        ),
        compiler_params=pltpu.CompilerParams(
            dimension_semantics=("arbitrary",),
            vmem_limit_bytes=32 * 1024 * 1024),
    )(*kernel_args)

    # Tiny (B, D) x (D, out_dim) output linear: cheaper as one XLA op over the
    # whole batch than a 1-row MXU pass per batch inside the kernel.
    final = pooled @ params["out_w"].T + params["out_b"]
    return final, cross_w


# ---------------------------------------------------------------------------
# Plain-JAX reference (same math, vmapped over batch) for validation.
# ---------------------------------------------------------------------------
def transformer_block_ref(protein, ligand, params, num_heads):
    kp = _prepare_params(params)
    D = protein.shape[-1]

    def one(x, lig):
        qkv = _mm(x, kp["sa_qkv_wT"]) + kp["sa_qkv_b"]
        q, k, v = qkv[:, :D], qkv[:, D:2 * D], qkv[:, 2 * D:]
        sa, _ = _attn_core(q, k, v, kp["sa_out_wT"], kp["sa_out_b"],
                           num_heads, need_weights=False)
        h1 = _layernorm(sa, kp["n1_g"], kp["n1_b"])

        q2 = _mm(h1, kp["ca_q_wT"]) + kp["ca_q_b"]
        kv2 = _mm(lig, kp["ca_kv_wT"]) + kp["ca_kv_b"]
        k2, v2 = kv2[:, :D], kv2[:, D:]
        ca, cw = _attn_core(q2, k2, v2, kp["ca_out_wT"], kp["ca_out_b"],
                            num_heads, need_weights=True)
        h2 = _layernorm(ca, kp["n2_g"], kp["n2_b"])

        y = _ffn(h2, kp["w1T"], kp["b1"], kp["w2T"], kp["b2"])
        return jnp.mean(y, axis=0), cw

    pooled, cw = jax.vmap(one)(protein, ligand)
    final = pooled @ params["out_w"].T + params["out_b"]
    return final, cw


# ---------------------------------------------------------------------------
def _init_params(key, model_dim, output_dim):
    D = model_dim
    shapes = {
        "sa_in_w": (3 * D, D), "sa_in_b": (3 * D,),
        "sa_out_w": (D, D), "sa_out_b": (D,),
        "ca_in_w": (3 * D, D), "ca_in_b": (3 * D,),
        "ca_out_w": (D, D), "ca_out_b": (D,),
        "w1": (4 * D, D), "b1": (4 * D,),
        "w2": (D, 4 * D), "b2": (D,),
        "out_w": (output_dim, D), "out_b": (output_dim,),
    }
    params = {}
    keys = jax.random.split(key, len(shapes))
    for (name, shp), k in zip(shapes.items(), keys):
        fan_in = shp[-1] if len(shp) > 1 else shp[0]
        params[name] = (jax.random.normal(k, shp, jnp.float32)
                        * (0.5 / math.sqrt(fan_in)))
    params["n1_g"] = jnp.ones((D,), jnp.float32)
    params["n1_b"] = jnp.zeros((D,), jnp.float32)
    params["n2_g"] = jnp.ones((D,), jnp.float32)
    params["n2_b"] = jnp.zeros((D,), jnp.float32)
    return params


if __name__ == "__main__":
    B, Sp, Sl, D, H, OUT = 2, 8, 8, 32, 4, 16

    root = jax.random.PRNGKey(0)
    k_prot, k_lig, k_par = jax.random.split(root, 3)
    protein = jax.random.normal(k_prot, (B, Sp, D), jnp.float32)
    ligand = jax.random.normal(k_lig, (B, Sl, D), jnp.float32)
    params = _init_params(k_par, D, OUT)

    final, cross_w = transformer_block_pallas(protein, ligand, params, H)
    jax.block_until_ready((final, cross_w))

    final_ref, cw_ref = transformer_block_ref(protein, ligand, params, H)
    np.testing.assert_allclose(np.asarray(final), np.asarray(final_ref),
                               rtol=1e-2, atol=1e-2)
    np.testing.assert_allclose(np.asarray(cross_w), np.asarray(cw_ref),
                               rtol=1e-2, atol=1e-2)
    assert final.shape == (B, OUT) and cross_w.shape == (B, Sp, Sl)

    print("KERNEL_OK")
</pallas_src>

<mosaic_0001>
module attributes {stable_mosaic.version = 11 : i64} {
  func.func @_tb_kernel(%arg0: i32, %arg1: memref<16x32xf32, #tpu.memory_space<vmem>>, %arg2: memref<16x32xf32, #tpu.memory_space<vmem>>, %arg3: memref<32x96xbf16, #tpu.memory_space<vmem>>, %arg4: memref<1x96xf32, #tpu.memory_space<vmem>>, %arg5: memref<32x32xbf16, #tpu.memory_space<vmem>>, %arg6: memref<1x32xf32, #tpu.memory_space<vmem>>, %arg7: memref<32x32xbf16, #tpu.memory_space<vmem>>, %arg8: memref<1x32xf32, #tpu.memory_space<vmem>>, %arg9: memref<32x64xbf16, #tpu.memory_space<vmem>>, %arg10: memref<1x64xf32, #tpu.memory_space<vmem>>, %arg11: memref<32x32xbf16, #tpu.memory_space<vmem>>, %arg12: memref<1x32xf32, #tpu.memory_space<vmem>>, %arg13: memref<1x32xf32, #tpu.memory_space<vmem>>, %arg14: memref<1x32xf32, #tpu.memory_space<vmem>>, %arg15: memref<1x32xf32, #tpu.memory_space<vmem>>, %arg16: memref<1x32xf32, #tpu.memory_space<vmem>>, %arg17: memref<32x128xbf16, #tpu.memory_space<vmem>>, %arg18: memref<1x128xf32, #tpu.memory_space<vmem>>, %arg19: memref<128x32xbf16, #tpu.memory_space<vmem>>, %arg20: memref<1x32xf32, #tpu.memory_space<vmem>>, %arg21: memref<2x32xf32, #tpu.memory_space<vmem>>, %arg22: memref<2x8x8xf32, #tpu.memory_space<vmem>>) attributes {dimension_semantics = [#tpu.dimension_semantics<arbitrary>], iteration_bounds = array<i64: 1>, scalar_prefetch = 0 : i64, scratch_operands = 0 : i64, tpu.core_type = #tpu.core_type<tc>, window_params = [{pipeline_mode = #tpu.pipeline_mode<synchronous>, transform_indices = @transform_0, window_bounds = array<i64: 16, 32>}, {pipeline_mode = #tpu.pipeline_mode<synchronous>, transform_indices = @transform_1, window_bounds = array<i64: 16, 32>}, {pipeline_mode = #tpu.pipeline_mode<synchronous>, transform_indices = @transform_2, window_bounds = array<i64: 32, 96>}, {pipeline_mode = #tpu.pipeline_mode<synchronous>, transform_indices = @transform_3, window_bounds = array<i64: 1, 96>}, {pipeline_mode = #tpu.pipeline_mode<synchronous>, transform_indices = @transform_4, window_bounds = array<i64: 32, 32>}, {pipeline_mode = #tpu.pipeline_mode<synchronous>, transform_indices = @transform_5, window_bounds = array<i64: 1, 32>}, {pipeline_mode = #tpu.pipeline_mode<synchronous>, transform_indices = @transform_6, window_bounds = array<i64: 32, 32>}, {pipeline_mode = #tpu.pipeline_mode<synchronous>, transform_indices = @transform_7, window_bounds = array<i64: 1, 32>}, {pipeline_mode = #tpu.pipeline_mode<synchronous>, transform_indices = @transform_8, window_bounds = array<i64: 32, 64>}, {pipeline_mode = #tpu.pipeline_mode<synchronous>, transform_indices = @transform_9, window_bounds = array<i64: 1, 64>}, {pipeline_mode = #tpu.pipeline_mode<synchronous>, transform_indices = @transform_10, window_bounds = array<i64: 32, 32>}, {pipeline_mode = #tpu.pipeline_mode<synchronous>, transform_indices = @transform_11, window_bounds = array<i64: 1, 32>}, {pipeline_mode = #tpu.pipeline_mode<synchronous>, transform_indices = @transform_12, window_bounds = array<i64: 1, 32>}, {pipeline_mode = #tpu.pipeline_mode<synchronous>, transform_indices = @transform_13, window_bounds = array<i64: 1, 32>}, {pipeline_mode = #tpu.pipeline_mode<synchronous>, transform_indices = @transform_14, window_bounds = array<i64: 1, 32>}, {pipeline_mode = #tpu.pipeline_mode<synchronous>, transform_indices = @transform_15, window_bounds = array<i64: 1, 32>}, {pipeline_mode = #tpu.pipeline_mode<synchronous>, transform_indices = @transform_16, window_bounds = array<i64: 32, 128>}, {pipeline_mode = #tpu.pipeline_mode<synchronous>, transform_indices = @transform_17, window_bounds = array<i64: 1, 128>}, {pipeline_mode = #tpu.pipeline_mode<synchronous>, transform_indices = @transform_18, window_bounds = array<i64: 128, 32>}, {pipeline_mode = #tpu.pipeline_mode<synchronous>, transform_indices = @transform_19, window_bounds = array<i64: 1, 32>}, {pipeline_mode = #tpu.pipeline_mode<synchronous>, transform_indices = @transform_20, window_bounds = array<i64: 2, 32>}, {pipeline_mode = #tpu.pipeline_mode<synchronous>, transform_indices = @transform_21, window_bounds = array<i64: 2, 8, 8>}]} {
    %c0 = arith.constant 0 : index
    %c0_0 = arith.constant 0 : index
    %0 = vector.load %arg1[%c0, %c0_0] : memref<16x32xf32, #tpu.memory_space<vmem>>, vector<16x32xf32>
    %c0_1 = arith.constant 0 : index
    %c0_2 = arith.constant 0 : index
    %1 = vector.load %arg2[%c0_1, %c0_2] : memref<16x32xf32, #tpu.memory_space<vmem>>, vector<16x32xf32>
    %c0_3 = arith.constant 0 : index
    %c0_4 = arith.constant 0 : index
    %2 = vector.load %arg3[%c0_3, %c0_4] : memref<32x96xbf16, #tpu.memory_space<vmem>>, vector<32x96xbf16>
    %3 = arith.truncf %0 : vector<16x32xf32> to vector<16x32xbf16>
    %cst = arith.constant dense<0.000000e+00> : vector<16x96xf32>
    %4 = tpu.matmul %3, %2, %cst {dimension_numbers = #tpu.dot_dimension_numbers<[1], [0], [0], [1], [0, 0, 1, 1], [], []>} : vector<16x32xbf16>, vector<32x96xbf16>, vector<16x96xf32> -> vector<16x96xf32>
    %c0_5 = arith.constant 0 : index
    %c0_6 = arith.constant 0 : index
    %5 = vector.load %arg4[%c0_5, %c0_6] : memref<1x96xf32, #tpu.memory_space<vmem>>, vector<1x96xf32>
    %6 = vector.broadcast %5 : vector<1x96xf32> to vector<16x96xf32>
    %7 = arith.addf %4, %6 : vector<16x96xf32>
    %8 = vector.extract_strided_slice %7 {offsets = [0, 0], sizes = [16, 32], strides = [1, 1]} : vector<16x96xf32> to vector<16x32xf32>
    %9 = vector.extract_strided_slice %7 {offsets = [0, 32], sizes = [16, 32], strides = [1, 1]} : vector<16x96xf32> to vector<16x32xf32>
    %10 = vector.extract_strided_slice %7 {offsets = [0, 64], sizes = [16, 32], strides = [1, 1]} : vector<16x96xf32> to vector<16x32xf32>
    %11 = vector.extract_strided_slice %8 {offsets = [0, 0], sizes = [8, 32], strides = [1, 1]} : vector<16x32xf32> to vector<8x32xf32>
    %12 = vector.extract_strided_slice %9 {offsets = [0, 0], sizes = [8, 32], strides = [1, 1]} : vector<16x32xf32> to vector<8x32xf32>
    %13 = vector.extract_strided_slice %10 {offsets = [0, 0], sizes = [8, 32], strides = [1, 1]} : vector<16x32xf32> to vector<8x32xf32>
    %c0_7 = arith.constant 0 : index
    %c0_8 = arith.constant 0 : index
    %14 = vector.load %arg5[%c0_7, %c0_8] : memref<32x32xbf16, #tpu.memory_space<vmem>>, vector<32x32xbf16>
    %c0_9 = arith.constant 0 : index
    %c0_10 = arith.constant 0 : index
    %15 = vector.load %arg6[%c0_9, %c0_10] : memref<1x32xf32, #tpu.memory_space<vmem>>, vector<1x32xf32>
    %16 = vector.extract_strided_slice %11 {offsets = [0, 0], sizes = [8, 8], strides = [1, 1]} : vector<8x32xf32> to vector<8x8xf32>
    %17 = vector.extract_strided_slice %12 {offsets = [0, 0], sizes = [8, 8], strides = [1, 1]} : vector<8x32xf32> to vector<8x8xf32>
    %18 = arith.truncf %16 : vector<8x8xf32> to vector<8x8xbf16>
    %19 = arith.truncf %17 : vector<8x8xf32> to vector<8x8xbf16>
    %cst_11 = arith.constant dense<0.000000e+00> : vector<8x8xf32>
    %20 = tpu.matmul %18, %19, %cst_11 {dimension_numbers = #tpu.dot_dimension_numbers<[1], [1], [0], [0], [0, 0, 1, 0], [], []>} : vector<8x8xbf16>, vector<8x8xbf16>, vector<8x8xf32> -> vector<8x8xf32>
    %cst_12 = arith.constant 0.353553385 : f32
    %21 = vector.broadcast %cst_12 : f32 to vector<8x8xf32>
    %22 = arith.mulf %20, %21 : vector<8x8xf32>
    %cst_13 = arith.constant dense<0xFF800000> : vector<8xf32>
    %23 = vector.multi_reduction <maximumf>, %22, %cst_13 [1] : vector<8x8xf32> to vector<8xf32>
    %24 = vector.shape_cast %23 : vector<8xf32> to vector<8x1xf32>
    %25 = vector.broadcast %24 : vector<8x1xf32> to vector<8x8xf32>
    %26 = arith.subf %22, %25 : vector<8x8xf32>
    %27 = math.exp %26 : vector<8x8xf32>
    %cst_14 = arith.constant dense<0.000000e+00> : vector<8xf32>
    %28 = vector.multi_reduction <add>, %27, %cst_14 [1] : vector<8x8xf32> to vector<8xf32>
    %29 = vector.shape_cast %28 : vector<8xf32> to vector<8x1xf32>
    %30 = vector.broadcast %29 : vector<8x1xf32> to vector<8x8xf32>
    %31 = arith.divf %27, %30 : vector<8x8xf32>
    %32 = vector.extract_strided_slice %13 {offsets = [0, 0], sizes = [8, 8], strides = [1, 1]} : vector<8x32xf32> to vector<8x8xf32>
    %33 = arith.truncf %31 : vector<8x8xf32> to vector<8x8xbf16>
    %34 = arith.truncf %32 : vector<8x8xf32> to vector<8x8xbf16>
    %cst_15 = arith.constant dense<0.000000e+00> : vector<8x8xf32>
    %35 = tpu.matmul %33, %34, %cst_15 {dimension_numbers = #tpu.dot_dimension_numbers<[1], [0], [0], [1], [0, 0, 1, 1], [], []>} : vector<8x8xbf16>, vector<8x8xbf16>, vector<8x8xf32> -> vector<8x8xf32>
    %36 = vector.extract_strided_slice %14 {offsets = [0, 0], sizes = [8, 32], strides = [1, 1]} : vector<32x32xbf16> to vector<8x32xbf16>
    %37 = arith.truncf %35 : vector<8x8xf32> to vector<8x8xbf16>
    %cst_16 = arith.constant dense<0.000000e+00> : vector<8x32xf32>
    %38 = tpu.matmul %37, %36, %cst_16 {dimension_numbers = #tpu.dot_dimension_numbers<[1], [0], [0], [1], [0, 0, 1, 1], [], []>} : vector<8x8xbf16>, vector<8x32xbf16>, vector<8x32xf32> -> vector<8x32xf32>
    %39 = vector.extract_strided_slice %11 {offsets = [0, 8], sizes = [8, 8], strides = [1, 1]} : vector<8x32xf32> to vector<8x8xf32>
    %40 = vector.extract_strided_slice %12 {offsets = [0, 8], sizes = [8, 8], strides = [1, 1]} : vector<8x32xf32> to vector<8x8xf32>
    %41 = arith.truncf %39 : vector<8x8xf32> to vector<8x8xbf16>
    %42 = arith.truncf %40 : vector<8x8xf32> to vector<8x8xbf16>
    %cst_17 = arith.constant dense<0.000000e+00> : vector<8x8xf32>
    %43 = tpu.matmul %41, %42, %cst_17 {dimension_numbers = #tpu.dot_dimension_numbers<[1], [1], [0], [0], [0, 0, 1, 0], [], []>} : vector<8x8xbf16>, vector<8x8xbf16>, vector<8x8xf32> -> vector<8x8xf32>
    %cst_18 = arith.constant 0.353553385 : f32
    %44 = vector.broadcast %cst_18 : f32 to vector<8x8xf32>
    %45 = arith.mulf %43, %44 : vector<8x8xf32>
    %cst_19 = arith.constant dense<0xFF800000> : vector<8xf32>
    %46 = vector.multi_reduction <maximumf>, %45, %cst_19 [1] : vector<8x8xf32> to vector<8xf32>
    %47 = vector.shape_cast %46 : vector<8xf32> to vector<8x1xf32>
    %48 = vector.broadcast %47 : vector<8x1xf32> to vector<8x8xf32>
    %49 = arith.subf %45, %48 : vector<8x8xf32>
    %50 = math.exp %49 : vector<8x8xf32>
    %cst_20 = arith.constant dense<0.000000e+00> : vector<8xf32>
    %51 = vector.multi_reduction <add>, %50, %cst_20 [1] : vector<8x8xf32> to vector<8xf32>
    %52 = vector.shape_cast %51 : vector<8xf32> to vector<8x1xf32>
    %53 = vector.broadcast %52 : vector<8x1xf32> to vector<8x8xf32>
    %54 = arith.divf %50, %53 : vector<8x8xf32>
    %55 = vector.extract_strided_slice %13 {offsets = [0, 8], sizes = [8, 8], strides = [1, 1]} : vector<8x32xf32> to vector<8x8xf32>
    %56 = arith.truncf %54 : vector<8x8xf32> to vector<8x8xbf16>
    %57 = arith.truncf %55 : vector<8x8xf32> to vector<8x8xbf16>
    %cst_21 = arith.constant dense<0.000000e+00> : vector<8x8xf32>
    %58 = tpu.matmul %56, %57, %cst_21 {dimension_numbers = #tpu.dot_dimension_numbers<[1], [0], [0], [1], [0, 0, 1, 1], [], []>} : vector<8x8xbf16>, vector<8x8xbf16>, vector<8x8xf32> -> vector<8x8xf32>
    %59 = vector.extract_strided_slice %14 {offsets = [8, 0], sizes = [8, 32], strides = [1, 1]} : vector<32x32xbf16> to vector<8x32xbf16>
    %60 = arith.truncf %58 : vector<8x8xf32> to vector<8x8xbf16>
    %cst_22 = arith.constant dense<0.000000e+00> : vector<8x32xf32>
    %61 = tpu.matmul %60, %59, %cst_22 {dimension_numbers = #tpu.dot_dimension_numbers<[1], [0], [0], [1], [0, 0, 1, 1], [], []>} : vector<8x8xbf16>, vector<8x32xbf16>, vector<8x32xf32> -> vector<8x32xf32>
    %62 = arith.addf %38, %61 : vector<8x32xf32>
    %63 = vector.extract_strided_slice %11 {offsets = [0, 16], sizes = [8, 8], strides = [1, 1]} : vector<8x32xf32> to vector<8x8xf32>
    %64 = vector.extract_strided_slice %12 {offsets = [0, 16], sizes = [8, 8], strides = [1, 1]} : vector<8x32xf32> to vector<8x8xf32>
    %65 = arith.truncf %63 : vector<8x8xf32> to vector<8x8xbf16>
    %66 = arith.truncf %64 : vector<8x8xf32> to vector<8x8xbf16>
    %cst_23 = arith.constant dense<0.000000e+00> : vector<8x8xf32>
    %67 = tpu.matmul %65, %66, %cst_23 {dimension_numbers = #tpu.dot_dimension_numbers<[1], [1], [0], [0], [0, 0, 1, 0], [], []>} : vector<8x8xbf16>, vector<8x8xbf16>, vector<8x8xf32> -> vector<8x8xf32>
    %cst_24 = arith.constant 0.353553385 : f32
    %68 = vector.broadcast %cst_24 : f32 to vector<8x8xf32>
    %69 = arith.mulf %67, %68 : vector<8x8xf32>
    %cst_25 = arith.constant dense<0xFF800000> : vector<8xf32>
    %70 = vector.multi_reduction <maximumf>, %69, %cst_25 [1] : vector<8x8xf32> to vector<8xf32>
    %71 = vector.shape_cast %70 : vector<8xf32> to vector<8x1xf32>
    %72 = vector.broadcast %71 : vector<8x1xf32> to vector<8x8xf32>
    %73 = arith.subf %69, %72 : vector<8x8xf32>
    %74 = math.exp %73 : vector<8x8xf32>
    %cst_26 = arith.constant dense<0.000000e+00> : vector<8xf32>
    %75 = vector.multi_reduction <add>, %74, %cst_26 [1] : vector<8x8xf32> to vector<8xf32>
    %76 = vector.shape_cast %75 : vector<8xf32> to vector<8x1xf32>
    %77 = vector.broadcast %76 : vector<8x1xf32> to vector<8x8xf32>
    %78 = arith.divf %74, %77 : vector<8x8xf32>
    %79 = vector.extract_strided_slice %13 {offsets = [0, 16], sizes = [8, 8], strides = [1, 1]} : vector<8x32xf32> to vector<8x8xf32>
    %80 = arith.truncf %78 : vector<8x8xf32> to vector<8x8xbf16>
    %81 = arith.truncf %79 : vector<8x8xf32> to vector<8x8xbf16>
    %cst_27 = arith.constant dense<0.000000e+00> : vector<8x8xf32>
    %82 = tpu.matmul %80, %81, %cst_27 {dimension_numbers = #tpu.dot_dimension_numbers<[1], [0], [0], [1], [0, 0, 1, 1], [], []>} : vector<8x8xbf16>, vector<8x8xbf16>, vector<8x8xf32> -> vector<8x8xf32>
    %83 = vector.extract_strided_slice %14 {offsets = [16, 0], sizes = [8, 32], strides = [1, 1]} : vector<32x32xbf16> to vector<8x32xbf16>
    %84 = arith.truncf %82 : vector<8x8xf32> to vector<8x8xbf16>
    %cst_28 = arith.constant dense<0.000000e+00> : vector<8x32xf32>
    %85 = tpu.matmul %84, %83, %cst_28 {dimension_numbers = #tpu.dot_dimension_numbers<[1], [0], [0], [1], [0, 0, 1, 1], [], []>} : vector<8x8xbf16>, vector<8x32xbf16>, vector<8x32xf32> -> vector<8x32xf32>
    %86 = arith.addf %62, %85 : vector<8x32xf32>
    %87 = vector.extract_strided_slice %11 {offsets = [0, 24], sizes = [8, 8], strides = [1, 1]} : vector<8x32xf32> to vector<8x8xf32>
    %88 = vector.extract_strided_slice %12 {offsets = [0, 24], sizes = [8, 8], strides = [1, 1]} : vector<8x32xf32> to vector<8x8xf32>
    %89 = arith.truncf %87 : vector<8x8xf32> to vector<8x8xbf16>
    %90 = arith.truncf %88 : vector<8x8xf32> to vector<8x8xbf16>
    %cst_29 = arith.constant dense<0.000000e+00> : vector<8x8xf32>
    %91 = tpu.matmul %89, %90, %cst_29 {dimension_numbers = #tpu.dot_dimension_numbers<[1], [1], [0], [0], [0, 0, 1, 0], [], []>} : vector<8x8xbf16>, vector<8x8xbf16>, vector<8x8xf32> -> vector<8x8xf32>
    %cst_30 = arith.constant 0.353553385 : f32
    %92 = vector.broadcast %cst_30 : f32 to vector<8x8xf32>
    %93 = arith.mulf %91, %92 : vector<8x8xf32>
    %cst_31 = arith.constant dense<0xFF800000> : vector<8xf32>
    %94 = vector.multi_reduction <maximumf>, %93, %cst_31 [1] : vector<8x8xf32> to vector<8xf32>
    %95 = vector.shape_cast %94 : vector<8xf32> to vector<8x1xf32>
    %96 = vector.broadcast %95 : vector<8x1xf32> to vector<8x8xf32>
    %97 = arith.subf %93, %96 : vector<8x8xf32>
    %98 = math.exp %97 : vector<8x8xf32>
    %cst_32 = arith.constant dense<0.000000e+00> : vector<8xf32>
    %99 = vector.multi_reduction <add>, %98, %cst_32 [1] : vector<8x8xf32> to vector<8xf32>
    %100 = vector.shape_cast %99 : vector<8xf32> to vector<8x1xf32>
    %101 = vector.broadcast %100 : vector<8x1xf32> to vector<8x8xf32>
    %102 = arith.divf %98, %101 : vector<8x8xf32>
    %103 = vector.extract_strided_slice %13 {offsets = [0, 24], sizes = [8, 8], strides = [1, 1]} : vector<8x32xf32> to vector<8x8xf32>
    %104 = arith.truncf %102 : vector<8x8xf32> to vector<8x8xbf16>
    %105 = arith.truncf %103 : vector<8x8xf32> to vector<8x8xbf16>
    %cst_33 = arith.constant dense<0.000000e+00> : vector<8x8xf32>
    %106 = tpu.matmul %104, %105, %cst_33 {dimension_numbers = #tpu.dot_dimension_numbers<[1], [0], [0], [1], [0, 0, 1, 1], [], []>} : vector<8x8xbf16>, vector<8x8xbf16>, vector<8x8xf32> -> vector<8x8xf32>
    %107 = vector.extract_strided_slice %14 {offsets = [24, 0], sizes = [8, 32], strides = [1, 1]} : vector<32x32xbf16> to vector<8x32xbf16>
    %108 = arith.truncf %106 : vector<8x8xf32> to vector<8x8xbf16>
    %cst_34 = arith.constant dense<0.000000e+00> : vector<8x32xf32>
    %109 = tpu.matmul %108, %107, %cst_34 {dimension_numbers = #tpu.dot_dimension_numbers<[1], [0], [0], [1], [0, 0, 1, 1], [], []>} : vector<8x8xbf16>, vector<8x32xbf16>, vector<8x32xf32> -> vector<8x32xf32>
    %110 = arith.addf %86, %109 : vector<8x32xf32>
    %111 = vector.broadcast %15 : vector<1x32xf32> to vector<8x32xf32>
    %112 = arith.addf %110, %111 : vector<8x32xf32>
    %113 = vector.extract_strided_slice %8 {offsets = [8, 0], sizes = [8, 32], strides = [1, 1]} : vector<16x32xf32> to vector<8x32xf32>
    %114 = vector.extract_strided_slice %9 {offsets = [8, 0], sizes = [8, 32], strides = [1, 1]} : vector<16x32xf32> to vector<8x32xf32>
    %115 = vector.extract_strided_slice %10 {offsets = [8, 0], sizes = [8, 32], strides = [1, 1]} : vector<16x32xf32> to vector<8x32xf32>
    %c0_35 = arith.constant 0 : index
    %c0_36 = arith.constant 0 : index
    %116 = vector.load %arg5[%c0_35, %c0_36] : memref<32x32xbf16, #tpu.memory_space<vmem>>, vector<32x32xbf16>
    %c0_37 = arith.constant 0 : index
    %c0_38 = arith.constant 0 : index
    %117 = vector.load %arg6[%c0_37, %c0_38] : memref<1x32xf32, #tpu.memory_space<vmem>>, vector<1x32xf32>
    %118 = vector.extract_strided_slice %113 {offsets = [0, 0], sizes = [8, 8], strides = [1, 1]} : vector<8x32xf32> to vector<8x8xf32>
    %119 = vector.extract_strided_slice %114 {offsets = [0, 0], sizes = [8, 8], strides = [1, 1]} : vector<8x32xf32> to vector<8x8xf32>
    %120 = arith.truncf %118 : vector<8x8xf32> to vector<8x8xbf16>
    %121 = arith.truncf %119 : vector<8x8xf32> to vector<8x8xbf16>
    %cst_39 = arith.constant dense<0.000000e+00> : vector<8x8xf32>
    %122 = tpu.matmul %120, %121, %cst_39 {dimension_numbers = #tpu.dot_dimension_numbers<[1], [1], [0], [0], [0, 0, 1, 0], [], []>} : vector<8x8xbf16>, vector<8x8xbf16>, vector<8x8xf32> -> vector<8x8xf32>
    %cst_40 = arith.constant 0.353553385 : f32
    %123 = vector.broadcast %cst_40 : f32 to vector<8x8xf32>
    %124 = arith.mulf %122, %123 : vector<8x8xf32>
    %cst_41 = arith.constant dense<0xFF800000> : vector<8xf32>
    %125 = vector.multi_reduction <maximumf>, %124, %cst_41 [1] : vector<8x8xf32> to vector<8xf32>
    %126 = vector.shape_cast %125 : vector<8xf32> to vector<8x1xf32>
    %127 = vector.broadcast %126 : vector<8x1xf32> to vector<8x8xf32>
    %128 = arith.subf %124, %127 : vector<8x8xf32>
    %129 = math.exp %128 : vector<8x8xf32>
    %cst_42 = arith.constant dense<0.000000e+00> : vector<8xf32>
    %130 = vector.multi_reduction <add>, %129, %cst_42 [1] : vector<8x8xf32> to vector<8xf32>
    %131 = vector.shape_cast %130 : vector<8xf32> to vector<8x1xf32>
    %132 = vector.broadcast %131 : vector<8x1xf32> to vector<8x8xf32>
    %133 = arith.divf %129, %132 : vector<8x8xf32>
    %134 = vector.extract_strided_slice %115 {offsets = [0, 0], sizes = [8, 8], strides = [1, 1]} : vector<8x32xf32> to vector<8x8xf32>
    %135 = arith.truncf %133 : vector<8x8xf32> to vector<8x8xbf16>
    %136 = arith.truncf %134 : vector<8x8xf32> to vector<8x8xbf16>
    %cst_43 = arith.constant dense<0.000000e+00> : vector<8x8xf32>
    %137 = tpu.matmul %135, %136, %cst_43 {dimension_numbers = #tpu.dot_dimension_numbers<[1], [0], [0], [1], [0, 0, 1, 1], [], []>} : vector<8x8xbf16>, vector<8x8xbf16>, vector<8x8xf32> -> vector<8x8xf32>
    %138 = vector.extract_strided_slice %116 {offsets = [0, 0], sizes = [8, 32], strides = [1, 1]} : vector<32x32xbf16> to vector<8x32xbf16>
    %139 = arith.truncf %137 : vector<8x8xf32> to vector<8x8xbf16>
    %cst_44 = arith.constant dense<0.000000e+00> : vector<8x32xf32>
    %140 = tpu.matmul %139, %138, %cst_44 {dimension_numbers = #tpu.dot_dimension_numbers<[1], [0], [0], [1], [0, 0, 1, 1], [], []>} : vector<8x8xbf16>, vector<8x32xbf16>, vector<8x32xf32> -> vector<8x32xf32>
    %141 = vector.extract_strided_slice %113 {offsets = [0, 8], sizes = [8, 8], strides = [1, 1]} : vector<8x32xf32> to vector<8x8xf32>
    %142 = vector.extract_strided_slice %114 {offsets = [0, 8], sizes = [8, 8], strides = [1, 1]} : vector<8x32xf32> to vector<8x8xf32>
    %143 = arith.truncf %141 : vector<8x8xf32> to vector<8x8xbf16>
    %144 = arith.truncf %142 : vector<8x8xf32> to vector<8x8xbf16>
    %cst_45 = arith.constant dense<0.000000e+00> : vector<8x8xf32>
    %145 = tpu.matmul %143, %144, %cst_45 {dimension_numbers = #tpu.dot_dimension_numbers<[1], [1], [0], [0], [0, 0, 1, 0], [], []>} : vector<8x8xbf16>, vector<8x8xbf16>, vector<8x8xf32> -> vector<8x8xf32>
    %cst_46 = arith.constant 0.353553385 : f32
    %146 = vector.broadcast %cst_46 : f32 to vector<8x8xf32>
    %147 = arith.mulf %145, %146 : vector<8x8xf32>
    %cst_47 = arith.constant dense<0xFF800000> : vector<8xf32>
    %148 = vector.multi_reduction <maximumf>, %147, %cst_47 [1] : vector<8x8xf32> to vector<8xf32>
    %149 = vector.shape_cast %148 : vector<8xf32> to vector<8x1xf32>
    %150 = vector.broadcast %149 : vector<8x1xf32> to vector<8x8xf32>
    %151 = arith.subf %147, %150 : vector<8x8xf32>
    %152 = math.exp %151 : vector<8x8xf32>
    %cst_48 = arith.constant dense<0.000000e+00> : vector<8xf32>
    %153 = vector.multi_reduction <add>, %152, %cst_48 [1] : vector<8x8xf32> to vector<8xf32>
    %154 = vector.shape_cast %153 : vector<8xf32> to vector<8x1xf32>
    %155 = vector.broadcast %154 : vector<8x1xf32> to vector<8x8xf32>
    %156 = arith.divf %152, %155 : vector<8x8xf32>
    %157 = vector.extract_strided_slice %115 {offsets = [0, 8], sizes = [8, 8], strides = [1, 1]} : vector<8x32xf32> to vector<8x8xf32>
    %158 = arith.truncf %156 : vector<8x8xf32> to vector<8x8xbf16>
    %159 = arith.truncf %157 : vector<8x8xf32> to vector<8x8xbf16>
    %cst_49 = arith.constant dense<0.000000e+00> : vector<8x8xf32>
    %160 = tpu.matmul %158, %159, %cst_49 {dimension_numbers = #tpu.dot_dimension_numbers<[1], [0], [0], [1], [0, 0, 1, 1], [], []>} : vector<8x8xbf16>, vector<8x8xbf16>, vector<8x8xf32> -> vector<8x8xf32>
    %161 = vector.extract_strided_slice %116 {offsets = [8, 0], sizes = [8, 32], strides = [1, 1]} : vector<32x32xbf16> to vector<8x32xbf16>
    %162 = arith.truncf %160 : vector<8x8xf32> to vector<8x8xbf16>
    %cst_50 = arith.constant dense<0.000000e+00> : vector<8x32xf32>
    %163 = tpu.matmul %162, %161, %cst_50 {dimension_numbers = #tpu.dot_dimension_numbers<[1], [0], [0], [1], [0, 0, 1, 1], [], []>} : vector<8x8xbf16>, vector<8x32xbf16>, vector<8x32xf32> -> vector<8x32xf32>
    %164 = arith.addf %140, %163 : vector<8x32xf32>
    %165 = vector.extract_strided_slice %113 {offsets = [0, 16], sizes = [8, 8], strides = [1, 1]} : vector<8x32xf32> to vector<8x8xf32>
    %166 = vector.extract_strided_slice %114 {offsets = [0, 16], sizes = [8, 8], strides = [1, 1]} : vector<8x32xf32> to vector<8x8xf32>
    %167 = arith.truncf %165 : vector<8x8xf32> to vector<8x8xbf16>
    %168 = arith.truncf %166 : vector<8x8xf32> to vector<8x8xbf16>
    %cst_51 = arith.constant dense<0.000000e+00> : vector<8x8xf32>
    %169 = tpu.matmul %167, %168, %cst_51 {dimension_numbers = #tpu.dot_dimension_numbers<[1], [1], [0], [0], [0, 0, 1, 0], [], []>} : vector<8x8xbf16>, vector<8x8xbf16>, vector<8x8xf32> -> vector<8x8xf32>
    %cst_52 = arith.constant 0.353553385 : f32
    %170 = vector.broadcast %cst_52 : f32 to vector<8x8xf32>
    %171 = arith.mulf %169, %170 : vector<8x8xf32>
    %cst_53 = arith.constant dense<0xFF800000> : vector<8xf32>
    %172 = vector.multi_reduction <maximumf>, %171, %cst_53 [1] : vector<8x8xf32> to vector<8xf32>
    %173 = vector.shape_cast %172 : vector<8xf32> to vector<8x1xf32>
    %174 = vector.broadcast %173 : vector<8x1xf32> to vector<8x8xf32>
    %175 = arith.subf %171, %174 : vector<8x8xf32>
    %176 = math.exp %175 : vector<8x8xf32>
    %cst_54 = arith.constant dense<0.000000e+00> : vector<8xf32>
    %177 = vector.multi_reduction <add>, %176, %cst_54 [1] : vector<8x8xf32> to vector<8xf32>
    %178 = vector.shape_cast %177 : vector<8xf32> to vector<8x1xf32>
    %179 = vector.broadcast %178 : vector<8x1xf32> to vector<8x8xf32>
    %180 = arith.divf %176, %179 : vector<8x8xf32>
    %181 = vector.extract_strided_slice %115 {offsets = [0, 16], sizes = [8, 8], strides = [1, 1]} : vector<8x32xf32> to vector<8x8xf32>
    %182 = arith.truncf %180 : vector<8x8xf32> to vector<8x8xbf16>
    %183 = arith.truncf %181 : vector<8x8xf32> to vector<8x8xbf16>
    %cst_55 = arith.constant dense<0.000000e+00> : vector<8x8xf32>
    %184 = tpu.matmul %182, %183, %cst_55 {dimension_numbers = #tpu.dot_dimension_numbers<[1], [0], [0], [1], [0, 0, 1, 1], [], []>} : vector<8x8xbf16>, vector<8x8xbf16>, vector<8x8xf32> -> vector<8x8xf32>
    %185 = vector.extract_strided_slice %116 {offsets = [16, 0], sizes = [8, 32], strides = [1, 1]} : vector<32x32xbf16> to vector<8x32xbf16>
    %186 = arith.truncf %184 : vector<8x8xf32> to vector<8x8xbf16>
    %cst_56 = arith.constant dense<0.000000e+00> : vector<8x32xf32>
    %187 = tpu.matmul %186, %185, %cst_56 {dimension_numbers = #tpu.dot_dimension_numbers<[1], [0], [0], [1], [0, 0, 1, 1], [], []>} : vector<8x8xbf16>, vector<8x32xbf16>, vector<8x32xf32> -> vector<8x32xf32>
    %188 = arith.addf %164, %187 : vector<8x32xf32>
    %189 = vector.extract_strided_slice %113 {offsets = [0, 24], sizes = [8, 8], strides = [1, 1]} : vector<8x32xf32> to vector<8x8xf32>
    %190 = vector.extract_strided_slice %114 {offsets = [0, 24], sizes = [8, 8], strides = [1, 1]} : vector<8x32xf32> to vector<8x8xf32>
    %191 = arith.truncf %189 : vector<8x8xf32> to vector<8x8xbf16>
    %192 = arith.truncf %190 : vector<8x8xf32> to vector<8x8xbf16>
    %cst_57 = arith.constant dense<0.000000e+00> : vector<8x8xf32>
    %193 = tpu.matmul %191, %192, %cst_57 {dimension_numbers = #tpu.dot_dimension_numbers<[1], [1], [0], [0], [0, 0, 1, 0], [], []>} : vector<8x8xbf16>, vector<8x8xbf16>, vector<8x8xf32> -> vector<8x8xf32>
    %cst_58 = arith.constant 0.353553385 : f32
    %194 = vector.broadcast %cst_58 : f32 to vector<8x8xf32>
    %195 = arith.mulf %193, %194 : vector<8x8xf32>
    %cst_59 = arith.constant dense<0xFF800000> : vector<8xf32>
    %196 = vector.multi_reduction <maximumf>, %195, %cst_59 [1] : vector<8x8xf32> to vector<8xf32>
    %197 = vector.shape_cast %196 : vector<8xf32> to vector<8x1xf32>
    %198 = vector.broadcast %197 : vector<8x1xf32> to vector<8x8xf32>
    %199 = arith.subf %195, %198 : vector<8x8xf32>
    %200 = math.exp %199 : vector<8x8xf32>
    %cst_60 = arith.constant dense<0.000000e+00> : vector<8xf32>
    %201 = vector.multi_reduction <add>, %200, %cst_60 [1] : vector<8x8xf32> to vector<8xf32>
    %202 = vector.shape_cast %201 : vector<8xf32> to vector<8x1xf32>
    %203 = vector.broadcast %202 : vector<8x1xf32> to vector<8x8xf32>
    %204 = arith.divf %200, %203 : vector<8x8xf32>
    %205 = vector.extract_strided_slice %115 {offsets = [0, 24], sizes = [8, 8], strides = [1, 1]} : vector<8x32xf32> to vector<8x8xf32>
    %206 = arith.truncf %204 : vector<8x8xf32> to vector<8x8xbf16>
    %207 = arith.truncf %205 : vector<8x8xf32> to vector<8x8xbf16>
    %cst_61 = arith.constant dense<0.000000e+00> : vector<8x8xf32>
    %208 = tpu.matmul %206, %207, %cst_61 {dimension_numbers = #tpu.dot_dimension_numbers<[1], [0], [0], [1], [0, 0, 1, 1], [], []>} : vector<8x8xbf16>, vector<8x8xbf16>, vector<8x8xf32> -> vector<8x8xf32>
    %209 = vector.extract_strided_slice %116 {offsets = [24, 0], sizes = [8, 32], strides = [1, 1]} : vector<32x32xbf16> to vector<8x32xbf16>
    %210 = arith.truncf %208 : vector<8x8xf32> to vector<8x8xbf16>
    %cst_62 = arith.constant dense<0.000000e+00> : vector<8x32xf32>
    %211 = tpu.matmul %210, %209, %cst_62 {dimension_numbers = #tpu.dot_dimension_numbers<[1], [0], [0], [1], [0, 0, 1, 1], [], []>} : vector<8x8xbf16>, vector<8x32xbf16>, vector<8x32xf32> -> vector<8x32xf32>
    %212 = arith.addf %188, %211 : vector<8x32xf32>
    %213 = vector.broadcast %117 : vector<1x32xf32> to vector<8x32xf32>
    %214 = arith.addf %212, %213 : vector<8x32xf32>
    %215 = tpu.concatenate %112, %214 in 0 : vector<8x32xf32>, vector<8x32xf32> -> vector<16x32xf32>
    %c0_63 = arith.constant 0 : index
    %c0_64 = arith.constant 0 : index
    %216 = vector.load %arg13[%c0_63, %c0_64] : memref<1x32xf32, #tpu.memory_space<vmem>>, vector<1x32xf32>
    %c0_65 = arith.constant 0 : index
    %c0_66 = arith.constant 0 : index
    %217 = vector.load %arg14[%c0_65, %c0_66] : memref<1x32xf32, #tpu.memory_space<vmem>>, vector<1x32xf32>
    %cst_67 = arith.constant dense<0.000000e+00> : vector<16xf32>
    %218 = vector.multi_reduction <add>, %215, %cst_67 [1] : vector<16x32xf32> to vector<16xf32>
    %219 = vector.shape_cast %218 : vector<16xf32> to vector<16x1xf32>
    %cst_68 = arith.constant 3.200000e+01 : f32
    %220 = vector.broadcast %cst_68 : f32 to vector<16x1xf32>
    %221 = arith.divf %219, %220 : vector<16x1xf32>
    %222 = vector.broadcast %221 : vector<16x1xf32> to vector<16x32xf32>
    %223 = arith.subf %215, %222 : vector<16x32xf32>
    %224 = arith.mulf %223, %223 : vector<16x32xf32>
    %cst_69 = arith.constant dense<0.000000e+00> : vector<16xf32>
    %225 = vector.multi_reduction <add>, %224, %cst_69 [1] : vector<16x32xf32> to vector<16xf32>
    %226 = vector.shape_cast %225 : vector<16xf32> to vector<16x1xf32>
    %cst_70 = arith.constant 3.200000e+01 : f32
    %227 = vector.broadcast %cst_70 : f32 to vector<16x1xf32>
    %228 = arith.divf %226, %227 : vector<16x1xf32>
    %229 = vector.broadcast %221 : vector<16x1xf32> to vector<16x32xf32>
    %230 = arith.subf %215, %229 : vector<16x32xf32>
    %cst_71 = arith.constant 9.99999974E-6 : f32
    %231 = vector.broadcast %cst_71 : f32 to vector<16x1xf32>
    %232 = arith.addf %228, %231 : vector<16x1xf32>
    %233 = math.rsqrt %232 : vector<16x1xf32>
    %234 = vector.broadcast %233 : vector<16x1xf32> to vector<16x32xf32>
    %235 = arith.mulf %230, %234 : vector<16x32xf32>
    %236 = vector.broadcast %216 : vector<1x32xf32> to vector<16x32xf32>
    %237 = arith.mulf %235, %236 : vector<16x32xf32>
    %238 = vector.broadcast %217 : vector<1x32xf32> to vector<16x32xf32>
    %239 = arith.addf %237, %238 : vector<16x32xf32>
    %c0_72 = arith.constant 0 : index
    %c0_73 = arith.constant 0 : index
    %240 = vector.load %arg7[%c0_72, %c0_73] : memref<32x32xbf16, #tpu.memory_space<vmem>>, vector<32x32xbf16>
    %241 = arith.truncf %239 : vector<16x32xf32> to vector<16x32xbf16>
    %cst_74 = arith.constant dense<0.000000e+00> : vector<16x32xf32>
    %242 = tpu.matmul %241, %240, %cst_74 {dimension_numbers = #tpu.dot_dimension_numbers<[1], [0], [0], [1], [0, 0, 1, 1], [], []>} : vector<16x32xbf16>, vector<32x32xbf16>, vector<16x32xf32> -> vector<16x32xf32>
    %c0_75 = arith.constant 0 : index
    %c0_76 = arith.constant 0 : index
    %243 = vector.load %arg8[%c0_75, %c0_76] : memref<1x32xf32, #tpu.memory_space<vmem>>, vector<1x32xf32>
    %244 = vector.broadcast %243 : vector<1x32xf32> to vector<16x32xf32>
    %245 = arith.addf %242, %244 : vector<16x32xf32>
    %c0_77 = arith.constant 0 : index
    %c0_78 = arith.constant 0 : index
    %246 = vector.load %arg9[%c0_77, %c0_78] : memref<32x64xbf16, #tpu.memory_space<vmem>>, vector<32x64xbf16>
    %247 = arith.truncf %1 : vector<16x32xf32> to vector<16x32xbf16>
    %cst_79 = arith.constant dense<0.000000e+00> : vector<16x64xf32>
    %248 = tpu.matmul %247, %246, %cst_79 {dimension_numbers = #tpu.dot_dimension_numbers<[1], [0], [0], [1], [0, 0, 1, 1], [], []>} : vector<16x32xbf16>, vector<32x64xbf16>, vector<16x64xf32> -> vector<16x64xf32>
    %c0_80 = arith.constant 0 : index
    %c0_81 = arith.constant 0 : index
    %249 = vector.load %arg10[%c0_80, %c0_81] : memref<1x64xf32, #tpu.memory_space<vmem>>, vector<1x64xf32>
    %250 = vector.broadcast %249 : vector<1x64xf32> to vector<16x64xf32>
    %251 = arith.addf %248, %250 : vector<16x64xf32>
    %252 = vector.extract_strided_slice %251 {offsets = [0, 0], sizes = [16, 32], strides = [1, 1]} : vector<16x64xf32> to vector<16x32xf32>
    %253 = vector.extract_strided_slice %251 {offsets = [0, 32], sizes = [16, 32], strides = [1, 1]} : vector<16x64xf32> to vector<16x32xf32>
    %254 = vector.extract_strided_slice %245 {offsets = [0, 0], sizes = [8, 32], strides = [1, 1]} : vector<16x32xf32> to vector<8x32xf32>
    %255 = vector.extract_strided_slice %252 {offsets = [0, 0], sizes = [8, 32], strides = [1, 1]} : vector<16x32xf32> to vector<8x32xf32>
    %256 = vector.extract_strided_slice %253 {offsets = [0, 0], sizes = [8, 32], strides = [1, 1]} : vector<16x32xf32> to vector<8x32xf32>
    %c0_82 = arith.constant 0 : index
    %c0_83 = arith.constant 0 : index
    %257 = vector.load %arg11[%c0_82, %c0_83] : memref<32x32xbf16, #tpu.memory_space<vmem>>, vector<32x32xbf16>
    %c0_84 = arith.constant 0 : index
    %c0_85 = arith.constant 0 : index
    %258 = vector.load %arg12[%c0_84, %c0_85] : memref<1x32xf32, #tpu.memory_space<vmem>>, vector<1x32xf32>
    %259 = vector.extract_strided_slice %254 {offsets = [0, 0], sizes = [8, 8], strides = [1, 1]} : vector<8x32xf32> to vector<8x8xf32>
    %260 = vector.extract_strided_slice %255 {offsets = [0, 0], sizes = [8, 8], strides = [1, 1]} : vector<8x32xf32> to vector<8x8xf32>
    %261 = arith.truncf %259 : vector<8x8xf32> to vector<8x8xbf16>
    %262 = arith.truncf %260 : vector<8x8xf32> to vector<8x8xbf16>
    %cst_86 = arith.constant dense<0.000000e+00> : vector<8x8xf32>
    %263 = tpu.matmul %261, %262, %cst_86 {dimension_numbers = #tpu.dot_dimension_numbers<[1], [1], [0], [0], [0, 0, 1, 0], [], []>} : vector<8x8xbf16>, vector<8x8xbf16>, vector<8x8xf32> -> vector<8x8xf32>
    %cst_87 = arith.constant 0.353553385 : f32
    %264 = vector.broadcast %cst_87 : f32 to vector<8x8xf32>
    %265 = arith.mulf %263, %264 : vector<8x8xf32>
    %cst_88 = arith.constant dense<0xFF800000> : vector<8xf32>
    %266 = vector.multi_reduction <maximumf>, %265, %cst_88 [1] : vector<8x8xf32> to vector<8xf32>
    %267 = vector.shape_cast %266 : vector<8xf32> to vector<8x1xf32>
    %268 = vector.broadcast %267 : vector<8x1xf32> to vector<8x8xf32>
    %269 = arith.subf %265, %268 : vector<8x8xf32>
    %270 = math.exp %269 : vector<8x8xf32>
    %cst_89 = arith.constant dense<0.000000e+00> : vector<8xf32>
    %271 = vector.multi_reduction <add>, %270, %cst_89 [1] : vector<8x8xf32> to vector<8xf32>
    %272 = vector.shape_cast %271 : vector<8xf32> to vector<8x1xf32>
    %273 = vector.broadcast %272 : vector<8x1xf32> to vector<8x8xf32>
    %274 = arith.divf %270, %273 : vector<8x8xf32>
    %275 = vector.extract_strided_slice %256 {offsets = [0, 0], sizes = [8, 8], strides = [1, 1]} : vector<8x32xf32> to vector<8x8xf32>
    %276 = arith.truncf %274 : vector<8x8xf32> to vector<8x8xbf16>
    %277 = arith.truncf %275 : vector<8x8xf32> to vector<8x8xbf16>
    %cst_90 = arith.constant dense<0.000000e+00> : vector<8x8xf32>
    %278 = tpu.matmul %276, %277, %cst_90 {dimension_numbers = #tpu.dot_dimension_numbers<[1], [0], [0], [1], [0, 0, 1, 1], [], []>} : vector<8x8xbf16>, vector<8x8xbf16>, vector<8x8xf32> -> vector<8x8xf32>
    %279 = vector.extract_strided_slice %257 {offsets = [0, 0], sizes = [8, 32], strides = [1, 1]} : vector<32x32xbf16> to vector<8x32xbf16>
    %280 = arith.truncf %278 : vector<8x8xf32> to vector<8x8xbf16>
    %cst_91 = arith.constant dense<0.000000e+00> : vector<8x32xf32>
    %281 = tpu.matmul %280, %279, %cst_91 {dimension_numbers = #tpu.dot_dimension_numbers<[1], [0], [0], [1], [0, 0, 1, 1], [], []>} : vector<8x8xbf16>, vector<8x32xbf16>, vector<8x32xf32> -> vector<8x32xf32>
    %282 = vector.extract_strided_slice %254 {offsets = [0, 8], sizes = [8, 8], strides = [1, 1]} : vector<8x32xf32> to vector<8x8xf32>
    %283 = vector.extract_strided_slice %255 {offsets = [0, 8], sizes = [8, 8], strides = [1, 1]} : vector<8x32xf32> to vector<8x8xf32>
    %284 = arith.truncf %282 : vector<8x8xf32> to vector<8x8xbf16>
    %285 = arith.truncf %283 : vector<8x8xf32> to vector<8x8xbf16>
    %cst_92 = arith.constant dense<0.000000e+00> : vector<8x8xf32>
    %286 = tpu.matmul %284, %285, %cst_92 {dimension_numbers = #tpu.dot_dimension_numbers<[1], [1], [0], [0], [0, 0, 1, 0], [], []>} : vector<8x8xbf16>, vector<8x8xbf16>, vector<8x8xf32> -> vector<8x8xf32>
    %cst_93 = arith.constant 0.353553385 : f32
    %287 = vector.broadcast %cst_93 : f32 to vector<8x8xf32>
    %288 = arith.mulf %286, %287 : vector<8x8xf32>
    %cst_94 = arith.constant dense<0xFF800000> : vector<8xf32>
    %289 = vector.multi_reduction <maximumf>, %288, %cst_94 [1] : vector<8x8xf32> to vector<8xf32>
    %290 = vector.shape_cast %289 : vector<8xf32> to vector<8x1xf32>
    %291 = vector.broadcast %290 : vector<8x1xf32> to vector<8x8xf32>
    %292 = arith.subf %288, %291 : vector<8x8xf32>
    %293 = math.exp %292 : vector<8x8xf32>
    %cst_95 = arith.constant dense<0.000000e+00> : vector<8xf32>
    %294 = vector.multi_reduction <add>, %293, %cst_95 [1] : vector<8x8xf32> to vector<8xf32>
    %295 = vector.shape_cast %294 : vector<8xf32> to vector<8x1xf32>
    %296 = vector.broadcast %295 : vector<8x1xf32> to vector<8x8xf32>
    %297 = arith.divf %293, %296 : vector<8x8xf32>
    %298 = vector.extract_strided_slice %256 {offsets = [0, 8], sizes = [8, 8], strides = [1, 1]} : vector<8x32xf32> to vector<8x8xf32>
    %299 = arith.truncf %297 : vector<8x8xf32> to vector<8x8xbf16>
    %300 = arith.truncf %298 : vector<8x8xf32> to vector<8x8xbf16>
    %cst_96 = arith.constant dense<0.000000e+00> : vector<8x8xf32>
    %301 = tpu.matmul %299, %300, %cst_96 {dimension_numbers = #tpu.dot_dimension_numbers<[1], [0], [0], [1], [0, 0, 1, 1], [], []>} : vector<8x8xbf16>, vector<8x8xbf16>, vector<8x8xf32> -> vector<8x8xf32>
    %302 = vector.extract_strided_slice %257 {offsets = [8, 0], sizes = [8, 32], strides = [1, 1]} : vector<32x32xbf16> to vector<8x32xbf16>
    %303 = arith.truncf %301 : vector<8x8xf32> to vector<8x8xbf16>
    %cst_97 = arith.constant dense<0.000000e+00> : vector<8x32xf32>
    %304 = tpu.matmul %303, %302, %cst_97 {dimension_numbers = #tpu.dot_dimension_numbers<[1], [0], [0], [1], [0, 0, 1, 1], [], []>} : vector<8x8xbf16>, vector<8x32xbf16>, vector<8x32xf32> -> vector<8x32xf32>
    %305 = arith.addf %281, %304 : vector<8x32xf32>
    %306 = arith.addf %274, %297 : vector<8x8xf32>
    %307 = vector.extract_strided_slice %254 {offsets = [0, 16], sizes = [8, 8], strides = [1, 1]} : vector<8x32xf32> to vector<8x8xf32>
    %308 = vector.extract_strided_slice %255 {offsets = [0, 16], sizes = [8, 8], strides = [1, 1]} : vector<8x32xf32> to vector<8x8xf32>
    %309 = arith.truncf %307 : vector<8x8xf32> to vector<8x8xbf16>
    %310 = arith.truncf %308 : vector<8x8xf32> to vector<8x8xbf16>
    %cst_98 = arith.constant dense<0.000000e+00> : vector<8x8xf32>
    %311 = tpu.matmul %309, %310, %cst_98 {dimension_numbers = #tpu.dot_dimension_numbers<[1], [1], [0], [0], [0, 0, 1, 0], [], []>} : vector<8x8xbf16>, vector<8x8xbf16>, vector<8x8xf32> -> vector<8x8xf32>
    %cst_99 = arith.constant 0.353553385 : f32
    %312 = vector.broadcast %cst_99 : f32 to vector<8x8xf32>
    %313 = arith.mulf %311, %312 : vector<8x8xf32>
    %cst_100 = arith.constant dense<0xFF800000> : vector<8xf32>
    %314 = vector.multi_reduction <maximumf>, %313, %cst_100 [1] : vector<8x8xf32> to vector<8xf32>
    %315 = vector.shape_cast %314 : vector<8xf32> to vector<8x1xf32>
    %316 = vector.broadcast %315 : vector<8x1xf32> to vector<8x8xf32>
    %317 = arith.subf %313, %316 : vector<8x8xf32>
    %318 = math.exp %317 : vector<8x8xf32>
    %cst_101 = arith.constant dense<0.000000e+00> : vector<8xf32>
    %319 = vector.multi_reduction <add>, %318, %cst_101 [1] : vector<8x8xf32> to vector<8xf32>
    %320 = vector.shape_cast %319 : vector<8xf32> to vector<8x1xf32>
    %321 = vector.broadcast %320 : vector<8x1xf32> to vector<8x8xf32>
    %322 = arith.divf %318, %321 : vector<8x8xf32>
    %323 = vector.extract_strided_slice %256 {offsets = [0, 16], sizes = [8, 8], strides = [1, 1]} : vector<8x32xf32> to vector<8x8xf32>
    %324 = arith.truncf %322 : vector<8x8xf32> to vector<8x8xbf16>
    %325 = arith.truncf %323 : vector<8x8xf32> to vector<8x8xbf16>
    %cst_102 = arith.constant dense<0.000000e+00> : vector<8x8xf32>
    %326 = tpu.matmul %324, %325, %cst_102 {dimension_numbers = #tpu.dot_dimension_numbers<[1], [0], [0], [1], [0, 0, 1, 1], [], []>} : vector<8x8xbf16>, vector<8x8xbf16>, vector<8x8xf32> -> vector<8x8xf32>
    %327 = vector.extract_strided_slice %257 {offsets = [16, 0], sizes = [8, 32], strides = [1, 1]} : vector<32x32xbf16> to vector<8x32xbf16>
    %328 = arith.truncf %326 : vector<8x8xf32> to vector<8x8xbf16>
    %cst_103 = arith.constant dense<0.000000e+00> : vector<8x32xf32>
    %329 = tpu.matmul %328, %327, %cst_103 {dimension_numbers = #tpu.dot_dimension_numbers<[1], [0], [0], [1], [0, 0, 1, 1], [], []>} : vector<8x8xbf16>, vector<8x32xbf16>, vector<8x32xf32> -> vector<8x32xf32>
    %330 = arith.addf %305, %329 : vector<8x32xf32>
    %331 = arith.addf %306, %322 : vector<8x8xf32>
    %332 = vector.extract_strided_slice %254 {offsets = [0, 24], sizes = [8, 8], strides = [1, 1]} : vector<8x32xf32> to vector<8x8xf32>
    %333 = vector.extract_strided_slice %255 {offsets = [0, 24], sizes = [8, 8], strides = [1, 1]} : vector<8x32xf32> to vector<8x8xf32>
    %334 = arith.truncf %332 : vector<8x8xf32> to vector<8x8xbf16>
    %335 = arith.truncf %333 : vector<8x8xf32> to vector<8x8xbf16>
    %cst_104 = arith.constant dense<0.000000e+00> : vector<8x8xf32>
    %336 = tpu.matmul %334, %335, %cst_104 {dimension_numbers = #tpu.dot_dimension_numbers<[1], [1], [0], [0], [0, 0, 1, 0], [], []>} : vector<8x8xbf16>, vector<8x8xbf16>, vector<8x8xf32> -> vector<8x8xf32>
    %cst_105 = arith.constant 0.353553385 : f32
    %337 = vector.broadcast %cst_105 : f32 to vector<8x8xf32>
    %338 = arith.mulf %336, %337 : vector<8x8xf32>
    %cst_106 = arith.constant dense<0xFF800000> : vector<8xf32>
    %339 = vector.multi_reduction <maximumf>, %338, %cst_106 [1] : vector<8x8xf32> to vector<8xf32>
    %340 = vector.shape_cast %339 : vector<8xf32> to vector<8x1xf32>
    %341 = vector.broadcast %340 : vector<8x1xf32> to vector<8x8xf32>
    %342 = arith.subf %338, %341 : vector<8x8xf32>
    %343 = math.exp %342 : vector<8x8xf32>
    %cst_107 = arith.constant dense<0.000000e+00> : vector<8xf32>
    %344 = vector.multi_reduction <add>, %343, %cst_107 [1] : vector<8x8xf32> to vector<8xf32>
    %345 = vector.shape_cast %344 : vector<8xf32> to vector<8x1xf32>
    %346 = vector.broadcast %345 : vector<8x1xf32> to vector<8x8xf32>
    %347 = arith.divf %343, %346 : vector<8x8xf32>
    %348 = vector.extract_strided_slice %256 {offsets = [0, 24], sizes = [8, 8], strides = [1, 1]} : vector<8x32xf32> to vector<8x8xf32>
    %349 = arith.truncf %347 : vector<8x8xf32> to vector<8x8xbf16>
    %350 = arith.truncf %348 : vector<8x8xf32> to vector<8x8xbf16>
    %cst_108 = arith.constant dense<0.000000e+00> : vector<8x8xf32>
    %351 = tpu.matmul %349, %350, %cst_108 {dimension_numbers = #tpu.dot_dimension_numbers<[1], [0], [0], [1], [0, 0, 1, 1], [], []>} : vector<8x8xbf16>, vector<8x8xbf16>, vector<8x8xf32> -> vector<8x8xf32>
    %352 = vector.extract_strided_slice %257 {offsets = [24, 0], sizes = [8, 32], strides = [1, 1]} : vector<32x32xbf16> to vector<8x32xbf16>
    %353 = arith.truncf %351 : vector<8x8xf32> to vector<8x8xbf16>
    %cst_109 = arith.constant dense<0.000000e+00> : vector<8x32xf32>
    %354 = tpu.matmul %353, %352, %cst_109 {dimension_numbers = #tpu.dot_dimension_numbers<[1], [0], [0], [1], [0, 0, 1, 1], [], []>} : vector<8x8xbf16>, vector<8x32xbf16>, vector<8x32xf32> -> vector<8x32xf32>
    %355 = arith.addf %330, %354 : vector<8x32xf32>
    %356 = arith.addf %331, %347 : vector<8x8xf32>
    %357 = vector.broadcast %258 : vector<1x32xf32> to vector<8x32xf32>
    %358 = arith.addf %355, %357 : vector<8x32xf32>
    %cst_110 = arith.constant 2.500000e-01 : f32
    %359 = vector.broadcast %cst_110 : f32 to vector<8x8xf32>
    %360 = arith.mulf %356, %359 : vector<8x8xf32>
    %c0_111 = arith.constant 0 : index
    %c0_112 = arith.constant 0 : index
    %c0_113 = arith.constant 0 : index
    %361 = vector.load %arg22[%c0_111, %c0_112, %c0_113] : memref<2x8x8xf32, #tpu.memory_space<vmem>>, vector<1x8x8xf32>
    %362 = vector.shape_cast %361 : vector<1x8x8xf32> to vector<8x8xf32>
    %363 = vector.shape_cast %360 : vector<8x8xf32> to vector<1x8x8xf32>
    tpu.vector_store %arg22[%c0_111, %c0_112, %c0_113], %363 {strides = array<i32>} : memref<2x8x8xf32, #tpu.memory_space<vmem>>, vector<1x8x8xf32>,
    %364 = vector.extract_strided_slice %245 {offsets = [8, 0], sizes = [8, 32], strides = [1, 1]} : vector<16x32xf32> to vector<8x32xf32>
    %365 = vector.extract_strided_slice %252 {offsets = [8, 0], sizes = [8, 32], strides = [1, 1]} : vector<16x32xf32> to vector<8x32xf32>
    %366 = vector.extract_strided_slice %253 {offsets = [8, 0], sizes = [8, 32], strides = [1, 1]} : vector<16x32xf32> to vector<8x32xf32>
    %c0_114 = arith.constant 0 : index
    %c0_115 = arith.constant 0 : index
    %367 = vector.load %arg11[%c0_114, %c0_115] : memref<32x32xbf16, #tpu.memory_space<vmem>>, vector<32x32xbf16>
    %c0_116 = arith.constant 0 : index
    %c0_117 = arith.constant 0 : index
    %368 = vector.load %arg12[%c0_116, %c0_117] : memref<1x32xf32, #tpu.memory_space<vmem>>, vector<1x32xf32>
    %369 = vector.extract_strided_slice %364 {offsets = [0, 0], sizes = [8, 8], strides = [1, 1]} : vector<8x32xf32> to vector<8x8xf32>
    %370 = vector.extract_strided_slice %365 {offsets = [0, 0], sizes = [8, 8], strides = [1, 1]} : vector<8x32xf32> to vector<8x8xf32>
    %371 = arith.truncf %369 : vector<8x8xf32> to vector<8x8xbf16>
    %372 = arith.truncf %370 : vector<8x8xf32> to vector<8x8xbf16>
    %cst_118 = arith.constant dense<0.000000e+00> : vector<8x8xf32>
    %373 = tpu.matmul %371, %372, %cst_118 {dimension_numbers = #tpu.dot_dimension_numbers<[1], [1], [0], [0], [0, 0, 1, 0], [], []>} : vector<8x8xbf16>, vector<8x8xbf16>, vector<8x8xf32> -> vector<8x8xf32>
    %cst_119 = arith.constant 0.353553385 : f32
    %374 = vector.broadcast %cst_119 : f32 to vector<8x8xf32>
    %375 = arith.mulf %373, %374 : vector<8x8xf32>
    %cst_120 = arith.constant dense<0xFF800000> : vector<8xf32>
    %376 = vector.multi_reduction <maximumf>, %375, %cst_120 [1] : vector<8x8xf32> to vector<8xf32>
    %377 = vector.shape_cast %376 : vector<8xf32> to vector<8x1xf32>
    %378 = vector.broadcast %377 : vector<8x1xf32> to vector<8x8xf32>
    %379 = arith.subf %375, %378 : vector<8x8xf32>
    %380 = math.exp %379 : vector<8x8xf32>
    %cst_121 = arith.constant dense<0.000000e+00> : vector<8xf32>
    %381 = vector.multi_reduction <add>, %380, %cst_121 [1] : vector<8x8xf32> to vector<8xf32>
    %382 = vector.shape_cast %381 : vector<8xf32> to vector<8x1xf32>
    %383 = vector.broadcast %382 : vector<8x1xf32> to vector<8x8xf32>
    %384 = arith.divf %380, %383 : vector<8x8xf32>
    %385 = vector.extract_strided_slice %366 {offsets = [0, 0], sizes = [8, 8], strides = [1, 1]} : vector<8x32xf32> to vector<8x8xf32>
    %386 = arith.truncf %384 : vector<8x8xf32> to vector<8x8xbf16>
    %387 = arith.truncf %385 : vector<8x8xf32> to vector<8x8xbf16>
    %cst_122 = arith.constant dense<0.000000e+00> : vector<8x8xf32>
    %388 = tpu.matmul %386, %387, %cst_122 {dimension_numbers = #tpu.dot_dimension_numbers<[1], [0], [0], [1], [0, 0, 1, 1], [], []>} : vector<8x8xbf16>, vector<8x8xbf16>, vector<8x8xf32> -> vector<8x8xf32>
    %389 = vector.extract_strided_slice %367 {offsets = [0, 0], sizes = [8, 32], strides = [1, 1]} : vector<32x32xbf16> to vector<8x32xbf16>
    %390 = arith.truncf %388 : vector<8x8xf32> to vector<8x8xbf16>
    %cst_123 = arith.constant dense<0.000000e+00> : vector<8x32xf32>
    %391 = tpu.matmul %390, %389, %cst_123 {dimension_numbers = #tpu.dot_dimension_numbers<[1], [0], [0], [1], [0, 0, 1, 1], [], []>} : vector<8x8xbf16>, vector<8x32xbf16>, vector<8x32xf32> -> vector<8x32xf32>
    %392 = vector.extract_strided_slice %364 {offsets = [0, 8], sizes = [8, 8], strides = [1, 1]} : vector<8x32xf32> to vector<8x8xf32>
    %393 = vector.extract_strided_slice %365 {offsets = [0, 8], sizes = [8, 8], strides = [1, 1]} : vector<8x32xf32> to vector<8x8xf32>
    %394 = arith.truncf %392 : vector<8x8xf32> to vector<8x8xbf16>
    %395 = arith.truncf %393 : vector<8x8xf32> to vector<8x8xbf16>
    %cst_124 = arith.constant dense<0.000000e+00> : vector<8x8xf32>
    %396 = tpu.matmul %394, %395, %cst_124 {dimension_numbers = #tpu.dot_dimension_numbers<[1], [1], [0], [0], [0, 0, 1, 0], [], []>} : vector<8x8xbf16>, vector<8x8xbf16>, vector<8x8xf32> -> vector<8x8xf32>
    %cst_125 = arith.constant 0.353553385 : f32
    %397 = vector.broadcast %cst_125 : f32 to vector<8x8xf32>
    %398 = arith.mulf %396, %397 : vector<8x8xf32>
    %cst_126 = arith.constant dense<0xFF800000> : vector<8xf32>
    %399 = vector.multi_reduction <maximumf>, %398, %cst_126 [1] : vector<8x8xf32> to vector<8xf32>
    %400 = vector.shape_cast %399 : vector<8xf32> to vector<8x1xf32>
    %401 = vector.broadcast %400 : vector<8x1xf32> to vector<8x8xf32>
    %402 = arith.subf %398, %401 : vector<8x8xf32>
    %403 = math.exp %402 : vector<8x8xf32>
    %cst_127 = arith.constant dense<0.000000e+00> : vector<8xf32>
    %404 = vector.multi_reduction <add>, %403, %cst_127 [1] : vector<8x8xf32> to vector<8xf32>
    %405 = vector.shape_cast %404 : vector<8xf32> to vector<8x1xf32>
    %406 = vector.broadcast %405 : vector<8x1xf32> to vector<8x8xf32>
    %407 = arith.divf %403, %406 : vector<8x8xf32>
    %408 = vector.extract_strided_slice %366 {offsets = [0, 8], sizes = [8, 8], strides = [1, 1]} : vector<8x32xf32> to vector<8x8xf32>
    %409 = arith.truncf %407 : vector<8x8xf32> to vector<8x8xbf16>
    %410 = arith.truncf %408 : vector<8x8xf32> to vector<8x8xbf16>
    %cst_128 = arith.constant dense<0.000000e+00> : vector<8x8xf32>
    %411 = tpu.matmul %409, %410, %cst_128 {dimension_numbers = #tpu.dot_dimension_numbers<[1], [0], [0], [1], [0, 0, 1, 1], [], []>} : vector<8x8xbf16>, vector<8x8xbf16>, vector<8x8xf32> -> vector<8x8xf32>
    %412 = vector.extract_strided_slice %367 {offsets = [8, 0], sizes = [8, 32], strides = [1, 1]} : vector<32x32xbf16> to vector<8x32xbf16>
    %413 = arith.truncf %411 : vector<8x8xf32> to vector<8x8xbf16>
    %cst_129 = arith.constant dense<0.000000e+00> : vector<8x32xf32>
    %414 = tpu.matmul %413, %412, %cst_129 {dimension_numbers = #tpu.dot_dimension_numbers<[1], [0], [0], [1], [0, 0, 1, 1], [], []>} : vector<8x8xbf16>, vector<8x32xbf16>, vector<8x32xf32> -> vector<8x32xf32>
    %415 = arith.addf %391, %414 : vector<8x32xf32>
    %416 = arith.addf %384, %407 : vector<8x8xf32>
    %417 = vector.extract_strided_slice %364 {offsets = [0, 16], sizes = [8, 8], strides = [1, 1]} : vector<8x32xf32> to vector<8x8xf32>
    %418 = vector.extract_strided_slice %365 {offsets = [0, 16], sizes = [8, 8], strides = [1, 1]} : vector<8x32xf32> to vector<8x8xf32>
    %419 = arith.truncf %417 : vector<8x8xf32> to vector<8x8xbf16>
    %420 = arith.truncf %418 : vector<8x8xf32> to vector<8x8xbf16>
    %cst_130 = arith.constant dense<0.000000e+00> : vector<8x8xf32>
    %421 = tpu.matmul %419, %420, %cst_130 {dimension_numbers = #tpu.dot_dimension_numbers<[1], [1], [0], [0], [0, 0, 1, 0], [], []>} : vector<8x8xbf16>, vector<8x8xbf16>, vector<8x8xf32> -> vector<8x8xf32>
    %cst_131 = arith.constant 0.353553385 : f32
    %422 = vector.broadcast %cst_131 : f32 to vector<8x8xf32>
    %423 = arith.mulf %421, %422 : vector<8x8xf32>
    %cst_132 = arith.constant dense<0xFF800000> : vector<8xf32>
    %424 = vector.multi_reduction <maximumf>, %423, %cst_132 [1] : vector<8x8xf32> to vector<8xf32>
    %425 = vector.shape_cast %424 : vector<8xf32> to vector<8x1xf32>
    %426 = vector.broadcast %425 : vector<8x1xf32> to vector<8x8xf32>
    %427 = arith.subf %423, %426 : vector<8x8xf32>
    %428 = math.exp %427 : vector<8x8xf32>
    %cst_133 = arith.constant dense<0.000000e+00> : vector<8xf32>
    %429 = vector.multi_reduction <add>, %428, %cst_133 [1] : vector<8x8xf32> to vector<8xf32>
    %430 = vector.shape_cast %429 : vector<8xf32> to vector<8x1xf32>
    %431 = vector.broadcast %430 : vector<8x1xf32> to vector<8x8xf32>
    %432 = arith.divf %428, %431 : vector<8x8xf32>
    %433 = vector.extract_strided_slice %366 {offsets = [0, 16], sizes = [8, 8], strides = [1, 1]} : vector<8x32xf32> to vector<8x8xf32>
    %434 = arith.truncf %432 : vector<8x8xf32> to vector<8x8xbf16>
    %435 = arith.truncf %433 : vector<8x8xf32> to vector<8x8xbf16>
    %cst_134 = arith.constant dense<0.000000e+00> : vector<8x8xf32>
    %436 = tpu.matmul %434, %435, %cst_134 {dimension_numbers = #tpu.dot_dimension_numbers<[1], [0], [0], [1], [0, 0, 1, 1], [], []>} : vector<8x8xbf16>, vector<8x8xbf16>, vector<8x8xf32> -> vector<8x8xf32>
    %437 = vector.extract_strided_slice %367 {offsets = [16, 0], sizes = [8, 32], strides = [1, 1]} : vector<32x32xbf16> to vector<8x32xbf16>
    %438 = arith.truncf %436 : vector<8x8xf32> to vector<8x8xbf16>
    %cst_135 = arith.constant dense<0.000000e+00> : vector<8x32xf32>
    %439 = tpu.matmul %438, %437, %cst_135 {dimension_numbers = #tpu.dot_dimension_numbers<[1], [0], [0], [1], [0, 0, 1, 1], [], []>} : vector<8x8xbf16>, vector<8x32xbf16>, vector<8x32xf32> -> vector<8x32xf32>
    %440 = arith.addf %415, %439 : vector<8x32xf32>
    %441 = arith.addf %416, %432 : vector<8x8xf32>
    %442 = vector.extract_strided_slice %364 {offsets = [0, 24], sizes = [8, 8], strides = [1, 1]} : vector<8x32xf32> to vector<8x8xf32>
    %443 = vector.extract_strided_slice %365 {offsets = [0, 24], sizes = [8, 8], strides = [1, 1]} : vector<8x32xf32> to vector<8x8xf32>
    %444 = arith.truncf %442 : vector<8x8xf32> to vector<8x8xbf16>
    %445 = arith.truncf %443 : vector<8x8xf32> to vector<8x8xbf16>
    %cst_136 = arith.constant dense<0.000000e+00> : vector<8x8xf32>
    %446 = tpu.matmul %444, %445, %cst_136 {dimension_numbers = #tpu.dot_dimension_numbers<[1], [1], [0], [0], [0, 0, 1, 0], [], []>} : vector<8x8xbf16>, vector<8x8xbf16>, vector<8x8xf32> -> vector<8x8xf32>
    %cst_137 = arith.constant 0.353553385 : f32
    %447 = vector.broadcast %cst_137 : f32 to vector<8x8xf32>
    %448 = arith.mulf %446, %447 : vector<8x8xf32>
    %cst_138 = arith.constant dense<0xFF800000> : vector<8xf32>
    %449 = vector.multi_reduction <maximumf>, %448, %cst_138 [1] : vector<8x8xf32> to vector<8xf32>
    %450 = vector.shape_cast %449 : vector<8xf32> to vector<8x1xf32>
    %451 = vector.broadcast %450 : vector<8x1xf32> to vector<8x8xf32>
    %452 = arith.subf %448, %451 : vector<8x8xf32>
    %453 = math.exp %452 : vector<8x8xf32>
    %cst_139 = arith.constant dense<0.000000e+00> : vector<8xf32>
    %454 = vector.multi_reduction <add>, %453, %cst_139 [1] : vector<8x8xf32> to vector<8xf32>
    %455 = vector.shape_cast %454 : vector<8xf32> to vector<8x1xf32>
    %456 = vector.broadcast %455 : vector<8x1xf32> to vector<8x8xf32>
    %457 = arith.divf %453, %456 : vector<8x8xf32>
    %458 = vector.extract_strided_slice %366 {offsets = [0, 24], sizes = [8, 8], strides = [1, 1]} : vector<8x32xf32> to vector<8x8xf32>
    %459 = arith.truncf %457 : vector<8x8xf32> to vector<8x8xbf16>
    %460 = arith.truncf %458 : vector<8x8xf32> to vector<8x8xbf16>
    %cst_140 = arith.constant dense<0.000000e+00> : vector<8x8xf32>
    %461 = tpu.matmul %459, %460, %cst_140 {dimension_numbers = #tpu.dot_dimension_numbers<[1], [0], [0], [1], [0, 0, 1, 1], [], []>} : vector<8x8xbf16>, vector<8x8xbf16>, vector<8x8xf32> -> vector<8x8xf32>
    %462 = vector.extract_strided_slice %367 {offsets = [24, 0], sizes = [8, 32], strides = [1, 1]} : vector<32x32xbf16> to vector<8x32xbf16>
    %463 = arith.truncf %461 : vector<8x8xf32> to vector<8x8xbf16>
    %cst_141 = arith.constant dense<0.000000e+00> : vector<8x32xf32>
    %464 = tpu.matmul %463, %462, %cst_141 {dimension_numbers = #tpu.dot_dimension_numbers<[1], [0], [0], [1], [0, 0, 1, 1], [], []>} : vector<8x8xbf16>, vector<8x32xbf16>, vector<8x32xf32> -> vector<8x32xf32>
    %465 = arith.addf %440, %464 : vector<8x32xf32>
    %466 = arith.addf %441, %457 : vector<8x8xf32>
    %467 = vector.broadcast %368 : vector<1x32xf32> to vector<8x32xf32>
    %468 = arith.addf %465, %467 : vector<8x32xf32>
    %cst_142 = arith.constant 2.500000e-01 : f32
    %469 = vector.broadcast %cst_142 : f32 to vector<8x8xf32>
    %470 = arith.mulf %466, %469 : vector<8x8xf32>
    %c1 = arith.constant 1 : index
    %c0_143 = arith.constant 0 : index
    %c0_144 = arith.constant 0 : index
    %471 = vector.load %arg22[%c1, %c0_143, %c0_144] : memref<2x8x8xf32, #tpu.memory_space<vmem>>, vector<1x8x8xf32>
    %472 = vector.shape_cast %471 : vector<1x8x8xf32> to vector<8x8xf32>
    %473 = vector.shape_cast %470 : vector<8x8xf32> to vector<1x8x8xf32>
    tpu.vector_store %arg22[%c1, %c0_143, %c0_144], %473 {strides = array<i32>} : memref<2x8x8xf32, #tpu.memory_space<vmem>>, vector<1x8x8xf32>,
    %474 = tpu.concatenate %358, %468 in 0 : vector<8x32xf32>, vector<8x32xf32> -> vector<16x32xf32>
    %c0_145 = arith.constant 0 : index
    %c0_146 = arith.constant 0 : index
    %475 = vector.load %arg15[%c0_145, %c0_146] : memref<1x32xf32, #tpu.memory_space<vmem>>, vector<1x32xf32>
    %c0_147 = arith.constant 0 : index
    %c0_148 = arith.constant 0 : index
    %476 = vector.load %arg16[%c0_147, %c0_148] : memref<1x32xf32, #tpu.memory_space<vmem>>, vector<1x32xf32>
    %cst_149 = arith.constant dense<0.000000e+00> : vector<16xf32>
    %477 = vector.multi_reduction <add>, %474, %cst_149 [1] : vector<16x32xf32> to vector<16xf32>
    %478 = vector.shape_cast %477 : vector<16xf32> to vector<16x1xf32>
    %cst_150 = arith.constant 3.200000e+01 : f32
    %479 = vector.broadcast %cst_150 : f32 to vector<16x1xf32>
    %480 = arith.divf %478, %479 : vector<16x1xf32>
    %481 = vector.broadcast %480 : vector<16x1xf32> to vector<16x32xf32>
    %482 = arith.subf %474, %481 : vector<16x32xf32>
    %483 = arith.mulf %482, %482 : vector<16x32xf32>
    %cst_151 = arith.constant dense<0.000000e+00> : vector<16xf32>
    %484 = vector.multi_reduction <add>, %483, %cst_151 [1] : vector<16x32xf32> to vector<16xf32>
    %485 = vector.shape_cast %484 : vector<16xf32> to vector<16x1xf32>
    %cst_152 = arith.constant 3.200000e+01 : f32
    %486 = vector.broadcast %cst_152 : f32 to vector<16x1xf32>
    %487 = arith.divf %485, %486 : vector<16x1xf32>
    %488 = vector.broadcast %480 : vector<16x1xf32> to vector<16x32xf32>
    %489 = arith.subf %474, %488 : vector<16x32xf32>
    %cst_153 = arith.constant 9.99999974E-6 : f32
    %490 = vector.broadcast %cst_153 : f32 to vector<16x1xf32>
    %491 = arith.addf %487, %490 : vector<16x1xf32>
    %492 = math.rsqrt %491 : vector<16x1xf32>
    %493 = vector.broadcast %492 : vector<16x1xf32> to vector<16x32xf32>
    %494 = arith.mulf %489, %493 : vector<16x32xf32>
    %495 = vector.broadcast %475 : vector<1x32xf32> to vector<16x32xf32>
    %496 = arith.mulf %494, %495 : vector<16x32xf32>
    %497 = vector.broadcast %476 : vector<1x32xf32> to vector<16x32xf32>
    %498 = arith.addf %496, %497 : vector<16x32xf32>
    %c0_154 = arith.constant 0 : index
    %c0_155 = arith.constant 0 : index
    %499 = vector.load %arg17[%c0_154, %c0_155] : memref<32x128xbf16, #tpu.memory_space<vmem>>, vector<32x128xbf16>
    %c0_156 = arith.constant 0 : index
    %c0_157 = arith.constant 0 : index
    %500 = vector.load %arg18[%c0_156, %c0_157] : memref<1x128xf32, #tpu.memory_space<vmem>>, vector<1x128xf32>
    %c0_158 = arith.constant 0 : index
    %c0_159 = arith.constant 0 : index
    %501 = vector.load %arg19[%c0_158, %c0_159] : memref<128x32xbf16, #tpu.memory_space<vmem>>, vector<128x32xbf16>
    %c0_160 = arith.constant 0 : index
    %c0_161 = arith.constant 0 : index
    %502 = vector.load %arg20[%c0_160, %c0_161] : memref<1x32xf32, #tpu.memory_space<vmem>>, vector<1x32xf32>
    %503 = arith.truncf %498 : vector<16x32xf32> to vector<16x32xbf16>
    %cst_162 = arith.constant dense<0.000000e+00> : vector<16x128xf32>
    %504 = tpu.matmul %503, %499, %cst_162 {dimension_numbers = #tpu.dot_dimension_numbers<[1], [0], [0], [1], [0, 0, 1, 1], [], []>} : vector<16x32xbf16>, vector<32x128xbf16>, vector<16x128xf32> -> vector<16x128xf32>
    %505 = vector.broadcast %500 : vector<1x128xf32> to vector<16x128xf32>
    %506 = arith.addf %504, %505 : vector<16x128xf32>
    %cst_163 = arith.constant 0.000000e+00 : f32
    %507 = vector.broadcast %cst_163 : f32 to vector<16x128xf32>
    %508 = arith.maximumf %506, %507 : vector<16x128xf32>
    %509 = arith.truncf %508 : vector<16x128xf32> to vector<16x128xbf16>
    %cst_164 = arith.constant dense<0.000000e+00> : vector<16x32xf32>
    %510 = tpu.matmul %509, %501, %cst_164 {dimension_numbers = #tpu.dot_dimension_numbers<[1], [0], [0], [1], [0, 0, 1, 1], [], []>} : vector<16x128xbf16>, vector<128x32xbf16>, vector<16x32xf32> -> vector<16x32xf32>
    %511 = vector.broadcast %502 : vector<1x32xf32> to vector<16x32xf32>
    %512 = arith.addf %510, %511 : vector<16x32xf32>
    %513 = vector.extract_strided_slice %512 {offsets = [0, 0], sizes = [8, 32], strides = [1, 1]} : vector<16x32xf32> to vector<8x32xf32>
    %cst_165 = arith.constant dense<0.000000e+00> : vector<32xf32>
    %514 = vector.multi_reduction <add>, %513, %cst_165 [0] : vector<8x32xf32> to vector<32xf32>
    %515 = vector.shape_cast %514 : vector<32xf32> to vector<1x32xf32>
    %cst_166 = arith.constant 8.000000e+00 : f32
    %516 = vector.broadcast %cst_166 : f32 to vector<1x32xf32>
    %517 = arith.divf %515, %516 : vector<1x32xf32>
    %518 = vector.extract_strided_slice %512 {offsets = [8, 0], sizes = [8, 32], strides = [1, 1]} : vector<16x32xf32> to vector<8x32xf32>
    %cst_167 = arith.constant dense<0.000000e+00> : vector<32xf32>
    %519 = vector.multi_reduction <add>, %518, %cst_167 [0] : vector<8x32xf32> to vector<32xf32>
    %520 = vector.shape_cast %519 : vector<32xf32> to vector<1x32xf32>
    %cst_168 = arith.constant 8.000000e+00 : f32
    %521 = vector.broadcast %cst_168 : f32 to vector<1x32xf32>
    %522 = arith.divf %520, %521 : vector<1x32xf32>
    %523 = tpu.concatenate %517, %522 in 0 : vector<1x32xf32>, vector<1x32xf32> -> vector<2x32xf32>
    %c0_169 = arith.constant 0 : index
    %c0_170 = arith.constant 0 : index
    %524 = vector.load %arg21[%c0_169, %c0_170] : memref<2x32xf32, #tpu.memory_space<vmem>>, vector<2x32xf32>
    tpu.vector_store %arg21[%c0_169, %c0_170], %523 {strides = array<i32>} : memref<2x32xf32, #tpu.memory_space<vmem>>, vector<2x32xf32>,
    return
  }
  func.func @transform_0(%arg0: i32) -> (i32, i32) {
    %c0_i32 = arith.constant 0 : i32
    %c0_i32_0 = arith.constant 0 : i32
    %c0_i32_1 = arith.constant 0 : i32
    return %c0_i32, %c0_i32_0 : i32, i32
  }
  func.func @transform_1(%arg0: i32) -> (i32, i32) {
    %c0_i32 = arith.constant 0 : i32
    %c0_i32_0 = arith.constant 0 : i32
    %c0_i32_1 = arith.constant 0 : i32
    return %c0_i32, %c0_i32_0 : i32, i32
  }
  func.func @transform_2(%arg0: i32) -> (i32, i32) {
    %c0_i32 = arith.constant 0 : i32
    %c0_i32_0 = arith.constant 0 : i32
    %c0_i32_1 = arith.constant 0 : i32
    return %c0_i32, %c0_i32_0 : i32, i32
  }
  func.func @transform_3(%arg0: i32) -> (i32, i32) {
    %c0_i32 = arith.constant 0 : i32
    %c0_i32_0 = arith.constant 0 : i32
    %c0_i32_1 = arith.constant 0 : i32
    return %c0_i32, %c0_i32_0 : i32, i32
  }
  func.func @transform_4(%arg0: i32) -> (i32, i32) {
    %c0_i32 = arith.constant 0 : i32
    %c0_i32_0 = arith.constant 0 : i32
    %c0_i32_1 = arith.constant 0 : i32
    return %c0_i32, %c0_i32_0 : i32, i32
  }
  func.func @transform_5(%arg0: i32) -> (i32, i32) {
    %c0_i32 = arith.constant 0 : i32
    %c0_i32_0 = arith.constant 0 : i32
    %c0_i32_1 = arith.constant 0 : i32
    return %c0_i32, %c0_i32_0 : i32, i32
  }
  func.func @transform_6(%arg0: i32) -> (i32, i32) {
    %c0_i32 = arith.constant 0 : i32
    %c0_i32_0 = arith.constant 0 : i32
    %c0_i32_1 = arith.constant 0 : i32
    return %c0_i32, %c0_i32_0 : i32, i32
  }
  func.func @transform_7(%arg0: i32) -> (i32, i32) {
    %c0_i32 = arith.constant 0 : i32
    %c0_i32_0 = arith.constant 0 : i32
    %c0_i32_1 = arith.constant 0 : i32
    return %c0_i32, %c0_i32_0 : i32, i32
  }
  func.func @transform_8(%arg0: i32) -> (i32, i32) {
    %c0_i32 = arith.constant 0 : i32
    %c0_i32_0 = arith.constant 0 : i32
    %c0_i32_1 = arith.constant 0 : i32
    return %c0_i32, %c0_i32_0 : i32, i32
  }
  func.func @transform_9(%arg0: i32) -> (i32, i32) {
    %c0_i32 = arith.constant 0 : i32
    %c0_i32_0 = arith.constant 0 : i32
    %c0_i32_1 = arith.constant 0 : i32
    return %c0_i32, %c0_i32_0 : i32, i32
  }
  func.func @transform_10(%arg0: i32) -> (i32, i32) {
    %c0_i32 = arith.constant 0 : i32
    %c0_i32_0 = arith.constant 0 : i32
    %c0_i32_1 = arith.constant 0 : i32
    return %c0_i32, %c0_i32_0 : i32, i32
  }
  func.func @transform_11(%arg0: i32) -> (i32, i32) {
    %c0_i32 = arith.constant 0 : i32
    %c0_i32_0 = arith.constant 0 : i32
    %c0_i32_1 = arith.constant 0 : i32
    return %c0_i32, %c0_i32_0 : i32, i32
  }
  func.func @transform_12(%arg0: i32) -> (i32, i32) {
    %c0_i32 = arith.constant 0 : i32
    %c0_i32_0 = arith.constant 0 : i32
    %c0_i32_1 = arith.constant 0 : i32
    return %c0_i32, %c0_i32_0 : i32, i32
  }
  func.func @transform_13(%arg0: i32) -> (i32, i32) {
    %c0_i32 = arith.constant 0 : i32
    %c0_i32_0 = arith.constant 0 : i32
    %c0_i32_1 = arith.constant 0 : i32
    return %c0_i32, %c0_i32_0 : i32, i32
  }
  func.func @transform_14(%arg0: i32) -> (i32, i32) {
    %c0_i32 = arith.constant 0 : i32
    %c0_i32_0 = arith.constant 0 : i32
    %c0_i32_1 = arith.constant 0 : i32
    return %c0_i32, %c0_i32_0 : i32, i32
  }
  func.func @transform_15(%arg0: i32) -> (i32, i32) {
    %c0_i32 = arith.constant 0 : i32
    %c0_i32_0 = arith.constant 0 : i32
    %c0_i32_1 = arith.constant 0 : i32
    return %c0_i32, %c0_i32_0 : i32, i32
  }
  func.func @transform_16(%arg0: i32) -> (i32, i32) {
    %c0_i32 = arith.constant 0 : i32
    %c0_i32_0 = arith.constant 0 : i32
    %c0_i32_1 = arith.constant 0 : i32
    return %c0_i32, %c0_i32_0 : i32, i32
  }
  func.func @transform_17(%arg0: i32) -> (i32, i32) {
    %c0_i32 = arith.constant 0 : i32
    %c0_i32_0 = arith.constant 0 : i32
    %c0_i32_1 = arith.constant 0 : i32
    return %c0_i32, %c0_i32_0 : i32, i32
  }
  func.func @transform_18(%arg0: i32) -> (i32, i32) {
    %c0_i32 = arith.constant 0 : i32
    %c0_i32_0 = arith.constant 0 : i32
    %c0_i32_1 = arith.constant 0 : i32
    return %c0_i32, %c0_i32_0 : i32, i32
  }
  func.func @transform_19(%arg0: i32) -> (i32, i32) {
    %c0_i32 = arith.constant 0 : i32
    %c0_i32_0 = arith.constant 0 : i32
    %c0_i32_1 = arith.constant 0 : i32
    return %c0_i32, %c0_i32_0 : i32, i32
  }
  func.func @transform_20(%arg0: i32) -> (i32, i32) {
    %c0_i32 = arith.constant 0 : i32
    %c0_i32_0 = arith.constant 0 : i32
    %c0_i32_1 = arith.constant 0 : i32
    return %c0_i32, %c0_i32_0 : i32, i32
  }
  func.func @transform_21(%arg0: i32) -> (i32, i32, i32) {
    %c0_i32 = arith.constant 0 : i32
    %c0_i32_0 = arith.constant 0 : i32
    %c0_i32_1 = arith.constant 0 : i32
    %c0_i32_2 = arith.constant 0 : i32
    return %c0_i32, %c0_i32_0, %c0_i32_1 : i32, i32, i32
  }
}

</mosaic_0001>

<bundles_post_ra>
// kernel: tpu_custom_call.1
= control target key start
LH: loop header
LB: loop body
LE: loop exit
PB: predicated region body
PF: predicated region fallthrough
CT: control target
= control target key end

     0   :  { %s4950_s0 = inlined_call_operand.vmem [shape: f32[16,32], index: 0, kind: input, shape index: {}]   ;;  %s4951_s1 = inlined_call_operand.vmem [shape: f32[16,32], index: 1, kind: input, shape index: {}]   ;;  %s4952_s2 = inlined_call_operand.vmem [shape: bf16[32,96], index: 2, kind: input, shape index: {}]   ;;  %s4953_s3 = inlined_call_operand.vmem [shape: f32[1,96], index: 3, kind: input, shape index: {}]   ;;  %s4954_s4 = inlined_call_operand.vmem [shape: bf16[32,32], index: 4, kind: input, shape index: {}]   ;;  %s4955_s5 = inlined_call_operand.hbm [shape: f32[1,32], index: 5, kind: input, shape index: {}]   ;;  %s4956_s6 = inlined_call_operand.vmem [shape: bf16[32,32], index: 6, kind: input, shape index: {}]   ;;  %s4957_s7 = inlined_call_operand.hbm [shape: f32[1,32], index: 7, kind: input, shape index: {}]   ;;  %s4958_s8 = inlined_call_operand.hbm [shape: bf16[32,64], index: 8, kind: input, shape index: {}]   ;;  %s4959_s9 = inlined_call_operand.hbm [shape: f32[1,64], index: 9, kind: input, shape index: {}]   ;;  %s4960_s10 = inlined_call_operand.vmem [shape: bf16[32,32], index: 10, kind: input, shape index: {}]   ;;  %s4961_s11 = inlined_call_operand.hbm [shape: f32[1,32], index: 11, kind: input, shape index: {}]   ;;  %s4962_s12 = inlined_call_operand.hbm [shape: f32[1,32], index: 12, kind: input, shape index: {}]   ;;  %s4963_s13 = inlined_call_operand.hbm [shape: f32[1,32], index: 13, kind: input, shape index: {}]   ;;  %s4964_s14 = inlined_call_operand.vmem [shape: f32[1,32], index: 14, kind: input, shape index: {}]   ;;  %s4965_s15 = inlined_call_operand.vmem [shape: f32[1,32], index: 15, kind: input, shape index: {}]   ;;  %s4966_s16 = inlined_call_operand.vmem [shape: bf16[32,128], index: 16, kind: input, shape index: {}]   ;;  %s4967_s17 = inlined_call_operand.vmem [shape: f32[1,128], index: 17, kind: input, shape index: {}]   ;;  %s4968_s18 = inlined_call_operand.vmem [shape: bf16[128,32], index: 18, kind: input, shape index: {}]   ;;  %s4969_s19 = inlined_call_operand.vmem [shape: f32[1,32], index: 19, kind: input, shape index: {}]   ;;  %s4970_s20 = inlined_call_operand.hbm [shape: f32[2,32], index: 20, kind: output, shape index: {0}]   ;;  %s4971_s21 = inlined_call_operand.hbm [shape: f32[2,8,8], index: 21, kind: output, shape index: {1}]  }
   0x1   :  { %4977 = sst [smem:[#allocation23_spill]] %s4950_s0 }
   0x2   :  { %4978 = sst [smem:[#allocation24_spill]] %s4951_s1 }
   0x3   :  { %4979 = sst [smem:[#allocation25_spill]] %s4952_s2 }
   0x4   :  { %4980 = sst [smem:[#allocation26_spill]] %s4953_s3 }
   0x5   :  { %4981 = sst [smem:[#allocation27_spill]] %s4954_s4 }
   0x6   :  { %4982 = sst [smem:[#allocation28_spill]] %s4955_s5 }
   0x7   :  { %27 = vsyncpa [#allocation3], 0 }
   0x8   :  { %28 = vsyncpa [#allocation6], 0 }
   0x9   :  { %29 = vsyncpa [#allocation9], 0 }
   0xa   :  { %30 = vsyncpa [#allocation12], 0 }
   0xb   :  { %31 = vsyncpa [#allocation4], 0 }
   0xc   :  { %32 = vsyncpa [#allocation16], 0  ;;  %s4123_s2 = smov [#allocation5]   ;;  %s4124_s26 = smov [#allocation8]  }
   0xd   :  { %s61_s25 = sshll.u32 %s4123_s2, 4  ;;  %s83_s27 = sshll.u32 %s4124_s26, 4  ;;  %s62_s25 = int_to_ptr.vmem [resolvable:$true] %s61_s25  ;;  %s84_s27 = int_to_ptr.vmem [resolvable:$true] %s83_s27 }
   0xe   :  { %s3913_s29 = scalar_lea.hbm %s4957_s7, 16 }
   0xf   :  { %p3914_p0 = scmp.ne.s32.totalorder %s4957_s7, %s3913_s29  ;;  %p3917_p1 = scmp.lt.u32.totalorder %s3913_s29, %s4957_s7 }
  0x11   :  { %p3919_p2 = pnand %p3917_p1, %p3914_p0 }
  0x13   :  { %3922 = shalt.err (!%p3919_p2)
}
  0x14   :  { %s3923_s22 = scalar_lea.vmem %s62_s25, 16  ;;  %s3927_s23 = scalar_lea.vmem %s62_s25, 32 }
  0x15   :  { %p3924_p3 = scmp.ne.s32.totalorder %s62_s25, %s3923_s22  ;;  %p3928_p4 = scmp.lt.s32.totalorder %s62_s25, %s62_s25 }
  0x16   :  { %p3929_p5 = scmp.lt.s32.totalorder %s3927_s23, %s3923_s22 }
  0x18   :  { %p3930_p6 = por %p3929_p5, %p3928_p4 }
  0x1a   :  { %p3931_p7 = pnand %p3930_p6, %p3924_p3 }
  0x1c   :  { %3934 = shalt.err (!%p3931_p7)
}
  0x1d   :  { %64 = dma.hbm_to_vmem [thread:$0]  %s4957_s7, 16, %s62_s25, [#allocation6]  }
  0x1e   :  { %s3935_s3 = scalar_lea.hbm %s4959_s9, 16 }
  0x1f   :  { %p3936_p8 = scmp.ne.s32.totalorder %s4959_s9, %s3935_s3  ;;  %p3939_p9 = scmp.lt.u32.totalorder %s3935_s3, %s4959_s9 }
  0x21   :  { %p3941_p10 = pnand %p3939_p9, %p3936_p8 }
  0x23   :  { %3944 = shalt.err (!%p3941_p10)
}
  0x24   :  { %s3945_s30 = scalar_lea.vmem %s84_s27, 16  ;;  %s3949_s5 = scalar_lea.vmem %s84_s27, 32 }
  0x25   :  { %p3946_p11 = scmp.ne.s32.totalorder %s84_s27, %s3945_s30  ;;  %p3950_p12 = scmp.lt.s32.totalorder %s84_s27, %s84_s27 }
  0x26   :  { %p3951_p13 = scmp.lt.s32.totalorder %s3949_s5, %s3945_s30 }
  0x28   :  { %p3952_p0 = por %p3951_p13, %p3950_p12 }
  0x2a   :  { %p3953_p1 = pnand %p3952_p0, %p3946_p11 }
  0x2c   :  { %3956 = shalt.err (!%p3953_p1)
}
  0x2d   :  { %86 = dma.hbm_to_vmem [thread:$0]  %s4959_s9, 16, %s84_s27, [#allocation9]  }
  0x2e   :  { %s4125_s22 = smov [#allocation11]   ;;  %s4126_s1 = smov [#allocation2]  }
  0x2f   :  { %s105_s23 = sshll.u32 %s4125_s22, 4  ;;  %s49_s24 = sshll.u32 %s4126_s1, 4  ;;  %s106_s23 = int_to_ptr.vmem [resolvable:$true] %s105_s23  ;;  %s50_s24 = int_to_ptr.vmem [resolvable:$true] %s49_s24 }
  0x30   :  { %s3957_s3 = scalar_lea.hbm %s4962_s12, 16 }
  0x31   :  { %p3958_p2 = scmp.ne.s32.totalorder %s4962_s12, %s3957_s3  ;;  %p3961_p3 = scmp.lt.u32.totalorder %s3957_s3, %s4962_s12 }
  0x33   :  { %p3963_p4 = pnand %p3961_p3, %p3958_p2 }
  0x35   :  { %3966 = shalt.err (!%p3963_p4)
}
  0x36   :  { %s3967_s9 = scalar_lea.vmem %s106_s23, 16  ;;  %s3971_s27 = scalar_lea.vmem %s106_s23, 32 }
  0x37   :  { %p3968_p5 = scmp.ne.s32.totalorder %s106_s23, %s3967_s9  ;;  %p3972_p6 = scmp.lt.s32.totalorder %s106_s23, %s106_s23 }
  0x38   :  { %p3973_p7 = scmp.lt.s32.totalorder %s3971_s27, %s3967_s9 }
  0x3a   :  { %p3974_p8 = por %p3973_p7, %p3972_p6 }
  0x3c   :  { %p3975_p9 = pnand %p3974_p8, %p3968_p5 }
  0x3e   :  { %3978 = shalt.err (!%p3975_p9)
}
  0x3f   :  { %108 = dma.hbm_to_vmem [thread:$0]  %s4962_s12, 16, %s106_s23, [#allocation12]  }
  0x40   :  { %s4983_s22 = sld [smem:[#allocation28_spill]] }
  0x46   :  { %s3979_s1 = scalar_lea.hbm %s4983_s22, 16 }
  0x47   :  { %p3980_p10 = scmp.ne.s32.totalorder %s4983_s22, %s3979_s1  ;;  %p3983_p11 = scmp.lt.u32.totalorder %s3979_s1, %s4983_s22 }
  0x49   :  { %p3985_p12 = pnand %p3983_p11, %p3980_p10 }
  0x4b   :  { %3988 = shalt.err (!%p3985_p12)
}
  0x4c   :  { %s3989_s29 = scalar_lea.vmem %s50_s24, 16  ;;  %s3993_s0 = scalar_lea.vmem %s50_s24, 32 }
  0x4d   :  { %p3990_p13 = scmp.ne.s32.totalorder %s50_s24, %s3989_s29  ;;  %p3994_p0 = scmp.lt.s32.totalorder %s50_s24, %s50_s24 }
  0x4e   :  { %p3995_p1 = scmp.lt.s32.totalorder %s3993_s0, %s3989_s29 }
  0x50   :  { %p3996_p2 = por %p3995_p1, %p3994_p0 }
  0x52   :  { %p3997_p3 = pnand %p3996_p2, %p3990_p13 }
  0x54   :  { %4000 = shalt.err (!%p3997_p3)
}
  0x55   :  { %52 = dma.hbm_to_vmem [thread:$0]  %s4983_s22, 16, %s50_s24, [#allocation3]  }
  0x56   :  { %s4127_s4 = smov [#allocation7]   ;;  %s4001_s5 = scalar_lea.hbm %s4958_s8, 256 }
  0x57   :  { %s70_s9 = sshll.u32 %s4127_s4, 4  ;;  %p4002_p4 = scmp.ne.s32.totalorder %s4958_s8, %s4001_s5  ;;  %s71_s9 = int_to_ptr.vmem [resolvable:$true] %s70_s9 }
  0x58   :  { %p4005_p5 = scmp.lt.u32.totalorder %s4001_s5, %s4958_s8 }
  0x5a   :  { %p4007_p6 = pnand %p4005_p5, %p4002_p4 }
  0x5c   :  { %4010 = shalt.err (!%p4007_p6)
}
  0x5d   :  { %s4011_s26 = scalar_lea.vmem %s71_s9, 256  ;;  %p4016_p8 = scmp.lt.s32.totalorder %s71_s9, %s71_s9 }
  0x5e   :  { %p4012_p7 = scmp.ne.s32.totalorder %s71_s9, %s4011_s26  ;;  %p4017_p9 = scmp.lt.s32.totalorder %s4011_s26, %s4011_s26 }
  0x60   :  { %p4018_p10 = por %p4017_p9, %p4016_p8 }
  0x62   :  { %p4019_p11 = pnand %p4018_p10, %p4012_p7 }
  0x64   :  { %4022 = shalt.err (!%p4019_p11)
}
  0x65   :  { %s4128_s24 = smov 64   ;;  %s4129_s22 = smov 4  }
  0x66   :  { %76 = dma.hbm_to_vmem [thread:$0]  %s4958_s8, 256, %s71_s9, [#allocation6], %s4128_s24, %s4128_s24, %s4129_s22  }
  0x67   :  { %s4130_s29 = smov [#allocation10]   ;;  %s4131_s12 = smov [#allocation13]  }
  0x68   :  { %s95_s0 = sshll.u32 %s4130_s29, 4  ;;  %s115_s23 = sshll.u32 %s4131_s12, 4  ;;  %s96_s0 = int_to_ptr.vmem [resolvable:$true] %s95_s0  ;;  %s116_s23 = int_to_ptr.vmem [resolvable:$true] %s115_s23 }
  0x69   :  { %s4023_s30 = scalar_lea.hbm %s4961_s11, 16 }
  0x6a   :  { %p4024_p12 = scmp.ne.s32.totalorder %s4961_s11, %s4023_s30  ;;  %p4027_p13 = scmp.lt.u32.totalorder %s4023_s30, %s4961_s11 }
  0x6c   :  { %p4029_p0 = pnand %p4027_p13, %p4024_p12 }
  0x6e   :  { %4032 = shalt.err (!%p4029_p0)
}
  0x6f   :  { %s4033_s8 = scalar_lea.vmem %s96_s0, 16  ;;  %s4037_s9 = scalar_lea.vmem %s96_s0, 32 }
  0x70   :  { %p4034_p1 = scmp.ne.s32.totalorder %s96_s0, %s4033_s8  ;;  %p4038_p2 = scmp.lt.s32.totalorder %s96_s0, %s96_s0 }
  0x71   :  { %p4039_p3 = scmp.lt.s32.totalorder %s4037_s9, %s4033_s8 }
  0x73   :  { %p4040_p4 = por %p4039_p3, %p4038_p2 }
  0x75   :  { %p4041_p5 = pnand %p4040_p4, %p4034_p1 }
  0x77   :  { %4044 = shalt.err (!%p4041_p5)
}
  0x78   :  { %98 = dma.hbm_to_vmem [thread:$0]  %s4961_s11, 16, %s96_s0, [#allocation9]  }
  0x79   :  { %s4045_s28 = scalar_lea.hbm %s4963_s13, 16 }
  0x7a   :  { %p4046_p6 = scmp.ne.s32.totalorder %s4963_s13, %s4045_s28  ;;  %p4049_p7 = scmp.lt.u32.totalorder %s4045_s28, %s4963_s13 }
  0x7c   :  { %p4051_p8 = pnand %p4049_p7, %p4046_p6 }
  0x7e   :  { %4054 = shalt.err (!%p4051_p8)
}
  0x7f   :  { %s4055_s30 = scalar_lea.vmem %s116_s23, 16  ;;  %s4059_s5 = scalar_lea.vmem %s116_s23, 32 }
  0x80   :  { %p4056_p9 = scmp.ne.s32.totalorder %s116_s23, %s4055_s30  ;;  %p4060_p10 = scmp.lt.s32.totalorder %s116_s23, %s116_s23 }
  0x81   :  { %p4061_p11 = scmp.lt.s32.totalorder %s4059_s5, %s4055_s30 }
  0x83   :  { %p4062_p12 = por %p4061_p11, %p4060_p10 }
  0x85   :  { %p4063_p13 = pnand %p4062_p12, %p4056_p9 }
  0x87   :  { %4066 = shalt.err (!%p4063_p13)
}
  0x88   :  { %118 = dma.hbm_to_vmem [thread:$0]  %s4963_s13, 16, %s116_s23, [#allocation12]  }
  0x89   :  { %4111 = dma.done.wait [#allocation3], 16  }
  0x8a   :  { %4112 = vsyncadd [#allocation3], 4294967280 }
  0x8b   :  { %4113 = dma.done.wait [#allocation6], 272  }
  0x8c   :  { %4114 = vsyncadd [#allocation6], 4294967024 }
  0x8d   :  { %4115 = dma.done.wait [#allocation9], 32  }
  0x8e   :  { %4116 = vsyncadd [#allocation9], 4294967264 }
  0x8f   :  { %4117 = dma.done.wait [#allocation12], 32  }
  0x90   :  { %4118 = vsyncadd [#allocation12], 4294967264  ;;  %v4132_v0 = vmov 0.0   ;;  %vm4133_vm0 = vmmov 0   ;;  %s4984_s7 = sld [smem:[#allocation25_spill]]  ;;  %s4985_s2 = sld [smem:[#allocation23_spill]] }
  0x91   :  { %3460 = vmatprep.subr.bf16.mxu1 %v4132_v0  ;;  %3464 = vmatprep.mubr.msk.bf16.mxu1 %vm4133_vm0, %v4132_v0  ;;  %vm181_vm1 = vcmask 261120   ;;  %s4986_s29 = sld [smem:[#allocation26_spill]]  ;;  %s4134_s12 = smov 96   ;;  %vm235_vm2 = vcmask 64512   ;;  %vm300_vm3 = vcmask 1043456  }
  0x92   :  { %3486 = vmatprep.subr.bf16.mxu0 %v4132_v0  ;;  %3488 = vmatprep.mubr.msk.bf16.mxu0 %vm4133_vm0, %v4132_v0  ;;  %s4135_s4 = smov 88   ;;  %s4136_s27 = smov 120  }
  0x93   :  { %s4137_s30 = smov 56   ;;  %s4138_s5 = smov 80  }
  0x94   :  { %s4139_s11 = smov 112   ;;  %s4987_s23 = sld [smem:[#allocation27_spill]] }
  0x95   :  { %s4140_s1 = smov 48   ;;  %s4141_s8 = smov 72  }
  0x96   :  { %v3825_v1 = vld [vmem:[%s4984_s7] sm:$0xff]   ;;  %v3826_v2 = vld [vmem:[%s4984_s7 + $0x8] sm:$0xff]   ;;  %s4142_s9 = smov 104  }
  0x97   :  { %3461 = vmatpush3.bf16.msra.mxu1 %v3825_v1  ;;  %v153_v3 = vld [vmem:[%s4985_s2] sm:$0xff]  ;;  %v154_v4 = vld [vmem:[%s4985_s2 + $0x8] sm:$0xff]  ;;  %s4143_s2 = smov 40  }
  0x98   :  { %3462 = vmatprep.subr.bf16.mxu1 %v4132_v0  ;;  %v161_v5 = vpack.c.bf16 %v154_v4, %v153_v3  ;;  %v3263_v6 = vld [vmem:[%s4986_s29] ss:$0 sm:$0xff] }
  0x9a   :  { %v227_v51 = vld [vmem:[%s4987_s23 + $0x4] sm:$0xf]  ;;  %v226_v57 = vld [vmem:[%s4987_s23] sm:$0xf] }
  0x9b   :  { %3463 = vmatpush3.bf16.msra.mxu1 %v3826_v2  ;;  %v4412_v52 = vsel %vm300_vm3, %v227_v51, 0  ;;  %v4422_v60 = vsel %vm300_vm3, %v226_v57, 0 }
  0x9c   :  { %3468 = vmatprep.subr.bf16.mxu1 %v4132_v0 }
  0x9e   :  { %3465 = vmatmul.mubr.msk.bf16.vlgmr.msra.gmra.mrb[0].mxu1 %vm181_vm1, %v161_v5 }
  0x9f   :  { %3470 = vmatprep.mubr.msk.bf16.mxu1 %vm4133_vm0, %v4132_v0 }
 0x171   :  { %v219_v7 = vpop.f32.mrb[0].mxu1 }
 0x172   :  { %v220_v8 = vadd.f32 %v3263_v6, %v219_v7  ;;  %v3466_v9 = vpop.f32.mrb[1].mxu1 }
 0x173   :  { %v222_v10 = vpop.f32.mrb[2].mxu1 }
 0x174   :  { %v4370_v11 = vpack.c.bf16 %v220_v8, %v220_v8  ;;  %v4372_v12 = vadd.f32 %v3263_v6, %v222_v10  ;;  %v3467_v13 = vpop.f32.mrb[3].mxu1 }
 0x176   :  { %295 = vrot.lane.b32.xlu1 %v4370_v11, %s4128_s24  ;;  %233 = vrot.lane.b32.xlu0 %v4370_v11, %s4134_s12 }
 0x1e8   :  { %v234_v14 = vpop.permute.xlu0 %233  ;;  %v296_v16 = vpop.permute.xlu1 %295 }
 0x1e9   :  { %v240_v15 = vsel %vm235_vm2, %v234_v14, 0  ;;  %v302_v17 = vsel %vm300_vm3, %v296_v16, 0 }
 0x1ea   :  { %3469 = vmatpush3.bf16.xpose.msra.mxu1 %v240_v15 }
 0x1eb   :  { %3474 = vmatprep.subr.bf16.mxu1 %v4132_v0 }
 0x1f1   :  { %3471 = vmatmul.mubr.msk.bf16.vlgmr.msra.gmra.mrb[4].mxu1 %vm235_vm2, %v4370_v11 }
 0x1f2   :  { %3475 = vmatpush3.bf16.msra.mxu1 %v302_v17  ;;  %3476 = vmatprep.mubr.msk.bf16.mxu1 %vm4133_vm0, %v4132_v0 }
 0x1f3   :  { %3480 = vmatprep.subr.bf16.mxu1 %v4132_v0 }
 0x2c4   :  { %v276_v18 = vpop.f32.mrb[4].mxu1 }
 0x2c5   :  { %v282_v19 = vmul.f32 0.35355338, %v276_v18  ;;  %v3472_v20 = vpop.f32.mrb[5].mxu1 }
 0x2c6   :  { %v279_v21 = vpop.f32.mrb[6].mxu1 }
 0x2c7   :  { %v3473_v22 = vpop.f32.mrb[7].mxu1  ;;  %v283_v23 = vsel %vm235_vm2, %v282_v19, -inf }
 0x2c8   :  { %284 = vmax.xlane.f32.xlu0 %v283_v23 }
 0x355   :  { %v285_v24 = vpop.xlane.xlu0 %284 }
 0x356   :  { %v286_v25 = vsub.f32 %v282_v19, %v285_v24 }
 0x358   :  { %v287_v26 = vmul.f32 1.442695, %v286_v25 }
 0x35a   :  { %3841 = vpow2.f32 %v287_v26 }
 0x364   :  { %v3842_v27 = vpop.eup %3841 }
 0x365   :  { %v289_v28 = vsel %vm235_vm2, %v3842_v27, 0.0 }
 0x366   :  { %290 = vadd.xlane.f32.xlu1 %v289_v28 }
 0x377   :  { %347 = vrot.lane.b32.xlu1 %v4370_v11, %s4135_s4 }
 0x37b   :  { %345 = vrot.lane.b32.xlu1 %v4370_v11, %s4136_s27 }
 0x3f3   :  { %v291_v29 = vpop.xlane.xlu1 %290 }
 0x3f4   :  { %3843 = vrcp.f32 %v291_v29 }
 0x3f7   :  { %v348_v32 = vpop.permute.xlu1 %347 }
 0x3f8   :  { %v353_v34 = vsel %vm235_vm2, %v348_v32, 0 }
 0x3fb   :  { %v346_v35 = vpop.permute.xlu1 %345 }
 0x3fe   :  { %v3844_v30 = vpop.eup %3843 }
 0x3ff   :  { %v293_v31 = vmul.f32 %v3844_v30, %v3842_v27 }
 0x401   :  { %v294_v33 = vpack.c.bf16 %v293_v31, %v293_v31  ;;  %v228_v31 = vld [vmem:[%s4987_s23 + $0x8] sm:$0xf] }
 0x402   :  { %v4458_v32 = vsel %vm300_vm3, %v228_v31, 0 }
 0x403   :  { %3477 = vmatmul.mubr.msk.bf16.vlgmr.msra.gmra.mrb[8].mxu1 %vm235_vm2, %v294_v33 }
 0x404   :  { %3481 = vmatpush3.bf16.xpose.msra.mxu1 %v353_v34  ;;  %3482 = vmatprep.mubr.msk.bf16.mxu1 %vm4133_vm0, %v4132_v0 }
 0x405   :  { %3492 = vmatprep.subr.bf16.mxu1 %v4132_v0 }
 0x40b   :  { %3483 = vmatmul.mubr.msk.bf16.vlgmr.msra.gmra.mrb[12].mxu1 %vm235_vm2, %v346_v35 }
 0x40c   :  { %3494 = vmatprep.mubr.msk.bf16.mxu1 %vm4133_vm0, %v4132_v0  ;;  %3493 = vmatpush3.bf16.msra.mxu1 %v4412_v52 }
 0x40d   :  { %3504 = vmatprep.subr.bf16.mxu1 %v4132_v0 }
 0x4d6   :  { %v338_v36 = vpop.f32.mrb[8].mxu1 }
 0x4d7   :  { %v3478_v37 = vpop.f32.mrb[9].mxu1  ;;  %v344_v61 = vpack.c.bf16 %v338_v36, %v338_v36 }
 0x4d8   :  { %v341_v38 = vpop.f32.mrb[10].mxu1 }
 0x4d9   :  { %v3479_v39 = vpop.f32.mrb[11].mxu1 }
 0x4de   :  { %v389_v40 = vpop.f32.mrb[12].mxu1 }
 0x4df   :  { %v395_v41 = vmul.f32 0.35355338, %v389_v40  ;;  %v3484_v42 = vpop.f32.mrb[13].mxu1 }
 0x4e0   :  { %v392_v43 = vpop.f32.mrb[14].mxu1 }
 0x4e1   :  { %v3485_v44 = vpop.f32.mrb[15].mxu1  ;;  %v396_v45 = vsel %vm235_vm2, %v395_v41, -inf }
 0x4e2   :  { %397 = vmax.xlane.f32.xlu1 %v396_v45 }
 0x56f   :  { %v398_v46 = vpop.xlane.xlu1 %397 }
 0x570   :  { %v399_v47 = vsub.f32 %v395_v41, %v398_v46 }
 0x572   :  { %v400_v48 = vmul.f32 1.442695, %v399_v47 }
 0x574   :  { %3845 = vpow2.f32 %v400_v48 }
 0x57e   :  { %v3846_v49 = vpop.eup %3845 }
 0x57f   :  { %v402_v50 = vsel %vm235_vm2, %v3846_v49, 0.0 }
 0x580   :  { %403 = vadd.xlane.f32.xlu0 %v402_v50 }
 0x596   :  { %408 = vrot.lane.b32.xlu0 %v4370_v11, %s4137_s30 }
 0x59a   :  { %551 = vrot.lane.b32.xlu0 %v4370_v11, %s4138_s5 }
 0x59e   :  { %549 = vrot.lane.b32.xlu0 %v4370_v11, %s4139_s11 }
 0x60d   :  { %v404_v53 = vpop.xlane.xlu0 %403 }
 0x60e   :  { %3847 = vrcp.f32 %v404_v53  ;;  %v4478_v53 = vpack.c.bf16 %v4372_v12, %v4372_v12 }
 0x611   :  { %v409_v54 = vpop.permute.xlu0 %408 }
 0x612   :  { %v414_v55 = vsel %vm300_vm3, %v409_v54, 0 }
 0x613   :  { %3487 = vmatpush3.bf16.msra.mxu0 %v414_v55 }
 0x614   :  { %3498 = vmatprep.subr.bf16.mxu0 %v4132_v0 }
 0x615   :  { %v552_v62 = vpop.permute.xlu0 %551 }
 0x616   :  { %v557_v4 = vsel %vm235_vm2, %v552_v62, 0 }
 0x618   :  { %v3848_v56 = vpop.eup %3847 }
 0x619   :  { %v406_v58 = vmul.f32 %v3848_v56, %v3846_v49  ;;  %v550_v8 = vpop.permute.xlu0 %549 }
 0x61b   :  { %v407_v59 = vpack.c.bf16 %v406_v58, %v406_v58 }
 0x61d   :  { %3489 = vmatmul.mubr.msk.bf16.vlgmr.msra.gmra.mrb[0].mxu0 %vm235_vm2, %v407_v59 }
 0x61e   :  { %3499 = vmatpush3.bf16.msra.mxu0 %v4422_v60  ;;  %3500 = vmatprep.mubr.msk.bf16.mxu0 %vm4133_vm0, %v4132_v0 }
 0x61f   :  { %3510 = vmatprep.subr.bf16.mxu0 %v4132_v0 }
 0x625   :  { %3501 = vmatmul.mubr.msk.bf16.vlgmr.msra.gmra.mrb[4].mxu0 %vm235_vm2, %v344_v61 }
 0x626   :  { %3512 = vmatprep.mubr.msk.bf16.mxu0 %vm4133_vm0, %v4132_v0 }
 0x6f0   :  { %v450_v63 = vpop.f32.mrb[0].mxu0 }
 0x6f1   :  { %v456_v1 = vpack.c.bf16 %v450_v63, %v450_v63  ;;  %v3490_v2 = vpop.f32.mrb[1].mxu0 }
 0x6f2   :  { %v453_v3 = vpop.f32.mrb[2].mxu0 }
 0x6f3   :  { %v3491_v5 = vpop.f32.mrb[3].mxu0  ;;  %3495 = vmatmul.mubr.msk.bf16.vlgmr.msra.gmra.mrb[16].mxu1 %vm235_vm2, %v456_v1 }
 0x6f4   :  { %3505 = vmatpush3.bf16.xpose.msra.mxu1 %v557_v4  ;;  %3506 = vmatprep.mubr.msk.bf16.mxu1 %vm4133_vm0, %v4132_v0 }
 0x6f5   :  { %3516 = vmatprep.subr.bf16.mxu1 %v4132_v0 }
 0x6f8   :  { %v543_v6 = vpop.f32.mrb[4].mxu0 }
 0x6f9   :  { %v3502_v7 = vpop.f32.mrb[5].mxu0 }
 0x6fa   :  { %v546_v9 = vpop.f32.mrb[6].mxu0 }
 0x6fb   :  { %v3503_v10 = vpop.f32.mrb[7].mxu0  ;;  %3507 = vmatmul.mubr.msk.bf16.vlgmr.msra.gmra.mrb[20].mxu1 %vm235_vm2, %v550_v8 }
 0x6fc   :  { %3518 = vmatprep.mubr.msk.bf16.mxu1 %vm4133_vm0, %v4132_v0  ;;  %3517 = vmatpush3.bf16.msra.mxu1 %v4458_v32  ;;  %v229_v10 = vld [vmem:[%s4987_s23 + $0xc] sm:$0xf] }
 0x6fd   :  { %3528 = vmatprep.subr.bf16.mxu1 %v4132_v0 }
 0x7c6   :  { %v497_v13 = vpop.f32.mrb[16].mxu1 }
 0x7c7   :  { %v4440_v14 = vadd.f32 %v543_v6, %v497_v13  ;;  %v3496_v15 = vpop.f32.mrb[17].mxu1  ;;  %v4510_v13 = vsel %vm300_vm3, %v229_v10, 0 }
 0x7c8   :  { %v500_v16 = vpop.f32.mrb[18].mxu1 }
 0x7c9   :  { %v3497_v17 = vpop.f32.mrb[19].mxu1 }
 0x7ce   :  { %v593_v18 = vpop.f32.mrb[20].mxu1 }
 0x7cf   :  { %v599_v19 = vmul.f32 0.35355338, %v593_v18  ;;  %v3508_v20 = vpop.f32.mrb[21].mxu1 }
 0x7d0   :  { %v596_v21 = vpop.f32.mrb[22].mxu1 }
 0x7d1   :  { %v3509_v22 = vpop.f32.mrb[23].mxu1  ;;  %v600_v23 = vsel %vm235_vm2, %v599_v19, -inf }
 0x7d2   :  { %601 = vmax.xlane.f32.xlu1 %v600_v23 }
 0x7e3   :  { %612 = vrot.lane.b32.xlu1 %v4370_v11, %s4140_s1 }
 0x7e7   :  { %710 = vrot.lane.b32.xlu1 %v4370_v11, %s4141_s8 }
 0x7eb   :  { %708 = vrot.lane.b32.xlu1 %v4370_v11, %s4142_s9 }
 0x85f   :  { %v602_v24 = vpop.xlane.xlu1 %601 }
 0x860   :  { %v603_v25 = vsub.f32 %v599_v19, %v602_v24 }
 0x862   :  { %v604_v26 = vmul.f32 1.442695, %v603_v25 }
 0x863   :  { %v613_v27 = vpop.permute.xlu1 %612 }
 0x864   :  { %3849 = vpow2.f32 %v604_v26  ;;  %v618_v28 = vsel %vm300_vm3, %v613_v27, 0 }
 0x865   :  { %3511 = vmatpush3.bf16.msra.mxu0 %v618_v28 }
 0x866   :  { %3522 = vmatprep.subr.bf16.mxu0 %v4132_v0 }
 0x867   :  { %v711_v36 = vpop.permute.xlu1 %710 }
 0x868   :  { %v716_v38 = vsel %vm235_vm2, %v711_v36, 0 }
 0x86e   :  { %v3850_v29 = vpop.eup %3849 }
 0x86f   :  { %v606_v30 = vsel %vm235_vm2, %v3850_v29, 0.0 }
 0x870   :  { %607 = vadd.xlane.f32.xlu0 %v606_v30 }
 0x886   :  { %771 = vrot.lane.b32.xlu0 %v4370_v11, %s4143_s2  ;;  %v709_v11 = vpop.permute.xlu1 %708 }
 0x8fd   :  { %v608_v33 = vpop.xlane.xlu0 %607 }
 0x8fe   :  { %3851 = vrcp.f32 %v608_v33 }
 0x901   :  { %v772_v39 = vpop.permute.xlu0 %771 }
 0x902   :  { %v777_v44 = vsel %vm300_vm3, %v772_v39, 0 }
 0x908   :  { %v3852_v34 = vpop.eup %3851 }
 0x909   :  { %v610_v35 = vmul.f32 %v3852_v34, %v3850_v29 }
 0x90b   :  { %v611_v37 = vpack.c.bf16 %v610_v35, %v610_v35 }
 0x90d   :  { %3513 = vmatmul.mubr.msk.bf16.vlgmr.msra.gmra.mrb[8].mxu0 %vm235_vm2, %v611_v37 }
 0x90e   :  { %3523 = vmatpush3.bf16.xpose.msra.mxu0 %v716_v38  ;;  %3524 = vmatprep.mubr.msk.bf16.mxu0 %vm4133_vm0, %v4132_v0 }
 0x90f   :  { %3534 = vmatprep.subr.bf16.mxu0 %v4132_v0 }
 0x915   :  { %3525 = vmatmul.mubr.msk.bf16.vlgmr.msra.gmra.mrb[12].mxu0 %vm235_vm2, %v709_v11 }
 0x916   :  { %3536 = vmatprep.mubr.msk.bf16.mxu0 %vm4133_vm0, %v4132_v0  ;;  %3535 = vmatpush3.bf16.msra.mxu0 %v4510_v13 }
 0x917   :  { %3546 = vmatprep.subr.bf16.mxu0 %v4132_v0 }
 0x9e0   :  { %v654_v40 = vpop.f32.mrb[8].mxu0 }
 0x9e1   :  { %v660_v41 = vpack.c.bf16 %v654_v40, %v654_v40  ;;  %v3514_v42 = vpop.f32.mrb[9].mxu0 }
 0x9e2   :  { %v657_v43 = vpop.f32.mrb[10].mxu0 }
 0x9e3   :  { %v3515_v45 = vpop.f32.mrb[11].mxu0  ;;  %3519 = vmatmul.mubr.msk.bf16.vlgmr.msra.gmra.mrb[24].mxu1 %vm235_vm2, %v660_v41 }
 0x9e4   :  { %3529 = vmatpush3.bf16.msra.mxu1 %v777_v44  ;;  %3530 = vmatprep.mubr.msk.bf16.mxu1 %vm4133_vm0, %v4132_v0 }
 0x9e5   :  { %3540 = vmatprep.subr.bf16.mxu1 %v4132_v0 }
 0x9e8   :  { %v752_v46 = vpop.f32.mrb[12].mxu0 }
 0x9e9   :  { %v758_v47 = vmul.f32 0.35355338, %v752_v46  ;;  %v3526_v48 = vpop.f32.mrb[13].mxu0 }
 0x9ea   :  { %v755_v49 = vpop.f32.mrb[14].mxu0 }
 0x9eb   :  { %v3527_v50 = vpop.f32.mrb[15].mxu0  ;;  %v759_v51 = vsel %vm235_vm2, %v758_v47, -inf }
 0x9ec   :  { %760 = vmax.xlane.f32.xlu1 %v759_v51 }
 0x9fd   :  { %986 = vrot.lane.b32.xlu1 %v4478_v53, %s4136_s27 }
 0xa79   :  { %v761_v54 = vpop.xlane.xlu1 %760 }
 0xa7a   :  { %v762_v55 = vsub.f32 %v758_v47, %v761_v54 }
 0xa7c   :  { %v763_v56 = vmul.f32 1.442695, %v762_v55 }
 0xa7d   :  { %v987_v9 = vpop.permute.xlu1 %986 }
 0xa7e   :  { %3853 = vpow2.f32 %v763_v56 }
 0xa88   :  { %v3854_v57 = vpop.eup %3853 }
 0xa89   :  { %v765_v58 = vsel %vm235_vm2, %v3854_v57, 0.0 }
 0xa8a   :  { %766 = vadd.xlane.f32.xlu0 %v765_v58 }
 0xaa0   :  { %876 = vrot.lane.b32.xlu0 %v4478_v53, %s4134_s12 }
 0xaa4   :  { %988 = vrot.lane.b32.xlu0 %v4478_v53, %s4135_s4 }
 0xab6   :  { %v701_v59 = vpop.f32.mrb[24].mxu1 }
 0xab7   :  { %v4488_v12 = vadd.f32 %v701_v59, %v4440_v14  ;;  %v3520_v61 = vpop.f32.mrb[25].mxu1 }
 0xab8   :  { %v704_v62 = vpop.f32.mrb[26].mxu1 }
 0xab9   :  { %v3521_v63 = vpop.f32.mrb[27].mxu1 }
 0xb17   :  { %v767_v1 = vpop.xlane.xlu0 %766 }
 0xb18   :  { %3855 = vrcp.f32 %v767_v1 }
 0xb1b   :  { %v877_v4 = vpop.permute.xlu0 %876 }
 0xb1c   :  { %v882_v6 = vsel %vm235_vm2, %v877_v4, 0 }
 0xb1f   :  { %v989_v7 = vpop.permute.xlu0 %988 }
 0xb20   :  { %v994_v8 = vsel %vm235_vm2, %v989_v7, 0 }
 0xb22   :  { %v3856_v2 = vpop.eup %3855 }
 0xb23   :  { %v769_v3 = vmul.f32 %v3856_v2, %v3854_v57 }
 0xb25   :  { %v770_v5 = vpack.c.bf16 %v769_v3, %v769_v3 }
 0xb27   :  { %3531 = vmatmul.mubr.msk.bf16.vlgmr.msra.gmra.mrb[28].mxu1 %vm235_vm2, %v770_v5 }
 0xb28   :  { %3541 = vmatpush3.bf16.xpose.msra.mxu1 %v882_v6  ;;  %3542 = vmatprep.mubr.msk.bf16.mxu1 %vm4133_vm0, %v4132_v0 }
 0xb29   :  { %3552 = vmatprep.subr.bf16.mxu1 %v4132_v0 }
 0xb2f   :  { %3543 = vmatmul.mubr.msk.bf16.vlgmr.msra.gmra.mrb[32].mxu1 %vm235_vm2, %v4478_v53 }
 0xb30   :  { %3553 = vmatpush3.bf16.xpose.msra.mxu1 %v994_v8  ;;  %3554 = vmatprep.mubr.msk.bf16.mxu1 %vm4133_vm0, %v4132_v0 }
 0xb31   :  { %3564 = vmatprep.subr.bf16.mxu1 %v4132_v0 }
 0xb37   :  { %3555 = vmatmul.mubr.msk.bf16.vlgmr.msra.gmra.mrb[36].mxu1 %vm235_vm2, %v987_v9 }
 0xb38   :  { %3565 = vmatpush3.bf16.msra.mxu1 %v4412_v52  ;;  %3566 = vmatprep.mubr.msk.bf16.mxu1 %vm4133_vm0, %v4132_v0 }
 0xb39   :  { %3576 = vmatprep.subr.bf16.mxu1 %v4132_v0 }
 0xbfa   :  { %v813_v14 = vpop.f32.mrb[28].mxu1 }
 0xbfb   :  { %v819_v15 = vpack.c.bf16 %v813_v14, %v813_v14  ;;  %v3532_v16 = vpop.f32.mrb[29].mxu1 }
 0xbfc   :  { %v816_v52 = vpop.f32.mrb[30].mxu1 }
 0xbfd   :  { %v3533_v17 = vpop.f32.mrb[31].mxu1  ;;  %3537 = vmatmul.mubr.msk.bf16.vlgmr.msra.gmra.mrb[16].mxu0 %vm235_vm2, %v819_v15 }
 0xbfe   :  { %3548 = vmatprep.mubr.msk.bf16.mxu0 %vm4133_vm0, %v4132_v0 }
 0xc02   :  { %v918_v18 = vpop.f32.mrb[32].mxu1 }
 0xc03   :  { %v924_v19 = vmul.f32 0.35355338, %v918_v18  ;;  %v3544_v20 = vpop.f32.mrb[33].mxu1 }
 0xc04   :  { %v921_v21 = vpop.f32.mrb[34].mxu1 }
 0xc05   :  { %v3545_v22 = vpop.f32.mrb[35].mxu1  ;;  %v925_v23 = vsel %vm235_vm2, %v924_v19, -inf }
 0xc06   :  { %926 = vmax.xlane.f32.xlu0 %v925_v23 }
 0xc0a   :  { %v1030_v24 = vpop.f32.mrb[36].mxu1 }
 0xc0b   :  { %v1036_v25 = vmul.f32 0.35355338, %v1030_v24  ;;  %v3556_v26 = vpop.f32.mrb[37].mxu1 }
 0xc0c   :  { %v1033_v27 = vpop.f32.mrb[38].mxu1 }
 0xc0d   :  { %v3557_v28 = vpop.f32.mrb[39].mxu1  ;;  %v1037_v29 = vsel %vm235_vm2, %v1036_v25, -inf }
 0xc0e   :  { %1038 = vmax.xlane.f32.xlu1 %v1037_v29 }
 0xc1f   :  { %1049 = vrot.lane.b32.xlu1 %v4478_v53, %s4137_s30  ;;  %s4988_s30 = sld [smem:[#allocation24_spill]] }
 0xc93   :  { %v927_v30 = vpop.xlane.xlu0 %926 }
 0xc94   :  { %v928_v31 = vsub.f32 %v924_v19, %v927_v30 }
 0xc96   :  { %v929_v33 = vmul.f32 1.442695, %v928_v31 }
 0xc98   :  { %3857 = vpow2.f32 %v929_v33 }
 0xc9b   :  { %v1039_v34 = vpop.xlane.xlu1 %1038 }
 0xc9c   :  { %v1040_v35 = vsub.f32 %v1036_v25, %v1039_v34 }
 0xc9e   :  { %v1041_v36 = vmul.f32 1.442695, %v1040_v35 }
 0xc9f   :  { %v1050_v51 = vpop.permute.xlu1 %1049 }
 0xca0   :  { %3859 = vpow2.f32 %v1041_v36  ;;  %v1055_v55 = vsel %vm300_vm3, %v1050_v51, 0 }
 0xca2   :  { %v3858_v37 = vpop.eup %3857 }
 0xca3   :  { %v931_v38 = vsel %vm235_vm2, %v3858_v37, 0.0 }
 0xca4   :  { %932 = vadd.xlane.f32.xlu0 %v931_v38 }
 0xcaa   :  { %v3860_v11 = vpop.eup %3859 }
 0xcab   :  { %v1043_v39 = vsel %vm235_vm2, %v3860_v11, 0.0 }
 0xcac   :  { %1044 = vadd.xlane.f32.xlu0 %v1043_v39 }
 0xcc2   :  { %937 = vrot.lane.b32.xlu0 %v4478_v53, %s4128_s24 }
 0xcc6   :  { %1186 = vrot.lane.b32.xlu0 %v4478_v53, %s4138_s5 }
 0xcca   :  { %1184 = vrot.lane.b32.xlu0 %v4478_v53, %s4139_s11 }
 0xcd0   :  { %v860_v40 = vpop.f32.mrb[16].mxu0 }
 0xcd1   :  { %v4530_v41 = vadd.f32 %v860_v40, %v4488_v12  ;;  %v3538_v42 = vpop.f32.mrb[17].mxu0 }
 0xcd2   :  { %v863_v43 = vpop.f32.mrb[18].mxu0 }
 0xcd3   :  { %v3539_v44 = vpop.f32.mrb[19].mxu0 }
 0xd31   :  { %v933_v45 = vpop.xlane.xlu0 %932 }
 0xd32   :  { %3861 = vrcp.f32 %v933_v45 }
 0xd39   :  { %v1045_v46 = vpop.xlane.xlu0 %1044 }
 0xd3a   :  { %3863 = vrcp.f32 %v1045_v46 }
 0xd3c   :  { %v3862_v47 = vpop.eup %3861 }
 0xd3d   :  { %v935_v48 = vmul.f32 %v3862_v47, %v3858_v37  ;;  %v938_v49 = vpop.permute.xlu0 %937 }
 0xd3e   :  { %v943_v50 = vsel %vm300_vm3, %v938_v49, 0 }
 0xd3f   :  { %3547 = vmatpush3.bf16.msra.mxu0 %v943_v50  ;;  %v936_v54 = vpack.c.bf16 %v935_v48, %v935_v48 }
 0xd40   :  { %3558 = vmatprep.subr.bf16.mxu0 %v4132_v0 }
 0xd41   :  { %v1187_v1 = vpop.permute.xlu0 %1186 }
 0xd42   :  { %3549 = vmatmul.mubr.msk.bf16.vlgmr.msra.gmra.mrb[20].mxu0 %vm235_vm2, %v936_v54  ;;  %v1192_v5 = vsel %vm235_vm2, %v1187_v1, 0 }
 0xd43   :  { %3559 = vmatpush3.bf16.msra.mxu0 %v1055_v55  ;;  %3560 = vmatprep.mubr.msk.bf16.mxu0 %vm4133_vm0, %v4132_v0 }
 0xd44   :  { %v3864_v56 = vpop.eup %3863  ;;  %3570 = vmatprep.subr.bf16.mxu0 %v4132_v0 }
 0xd45   :  { %v1047_v57 = vmul.f32 %v3864_v56, %v3860_v11  ;;  %v1185_v7 = vpop.permute.xlu0 %1184  ;;  %v3279_v56 = vld [vmem:[#allocation2] ss:$0 sm:$0xff] }
 0xd47   :  { %v1048_v58 = vpack.c.bf16 %v1047_v57, %v1047_v57 }
 0xd4a   :  { %3561 = vmatmul.mubr.msk.bf16.vlgmr.msra.gmra.mrb[24].mxu0 %vm235_vm2, %v1048_v58 }
 0xd4b   :  { %3571 = vmatpush3.bf16.msra.mxu0 %v4422_v60  ;;  %3572 = vmatprep.mubr.msk.bf16.mxu0 %vm4133_vm0, %v4132_v0 }
 0xd4c   :  { %3582 = vmatprep.subr.bf16.mxu0 %v4132_v0 }
 0xe15   :  { %v979_v59 = vpop.f32.mrb[20].mxu0 }
 0xe16   :  { %v985_v12 = vpack.c.bf16 %v979_v59, %v979_v59  ;;  %v3550_v61 = vpop.f32.mrb[21].mxu0  ;;  %v873_v59 = vadd.f32 %v3279_v56, %v4530_v41 }
 0xe17   :  { %v982_v62 = vpop.f32.mrb[22].mxu0 }
 0xe18   :  { %v3551_v63 = vpop.f32.mrb[23].mxu0  ;;  %3573 = vmatmul.mubr.msk.bf16.vlgmr.msra.gmra.mrb[28].mxu0 %vm235_vm2, %v985_v12  ;;  %v1499_v12 = vsel %vm181_vm1, %v873_v59, 0.0 }
 0xe19   :  { %3584 = vmatprep.mubr.msk.bf16.mxu0 %vm4133_vm0, %v4132_v0 }
 0xe1d   :  { %v1091_v2 = vpop.f32.mrb[24].mxu0 }
 0xe1e   :  { %v1097_v3 = vpack.c.bf16 %v1091_v2, %v1091_v2  ;;  %v3562_v4 = vpop.f32.mrb[25].mxu0 }
 0xe1f   :  { %v1094_v60 = vpop.f32.mrb[26].mxu0 }
 0xe20   :  { %v3563_v6 = vpop.f32.mrb[27].mxu0  ;;  %3567 = vmatmul.mubr.msk.bf16.vlgmr.msra.gmra.mrb[40].mxu1 %vm235_vm2, %v1097_v3 }
 0xe21   :  { %3577 = vmatpush3.bf16.xpose.msra.mxu1 %v1192_v5  ;;  %3578 = vmatprep.mubr.msk.bf16.mxu1 %vm4133_vm0, %v4132_v0 }
 0xe22   :  { %3588 = vmatprep.subr.bf16.mxu1 %v4132_v0 }
 0xe28   :  { %3579 = vmatmul.mubr.msk.bf16.vlgmr.msra.gmra.mrb[44].mxu1 %vm235_vm2, %v1185_v7 }
 0xe29   :  { %3589 = vmatpush3.bf16.msra.mxu1 %v4458_v32  ;;  %3590 = vmatprep.mubr.msk.bf16.mxu1 %vm4133_vm0, %v4132_v0 }
 0xe2a   :  { %3600 = vmatprep.subr.bf16.mxu1 %v4132_v0 }
 0xeeb   :  { %v1178_v8 = vpop.f32.mrb[28].mxu0 }
 0xeec   :  { %v3574_v9 = vpop.f32.mrb[29].mxu0 }
 0xeed   :  { %v1181_v10 = vpop.f32.mrb[30].mxu0 }
 0xeee   :  { %v3575_v14 = vpop.f32.mrb[31].mxu0 }
 0xef3   :  { %v1135_v15 = vpop.f32.mrb[40].mxu1 }
 0xef4   :  { %v4557_v16 = vadd.f32 %v1178_v8, %v1135_v15  ;;  %v3568_v52 = vpop.f32.mrb[41].mxu1 }
 0xef5   :  { %v1138_v17 = vpop.f32.mrb[42].mxu1 }
 0xef6   :  { %v3569_v18 = vpop.f32.mrb[43].mxu1 }
 0xefb   :  { %v1228_v19 = vpop.f32.mrb[44].mxu1 }
 0xefc   :  { %v1234_v20 = vmul.f32 0.35355338, %v1228_v19  ;;  %v3580_v21 = vpop.f32.mrb[45].mxu1 }
 0xefd   :  { %v1231_v22 = vpop.f32.mrb[46].mxu1 }
 0xefe   :  { %v3581_v32 = vpop.f32.mrb[47].mxu1  ;;  %v1235_v23 = vsel %vm235_vm2, %v1234_v20, -inf }
 0xeff   :  { %1236 = vmax.xlane.f32.xlu1 %v1235_v23 }
 0xf10   :  { %1342 = vrot.lane.b32.xlu1 %v4478_v53, %s4141_s8 }
 0xf14   :  { %1340 = vrot.lane.b32.xlu1 %v4478_v53, %s4142_s9 }
 0xf8c   :  { %v1237_v24 = vpop.xlane.xlu1 %1236 }
 0xf8d   :  { %v1238_v25 = vsub.f32 %v1234_v20, %v1237_v24 }
 0xf8f   :  { %v1239_v26 = vmul.f32 1.442695, %v1238_v25 }
 0xf90   :  { %v1343_v35 = vpop.permute.xlu1 %1342 }
 0xf91   :  { %3865 = vpow2.f32 %v1239_v26  ;;  %v1348_v37 = vsel %vm235_vm2, %v1343_v35, 0 }
 0xf94   :  { %v1341_v38 = vpop.permute.xlu1 %1340 }
 0xf9b   :  { %v3866_v27 = vpop.eup %3865 }
 0xf9c   :  { %v1241_v28 = vsel %vm235_vm2, %v3866_v27, 0.0 }
 0xf9d   :  { %1242 = vadd.xlane.f32.xlu0 %v1241_v28  ;;  %v3828_v28 = vld [vmem:[#allocation7 + $0x8] sm:$0xff]  }
 0xfb3   :  { %1247 = vrot.lane.b32.xlu0 %v4478_v53, %s4140_s1 }
0x102a   :  { %v1243_v29 = vpop.xlane.xlu0 %1242 }
0x102b   :  { %3867 = vrcp.f32 %v1243_v29  ;;  %v155_v29 = vld [vmem:[%s4988_s30] sm:$0xff] }
0x102e   :  { %v1248_v30 = vpop.permute.xlu0 %1247 }
0x102f   :  { %v1253_v31 = vsel %vm300_vm3, %v1248_v30, 0  ;;  %v156_v30 = vld [vmem:[%s4988_s30 + $0x8] sm:$0xff] }
0x1030   :  { %3583 = vmatpush3.bf16.msra.mxu0 %v1253_v31  ;;  %v1614_v31 = vpack.c.bf16 %v156_v30, %v155_v29 }
0x1031   :  { %3594 = vmatprep.subr.bf16.mxu0 %v4132_v0 }
0x1035   :  { %v3868_v33 = vpop.eup %3867 }
0x1036   :  { %v1245_v34 = vmul.f32 %v3868_v33, %v3866_v27  ;;  %v3827_v27 = vld [vmem:[#allocation7] sm:$0xff]  }
0x1037   :  { %v3829_v33 = vld [vmem:[%s4956_s6] sm:$0xff]  }
0x1038   :  { %v1246_v36 = vpack.c.bf16 %v1245_v34, %v1245_v34  ;;  %v3830_v34 = vld [vmem:[%s4956_s6 + $0x8] sm:$0xff]  }
0x103a   :  { %3585 = vmatmul.mubr.msk.bf16.vlgmr.msra.gmra.mrb[32].mxu0 %vm235_vm2, %v1246_v36 }
0x103b   :  { %3595 = vmatpush3.bf16.xpose.msra.mxu0 %v1348_v37  ;;  %3596 = vmatprep.mubr.msk.bf16.mxu0 %vm4133_vm0, %v4132_v0 }
0x103c   :  { %3606 = vmatprep.subr.bf16.mxu0 %v4132_v0 }
0x1042   :  { %3597 = vmatmul.mubr.msk.bf16.vlgmr.msra.gmra.mrb[36].mxu0 %vm235_vm2, %v1341_v38 }
0x1043   :  { %3607 = vmatpush3.bf16.msra.mxu0 %v4510_v13  ;;  %3608 = vmatprep.mubr.msk.bf16.mxu0 %vm4133_vm0, %v4132_v0 }
0x1044   :  { %3620 = vmatprep.subr.bf16.mxu0 %v4132_v0 }
0x110d   :  { %v1289_v11 = vpop.f32.mrb[32].mxu0 }
0x110e   :  { %v1295_v39 = vpack.c.bf16 %v1289_v11, %v1289_v11  ;;  %v3586_v40 = vpop.f32.mrb[33].mxu0 }
0x110f   :  { %v1292_v42 = vpop.f32.mrb[34].mxu0 }
0x1110   :  { %v3587_v43 = vpop.f32.mrb[35].mxu0  ;;  %3591 = vmatmul.mubr.msk.bf16.vlgmr.msra.gmra.mrb[48].mxu1 %vm235_vm2, %v1295_v39 }
0x1111   :  { %3602 = vmatprep.mubr.msk.bf16.mxu1 %vm4133_vm0, %v4132_v0  ;;  %v3292_v43 = vld [vmem:[#allocation11] ss:$0 sm:$0xff] }
0x1115   :  { %v1384_v44 = vpop.f32.mrb[36].mxu0 }
0x1116   :  { %v1390_v45 = vmul.f32 0.35355338, %v1384_v44  ;;  %v3598_v46 = vpop.f32.mrb[37].mxu0 }
0x1117   :  { %v1387_v47 = vpop.f32.mrb[38].mxu0 }
0x1118   :  { %v3599_v13 = vpop.f32.mrb[39].mxu0  ;;  %v1391_v48 = vsel %vm235_vm2, %v1390_v45, -inf  ;;  %v3293_v47 = vld [vmem:[#allocation13] ss:$0 sm:$0xff] }
0x1119   :  { %1392 = vmax.xlane.f32.xlu0 %v1391_v48 }
0x112f   :  { %1403 = vrot.lane.b32.xlu0 %v4478_v53, %s4143_s2 }
0x11a6   :  { %v1393_v49 = vpop.xlane.xlu0 %1392 }
0x11a7   :  { %v1394_v50 = vsub.f32 %v1390_v45, %v1393_v49 }
0x11a9   :  { %v1395_v51 = vmul.f32 1.442695, %v1394_v50 }
0x11aa   :  { %v1404_v54 = vpop.permute.xlu0 %1403 }
0x11ab   :  { %3869 = vpow2.f32 %v1395_v51  ;;  %v1409_v55 = vsel %vm300_vm3, %v1404_v54, 0  ;;  %v3298_v51 = vld [vmem:[#allocation8] ss:$0 sm:$0xff] }
0x11ac   :  { %3601 = vmatpush3.bf16.msra.mxu1 %v1409_v55 }
0x11ad   :  { %3612 = vmatprep.subr.bf16.mxu1 %v4132_v0 }
0x11b5   :  { %v3870_v57 = vpop.eup %3869 }
0x11b6   :  { %v1397_v58 = vsel %vm235_vm2, %v3870_v57, 0.0 }
0x11b7   :  { %1398 = vadd.xlane.f32.xlu1 %v1397_v58 }
0x11bb   :  { %1500 = vadd.xlane.f32.xlu1 %v1499_v12 }
0x11e3   :  { %v1333_v53 = vpop.f32.mrb[48].mxu1 }
0x11e4   :  { %v1339_v61 = vadd.f32 %v1333_v53, %v4557_v16  ;;  %v3592_v62 = vpop.f32.mrb[49].mxu1 }
0x11e5   :  { %v1336_v63 = vpop.f32.mrb[50].mxu1 }
0x11e6   :  { %v3593_v1 = vpop.f32.mrb[51].mxu1 }
0x1244   :  { %v1399_v2 = vpop.xlane.xlu1 %1398 }
0x1245   :  { %3871 = vrcp.f32 %v1399_v2 }
0x1248   :  { %v1501_v9 = vpop.xlane.xlu1 %1500 }
0x1249   :  { %v1506_v10 = vmul.f32 0.03125, %v1501_v9 }
0x124b   :  { %v1508_v15 = vsub.f32 %v873_v59, %v1506_v10 }
0x124d   :  { %v1510_v21 = vmul.f32 %v1508_v15, %v1508_v15 }
0x124f   :  { %v3872_v3 = vpop.eup %3871  ;;  %v1512_v22 = vsel %vm181_vm1, %v1510_v21, 0.0 }
0x1250   :  { %v1401_v4 = vmul.f32 %v3872_v3, %v3870_v57 }
0x1252   :  { %v1402_v60 = vpack.c.bf16 %v1401_v4, %v1401_v4 }
0x1254   :  { %3603 = vmatmul.mubr.msk.bf16.vlgmr.msra.gmra.mrb[52].mxu1 %vm235_vm2, %v1402_v60 }
0x1255   :  { %3616 = vmatprep.mubr.msk.bf16.mxu1 %vm4133_vm0, %v4132_v0  ;;  %3613 = vmatpush3.bf16.msra.mxu1 %v3829_v33 }
0x1256   :  { %3614 = vmatprep.subr.bf16.mxu1 %v4132_v0 }
0x1259   :  { %3615 = vmatpush3.bf16.msra.mxu1 %v3830_v34 }
0x125a   :  { %3628 = vmatprep.subr.bf16.mxu1 %v4132_v0 }
0x1327   :  { %v1445_v41 = vpop.f32.mrb[52].mxu1 }
0x1328   :  { %v1451_v5 = vpack.c.bf16 %v1445_v41, %v1445_v41  ;;  %v3604_v6 = vpop.f32.mrb[53].mxu1 }
0x1329   :  { %v1448_v7 = vpop.f32.mrb[54].mxu1 }
0x132a   :  { %v3605_v8 = vpop.f32.mrb[55].mxu1  ;;  %3609 = vmatmul.mubr.msk.bf16.vlgmr.msra.gmra.mrb[40].mxu0 %vm235_vm2, %v1451_v5 }
0x132b   :  { %3624 = vmatprep.mubr.msk.bf16.mxu0 %vm4133_vm0, %v4132_v0  ;;  %3621 = vmatpush3.bf16.msra.mxu0 %v3827_v27 }
0x132c   :  { %3622 = vmatprep.subr.bf16.mxu0 %v4132_v0 }
0x132f   :  { %3623 = vmatpush3.bf16.msra.mxu0 %v3828_v28 }
0x1330   :  { %3634 = vmatprep.subr.bf16.mxu0 %v4132_v0 }
0x1332   :  { %3625 = vmatmul.mubr.msk.bf16.vlgmr.msra.gmra.mrb[44].mxu0 %vm181_vm1, %v1614_v31 }
0x1333   :  { %3636 = vmatprep.mubr.msk.bf16.mxu0 %vm4133_vm0, %v4132_v0 }
0x13fd   :  { %v1489_v14 = vpop.f32.mrb[40].mxu0 }
0x13fe   :  { %v1495_v16 = vadd.f32 %v1489_v14, %v1339_v61  ;;  %v3610_v52 = vpop.f32.mrb[41].mxu0  ;;  %v3294_v61 = vld [vmem:[#allocation5] ss:$0 sm:$0xff] }
0x13ff   :  { %v1492_v17 = vpop.f32.mrb[42].mxu0 }
0x1400   :  { %v3611_v18 = vpop.f32.mrb[43].mxu0  ;;  %v1496_v19 = vadd.f32 %v3279_v56, %v1495_v16 }
0x1402   :  { %v1502_v20 = vsel %vm181_vm1, %v1496_v19, 0.0 }
0x1403   :  { %1503 = vadd.xlane.f32.xlu1 %v1502_v20 }
0x1405   :  { %v1671_v54 = vpop.f32.mrb[44].mxu0 }
0x1406   :  { %v1672_v55 = vadd.f32 %v3298_v51, %v1671_v54  ;;  %v3626_v56 = vpop.f32.mrb[45].mxu0 }
0x1407   :  { %1513 = vadd.xlane.f32.xlu1 %v1512_v22  ;;  %v1674_v57 = vpop.f32.mrb[46].mxu0 }
0x1408   :  { %v4622_v58 = vpack.c.bf16 %v1672_v55, %v1672_v55  ;;  %v4624_v59 = vadd.f32 %v3298_v51, %v1674_v57  ;;  %v3627_v12 = vpop.f32.mrb[47].mxu0 }
0x140a   :  { %1797 = vrot.lane.b32.xlu0 %v4622_v58, %s4136_s27  ;;  %v1689_v53 = vsel %vm235_vm2, %v4622_v58, 0 }
0x147c   :  { %v1798_v63 = vpop.permute.xlu0 %1797 }
0x147d   :  { %v1803_v5 = vsel %vm235_vm2, %v1798_v63, 0 }
0x1490   :  { %v1504_v32 = vpop.xlane.xlu1 %1503 }
0x1491   :  { %v1507_v23 = vmul.f32 0.03125, %v1504_v32 }
0x1493   :  { %v1509_v24 = vsub.f32 %v1496_v19, %v1507_v23 }
0x1494   :  { %v1514_v35 = vpop.xlane.xlu1 %1513 }
0x1495   :  { %v1511_v25 = vmul.f32 %v1509_v24, %v1509_v24  ;;  %v1518_v36 = vmul.f32 0.03125, %v1514_v35 }
0x1497   :  { %v1515_v26 = vsel %vm181_vm1, %v1511_v25, 0.0  ;;  %v1520_v37 = vadd.f32 1e-05, %v1518_v36 }
0x1498   :  { %1516 = vadd.xlane.f32.xlu1 %v1515_v26 }
0x1499   :  { %3873 = vrsqrt.f32 %v1520_v37 }
0x14a3   :  { %v3874_v40 = vpop.eup %3873 }
0x14a4   :  { %v1524_v42 = vmul.f32 %v3874_v40, %v1508_v15 }
0x14a6   :  { %v1532_v45 = vmul.f32 %v3292_v43, %v1524_v42 }
0x14a8   :  { %v1540_v48 = vadd.f32 %v3293_v47, %v1532_v45  ;;  %v1679_v45 = vld [vmem:[%s4960_s10 + $0x4] sm:$0xf] }
0x1525   :  { %v1517_v38 = vpop.xlane.xlu1 %1516 }
0x1526   :  { %v1519_v11 = vmul.f32 0.03125, %v1517_v38 }
0x1528   :  { %v1521_v39 = vadd.f32 1e-05, %v1519_v11 }
0x152a   :  { %3875 = vrsqrt.f32 %v1521_v39 }
0x1534   :  { %v3876_v44 = vpop.eup %3875 }
0x1535   :  { %v1525_v46 = vmul.f32 %v3876_v44, %v1509_v24 }
0x1537   :  { %v1533_v13 = vmul.f32 %v3292_v43, %v1525_v46  ;;  %v1678_v43 = vld [vmem:[%s4960_s10] sm:$0xf]  ;;  %v1911_v46 = vsel %vm300_vm3, %v1679_v45, 0 }
0x1538   :  { %v1957_v44 = vsel %vm300_vm3, %v1678_v43, 0 }
0x1539   :  { %v1541_v49 = vadd.f32 %v3293_v47, %v1533_v13 }
0x153b   :  { %v1546_v50 = vpack.c.bf16 %v1541_v49, %v1540_v48 }
0x153d   :  { %3617 = vmatmul.mubr.msk.bf16.vlgmr.msra.gmra.mrb[56].mxu1 %vm181_vm1, %v1546_v50 }
0x153e   :  { %3630 = vmatprep.mubr.msk.bf16.mxu1 %vm4133_vm0, %v4132_v0  ;;  %3629 = vmatpush3.bf16.xpose.msra.mxu1 %v1689_v53 }
0x153f   :  { %3640 = vmatprep.subr.bf16.mxu1 %v4132_v0 }
0x1610   :  { %v1603_v62 = vpop.f32.mrb[56].mxu1 }
0x1611   :  { %v1604_v1 = vadd.f32 %v3294_v61, %v1603_v62  ;;  %v3618_v2 = vpop.f32.mrb[57].mxu1 }
0x1612   :  { %v1606_v3 = vpop.f32.mrb[58].mxu1 }
0x1613   :  { %v4631_v4 = vpack.c.bf16 %v1604_v1, %v1604_v1  ;;  %v4633_v60 = vadd.f32 %v3294_v61, %v1606_v3  ;;  %v3619_v41 = vpop.f32.mrb[59].mxu1 }
0x1615   :  { %1795 = vrot.lane.b32.xlu1 %v4631_v4, %s4136_s27  ;;  %3631 = vmatmul.mubr.msk.bf16.vlgmr.msra.gmra.mrb[60].mxu1 %vm235_vm2, %v4631_v4 }
0x1616   :  { %3641 = vmatpush3.bf16.xpose.msra.mxu1 %v1803_v5  ;;  %3642 = vmatprep.mubr.msk.bf16.mxu1 %vm4133_vm0, %v4132_v0 }
0x1617   :  { %3652 = vmatprep.subr.bf16.mxu1 %v4132_v0 }
0x1687   :  { %v1796_v6 = vpop.permute.xlu1 %1795 }
0x1688   :  { %3643 = vmatmul.mubr.msk.bf16.vlgmr.msra.gmra.mrb[64].mxu1 %vm235_vm2, %v1796_v6 }
0x1689   :  { %3654 = vmatprep.mubr.msk.bf16.mxu1 %vm4133_vm0, %v4132_v0  ;;  %3653 = vmatpush3.bf16.msra.mxu1 %v1911_v46 }
0x168a   :  { %3664 = vmatprep.subr.bf16.mxu1 %v4132_v0 }
0x16e8   :  { %v1725_v7 = vpop.f32.mrb[60].mxu1 }
0x16e9   :  { %v1731_v8 = vmul.f32 0.35355338, %v1725_v7  ;;  %v3632_v9 = vpop.f32.mrb[61].mxu1 }
0x16ea   :  { %v1728_v10 = vpop.f32.mrb[62].mxu1 }
0x16eb   :  { %v3633_v14 = vpop.f32.mrb[63].mxu1  ;;  %v1732_v15 = vsel %vm235_vm2, %v1731_v8, -inf }
0x16ec   :  { %1733 = vmax.xlane.f32.xlu0 %v1732_v15 }
0x175b   :  { %v1839_v16 = vpop.f32.mrb[64].mxu1 }
0x175c   :  { %v1845_v52 = vmul.f32 0.35355338, %v1839_v16  ;;  %v3644_v17 = vpop.f32.mrb[65].mxu1 }
0x175d   :  { %v1842_v18 = vpop.f32.mrb[66].mxu1 }
0x175e   :  { %v3645_v19 = vpop.f32.mrb[67].mxu1  ;;  %v1846_v20 = vsel %vm235_vm2, %v1845_v52, -inf }
0x175f   :  { %1847 = vmax.xlane.f32.xlu1 %v1846_v20 }
0x1770   :  { %1858 = vrot.lane.b32.xlu1 %v4622_v58, %s4135_s4 }
0x1779   :  { %v1734_v21 = vpop.xlane.xlu0 %1733 }
0x177a   :  { %v1735_v22 = vsub.f32 %v1731_v8, %v1734_v21 }
0x177c   :  { %v1736_v32 = vmul.f32 1.442695, %v1735_v22 }
0x177e   :  { %3877 = vpow2.f32 %v1736_v32 }
0x1788   :  { %v3878_v23 = vpop.eup %3877 }
0x1789   :  { %v1738_v24 = vsel %vm235_vm2, %v3878_v23, 0.0 }
0x178a   :  { %1739 = vadd.xlane.f32.xlu0 %v1738_v24 }
0x17ec   :  { %v1848_v25 = vpop.xlane.xlu1 %1847 }
0x17ed   :  { %v1849_v26 = vsub.f32 %v1845_v52, %v1848_v25 }
0x17ef   :  { %v1850_v27 = vmul.f32 1.442695, %v1849_v26 }
0x17f0   :  { %v1859_v37 = vpop.permute.xlu1 %1858 }
0x17f1   :  { %3879 = vpow2.f32 %v1850_v27  ;;  %v1864_v11 = vsel %vm300_vm3, %v1859_v37, 0 }
0x17fb   :  { %v3880_v28 = vpop.eup %3879 }
0x17fc   :  { %v1852_v29 = vsel %vm235_vm2, %v3880_v28, 0.0 }
0x17fd   :  { %1853 = vadd.xlane.f32.xlu0 %v1852_v29 }
0x1813   :  { %1745 = vrot.lane.b32.xlu0 %v4622_v58, %s4134_s12 }
0x1817   :  { %2002 = vrot.lane.b32.xlu0 %v4622_v58, %s4139_s11  ;;  %v1740_v30 = vpop.xlane.xlu0 %1739 }
0x1818   :  { %3881 = vrcp.f32 %v1740_v30  ;;  %v1680_v30 = vld [vmem:[%s4960_s10 + $0x8] sm:$0xf] }
0x181b   :  { %2000 = vrot.lane.b32.xlu0 %v4631_v4, %s4139_s11 }
0x1822   :  { %v3882_v31 = vpop.eup %3881 }
0x1823   :  { %v4658_v34 = vmul.f32 %v3882_v31, %v3878_v23  ;;  %v2116_v31 = vsel %vm300_vm3, %v1680_v30, 0 }
0x1825   :  { %v1743_v38 = vpack.c.bf16 %v4658_v34, %v4658_v34 }
0x188a   :  { %v1854_v33 = vpop.xlane.xlu0 %1853 }
0x188b   :  { %3883 = vrcp.f32 %v1854_v33 }
0x188e   :  { %v1746_v35 = vpop.permute.xlu0 %1745 }
0x188f   :  { %v1751_v36 = vsel %vm300_vm3, %v1746_v35, 0 }
0x1890   :  { %3635 = vmatpush3.bf16.msra.mxu0 %v1751_v36 }
0x1891   :  { %3646 = vmatprep.subr.bf16.mxu0 %v4132_v0 }
0x1892   :  { %v2003_v51 = vpop.permute.xlu0 %2002 }
0x1893   :  { %3637 = vmatmul.mubr.msk.bf16.vlgmr.msra.gmra.mrb[48].mxu0 %vm235_vm2, %v1743_v38  ;;  %v2008_v12 = vsel %vm235_vm2, %v2003_v51, 0 }
0x1894   :  { %3647 = vmatpush3.bf16.msra.mxu0 %v1864_v11  ;;  %3648 = vmatprep.mubr.msk.bf16.mxu0 %vm4133_vm0, %v4132_v0 }
0x1895   :  { %v3884_v39 = vpop.eup %3883  ;;  %3658 = vmatprep.subr.bf16.mxu0 %v4132_v0 }
0x1896   :  { %v4669_v40 = vmul.f32 %v3884_v39, %v3880_v28  ;;  %v2001_v61 = vpop.permute.xlu0 %2000 }
0x1898   :  { %v1857_v42 = vpack.c.bf16 %v4669_v40, %v4669_v40  ;;  %v1999_v23 = vadd.f32 %v4669_v40, %v4658_v34 }
0x189b   :  { %3649 = vmatmul.mubr.msk.bf16.vlgmr.msra.gmra.mrb[52].mxu0 %vm235_vm2, %v1857_v42 }
0x189c   :  { %3660 = vmatprep.mubr.msk.bf16.mxu0 %vm4133_vm0, %v4132_v0  ;;  %3659 = vmatpush3.bf16.msra.mxu0 %v1957_v44  ;;  %v4732_v44 = vpack.c.bf16 %v4633_v60, %v4633_v60  ;;  %v4741_v60 = vpack.c.bf16 %v4624_v59, %v4624_v59 }
0x189d   :  { %3670 = vmatprep.subr.bf16.mxu0 %v4132_v0 }
0x189e   :  { %v2340_v59 = vsel %vm235_vm2, %v4741_v60, 0 }
0x1966   :  { %v1787_v47 = vpop.f32.mrb[48].mxu0 }
0x1967   :  { %v1793_v13 = vpack.c.bf16 %v1787_v47, %v1787_v47  ;;  %v3638_v48 = vpop.f32.mrb[49].mxu0 }
0x1968   :  { %v1790_v49 = vpop.f32.mrb[50].mxu0 }
0x1969   :  { %v3639_v50 = vpop.f32.mrb[51].mxu0  ;;  %3661 = vmatmul.mubr.msk.bf16.vlgmr.msra.gmra.mrb[56].mxu0 %vm235_vm2, %v1793_v13 }
0x196a   :  { %3672 = vmatprep.mubr.msk.bf16.mxu0 %vm4133_vm0, %v4132_v0 }
0x196e   :  { %v1900_v54 = vpop.f32.mrb[52].mxu0 }
0x196f   :  { %v1906_v55 = vpack.c.bf16 %v1900_v54, %v1900_v54  ;;  %v3650_v56 = vpop.f32.mrb[53].mxu0 }
0x1970   :  { %v1903_v57 = vpop.f32.mrb[54].mxu0 }
0x1971   :  { %v3651_v53 = vpop.f32.mrb[55].mxu0  ;;  %3655 = vmatmul.mubr.msk.bf16.vlgmr.msra.gmra.mrb[68].mxu1 %vm235_vm2, %v1906_v55 }
0x1972   :  { %3665 = vmatpush3.bf16.xpose.msra.mxu1 %v2008_v12  ;;  %3666 = vmatprep.mubr.msk.bf16.mxu1 %vm4133_vm0, %v4132_v0 }
0x1973   :  { %3676 = vmatprep.subr.bf16.mxu1 %v4132_v0 }
0x1979   :  { %3667 = vmatmul.mubr.msk.bf16.vlgmr.msra.gmra.mrb[72].mxu1 %vm235_vm2, %v2001_v61 }
0x197a   :  { %3678 = vmatprep.mubr.msk.bf16.mxu1 %vm4133_vm0, %v4132_v0  ;;  %3677 = vmatpush3.bf16.msra.mxu1 %v2116_v31 }
0x197b   :  { %3688 = vmatprep.subr.bf16.mxu1 %v4132_v0 }
0x1a3c   :  { %v1993_v62 = vpop.f32.mrb[56].mxu0 }
0x1a3d   :  { %v3662_v63 = vpop.f32.mrb[57].mxu0 }
0x1a3e   :  { %v1996_v1 = vpop.f32.mrb[58].mxu0 }
0x1a3f   :  { %v3663_v2 = vpop.f32.mrb[59].mxu0 }
0x1a44   :  { %v1947_v3 = vpop.f32.mrb[68].mxu1 }
0x1a45   :  { %v4697_v41 = vadd.f32 %v1993_v62, %v1947_v3  ;;  %v3656_v5 = vpop.f32.mrb[69].mxu1 }
0x1a46   :  { %v1950_v6 = vpop.f32.mrb[70].mxu1 }
0x1a47   :  { %v3657_v7 = vpop.f32.mrb[71].mxu1 }
0x1a4c   :  { %v2044_v8 = vpop.f32.mrb[72].mxu1 }
0x1a4d   :  { %v2050_v9 = vmul.f32 0.35355338, %v2044_v8  ;;  %v3668_v10 = vpop.f32.mrb[73].mxu1 }
0x1a4e   :  { %v2047_v14 = vpop.f32.mrb[74].mxu1 }
0x1a4f   :  { %v3669_v15 = vpop.f32.mrb[75].mxu1  ;;  %v2051_v16 = vsel %vm235_vm2, %v2050_v9, -inf }
0x1a50   :  { %2052 = vmax.xlane.f32.xlu1 %v2051_v16 }
0x1a61   :  { %2162 = vrot.lane.b32.xlu1 %v4622_v58, %s4142_s9 }
0x1a65   :  { %2160 = vrot.lane.b32.xlu1 %v4631_v4, %s4142_s9 }
0x1add   :  { %v2053_v52 = vpop.xlane.xlu1 %2052 }
0x1ade   :  { %v2054_v17 = vsub.f32 %v2050_v9, %v2053_v52 }
0x1ae0   :  { %v2055_v18 = vmul.f32 1.442695, %v2054_v17 }
0x1ae1   :  { %v2163_v25 = vpop.permute.xlu1 %2162 }
0x1ae2   :  { %3885 = vpow2.f32 %v2055_v18  ;;  %v2168_v28 = vsel %vm235_vm2, %v2163_v25, 0 }
0x1ae5   :  { %v2161_v29 = vpop.permute.xlu1 %2160 }
0x1aec   :  { %v3886_v19 = vpop.eup %3885 }
0x1aed   :  { %v2057_v20 = vsel %vm235_vm2, %v3886_v19, 0.0 }
0x1aee   :  { %2058 = vadd.xlane.f32.xlu0 %v2057_v20 }
0x1b04   :  { %2063 = vrot.lane.b32.xlu0 %v4622_v58, %s4138_s5 }
0x1b7b   :  { %v2059_v21 = vpop.xlane.xlu0 %2058 }
0x1b7c   :  { %3887 = vrcp.f32 %v2059_v21 }
0x1b7f   :  { %v2064_v22 = vpop.permute.xlu0 %2063 }
0x1b80   :  { %v2069_v32 = vsel %vm300_vm3, %v2064_v22, 0 }
0x1b81   :  { %3671 = vmatpush3.bf16.msra.mxu0 %v2069_v32 }
0x1b82   :  { %3682 = vmatprep.subr.bf16.mxu0 %v4132_v0 }
0x1b86   :  { %v3888_v4 = vpop.eup %3887 }
0x1b87   :  { %v2061_v24 = vmul.f32 %v3888_v4, %v3886_v19 }
0x1b89   :  { %v2159_v26 = vadd.f32 %v2061_v24, %v1999_v23  ;;  %v2062_v27 = vpack.c.bf16 %v2061_v24, %v2061_v24 }
0x1b8b   :  { %3673 = vmatmul.mubr.msk.bf16.vlgmr.msra.gmra.mrb[60].mxu0 %vm235_vm2, %v2062_v27 }
0x1b8c   :  { %3683 = vmatpush3.bf16.xpose.msra.mxu0 %v2168_v28  ;;  %3684 = vmatprep.mubr.msk.bf16.mxu0 %vm4133_vm0, %v4132_v0 }
0x1b8d   :  { %3694 = vmatprep.subr.bf16.mxu0 %v4132_v0 }
0x1b93   :  { %3685 = vmatmul.mubr.msk.bf16.vlgmr.msra.gmra.mrb[64].mxu0 %vm235_vm2, %v2161_v29 }
0x1b94   :  { %3696 = vmatprep.mubr.msk.bf16.mxu0 %vm4133_vm0, %v4132_v0 }
0x1c5e   :  { %v2105_v33 = vpop.f32.mrb[60].mxu0 }
0x1c5f   :  { %v2111_v34 = vpack.c.bf16 %v2105_v33, %v2105_v33  ;;  %v3674_v35 = vpop.f32.mrb[61].mxu0 }
0x1c60   :  { %v2108_v36 = vpop.f32.mrb[62].mxu0 }
0x1c61   :  { %v3675_v37 = vpop.f32.mrb[63].mxu0  ;;  %3679 = vmatmul.mubr.msk.bf16.vlgmr.msra.gmra.mrb[76].mxu1 %vm235_vm2, %v2111_v34 }
0x1c62   :  { %3690 = vmatprep.mubr.msk.bf16.mxu1 %vm4133_vm0, %v4132_v0 }
0x1c66   :  { %v2204_v38 = vpop.f32.mrb[64].mxu0 }
0x1c67   :  { %v2210_v11 = vmul.f32 0.35355338, %v2204_v38  ;;  %v3686_v39 = vpop.f32.mrb[65].mxu0 }
0x1c68   :  { %v2207_v40 = vpop.f32.mrb[66].mxu0 }
0x1c69   :  { %v3687_v42 = vpop.f32.mrb[67].mxu0  ;;  %v2211_v43 = vsel %vm235_vm2, %v2210_v11, -inf }
0x1c6a   :  { %2212 = vmax.xlane.f32.xlu0 %v2211_v43 }
0x1c80   :  { %2223 = vrot.lane.b32.xlu0 %v4622_v58, %s4141_s8 }
0x1c84   :  { %2446 = vrot.lane.b32.xlu0 %v4732_v44, %s4136_s27 }
0x1cf7   :  { %v2213_v45 = vpop.xlane.xlu0 %2212 }
0x1cf8   :  { %v2214_v46 = vsub.f32 %v2210_v11, %v2213_v45 }
0x1cfa   :  { %v2215_v47 = vmul.f32 1.442695, %v2214_v46 }
0x1cfb   :  { %v2224_v13 = vpop.permute.xlu0 %2223 }
0x1cfc   :  { %3889 = vpow2.f32 %v2215_v47  ;;  %v2229_v48 = vsel %vm300_vm3, %v2224_v13, 0 }
0x1cfd   :  { %3689 = vmatpush3.bf16.msra.mxu1 %v2229_v48 }
0x1cfe   :  { %3700 = vmatprep.subr.bf16.mxu1 %v4132_v0 }
0x1cff   :  { %v2447_v3 = vpop.permute.xlu0 %2446 }
0x1d06   :  { %v3890_v49 = vpop.eup %3889 }
0x1d07   :  { %v2217_v58 = vsel %vm235_vm2, %v3890_v49, 0.0 }
0x1d08   :  { %2218 = vadd.xlane.f32.xlu1 %v2217_v58 }
0x1d19   :  { %2448 = vrot.lane.b32.xlu1 %v4741_v60, %s4136_s27 }
0x1d34   :  { %v2152_v50 = vpop.f32.mrb[76].mxu1 }
0x1d35   :  { %v4746_v51 = vadd.f32 %v2152_v50, %v4697_v41  ;;  %v3680_v54 = vpop.f32.mrb[77].mxu1  ;;  %v1681_v41 = vld [vmem:[%s4960_s10 + $0xc] sm:$0xf] }
0x1d36   :  { %v2155_v55 = vpop.f32.mrb[78].mxu1  ;;  %v2276_v5 = vsel %vm300_vm3, %v1681_v41, 0 }
0x1d37   :  { %v3681_v56 = vpop.f32.mrb[79].mxu1  ;;  %3695 = vmatpush3.bf16.msra.mxu0 %v2276_v5  ;;  %v2330_v55 = vld [vmem:[%s4960_s10 + $0x4] sm:$0xf] }
0x1d38   :  { %3706 = vmatprep.subr.bf16.mxu0 %v4132_v0  ;;  %v2562_v56 = vsel %vm300_vm3, %v2330_v55, 0 }
0x1d95   :  { %v2219_v57 = vpop.xlane.xlu1 %2218 }
0x1d96   :  { %3891 = vrcp.f32 %v2219_v57 }
0x1d99   :  { %v2449_v1 = vpop.permute.xlu1 %2448 }
0x1d9a   :  { %v2454_v2 = vsel %vm235_vm2, %v2449_v1, 0 }
0x1da0   :  { %v3892_v12 = vpop.eup %3891 }
0x1da1   :  { %v2221_v53 = vmul.f32 %v3892_v12, %v3890_v49 }
0x1da3   :  { %v2222_v61 = vpack.c.bf16 %v2221_v53, %v2221_v53  ;;  %v2319_v62 = vadd.f32 %v2221_v53, %v2159_v26 }
0x1da5   :  { %3691 = vmatmul.mubr.msk.bf16.vlgmr.msra.gmra.mrb[80].mxu1 %vm235_vm2, %v2222_v61  ;;  %v2327_v63 = vmul.f32 0.25, %v2319_v62 }
0x1da6   :  { %3701 = vmatpush3.bf16.xpose.msra.mxu1 %v2340_v59  ;;  %3702 = vmatprep.mubr.msk.bf16.mxu1 %vm4133_vm0, %v4132_v0 }
0x1da7   :  { %3712 = vmatprep.subr.bf16.mxu1 %v4132_v0  ;;  %2328 = vst.msk [vmem:[#allocation15] sm:$0xff] %vm235_vm2, %v2327_v63 }
0x1dad   :  { %3703 = vmatmul.mubr.msk.bf16.vlgmr.msra.gmra.mrb[84].mxu1 %vm235_vm2, %v4732_v44 }
0x1dae   :  { %3713 = vmatpush3.bf16.xpose.msra.mxu1 %v2454_v2  ;;  %3714 = vmatprep.mubr.msk.bf16.mxu1 %vm4133_vm0, %v4132_v0 }
0x1daf   :  { %3724 = vmatprep.subr.bf16.mxu1 %v4132_v0 }
0x1db5   :  { %3715 = vmatmul.mubr.msk.bf16.vlgmr.msra.gmra.mrb[88].mxu1 %vm235_vm2, %v2447_v3 }
0x1db6   :  { %3726 = vmatprep.mubr.msk.bf16.mxu1 %vm4133_vm0, %v4132_v0  ;;  %3725 = vmatpush3.bf16.msra.mxu1 %v2562_v56 }
0x1db7   :  { %3736 = vmatprep.subr.bf16.mxu1 %v4132_v0 }
0x1e78   :  { %v2265_v6 = vpop.f32.mrb[80].mxu1 }
0x1e79   :  { %v2271_v7 = vpack.c.bf16 %v2265_v6, %v2265_v6  ;;  %v3692_v8 = vpop.f32.mrb[81].mxu1 }
0x1e7a   :  { %v2268_v9 = vpop.f32.mrb[82].mxu1 }
0x1e7b   :  { %v3693_v10 = vpop.f32.mrb[83].mxu1  ;;  %3697 = vmatmul.mubr.msk.bf16.vlgmr.msra.gmra.mrb[68].mxu0 %vm235_vm2, %v2271_v7 }
0x1e7c   :  { %3708 = vmatprep.mubr.msk.bf16.mxu0 %vm4133_vm0, %v4132_v0 }
0x1e80   :  { %v2376_v14 = vpop.f32.mrb[84].mxu1 }
0x1e81   :  { %v2382_v15 = vmul.f32 0.35355338, %v2376_v14  ;;  %v3704_v16 = vpop.f32.mrb[85].mxu1 }
0x1e82   :  { %v2379_v52 = vpop.f32.mrb[86].mxu1 }
0x1e83   :  { %v3705_v17 = vpop.f32.mrb[87].mxu1  ;;  %v2383_v18 = vsel %vm235_vm2, %v2382_v15, -inf }
0x1e84   :  { %2384 = vmax.xlane.f32.xlu1 %v2383_v18 }
0x1e88   :  { %v2490_v19 = vpop.f32.mrb[88].mxu1 }
0x1e89   :  { %v2496_v20 = vmul.f32 0.35355338, %v2490_v19  ;;  %v3716_v21 = vpop.f32.mrb[89].mxu1 }
0x1e8a   :  { %v2493_v22 = vpop.f32.mrb[90].mxu1 }
0x1e8b   :  { %v3717_v32 = vpop.f32.mrb[91].mxu1  ;;  %v2497_v4 = vsel %vm235_vm2, %v2496_v20, -inf }
0x1e8c   :  { %2498 = vmax.xlane.f32.xlu0 %v2497_v4 }
0x1f11   :  { %v2385_v23 = vpop.xlane.xlu1 %2384 }
0x1f12   :  { %v2386_v24 = vsub.f32 %v2382_v15, %v2385_v23 }
0x1f14   :  { %v2387_v25 = vmul.f32 1.442695, %v2386_v24 }
0x1f16   :  { %3893 = vpow2.f32 %v2387_v25 }
0x1f19   :  { %v2499_v26 = vpop.xlane.xlu0 %2498 }
0x1f1a   :  { %v2500_v27 = vsub.f32 %v2496_v20, %v2499_v26 }
0x1f1c   :  { %v2501_v28 = vmul.f32 1.442695, %v2500_v27 }
0x1f1e   :  { %3895 = vpow2.f32 %v2501_v28 }
0x1f20   :  { %v3894_v29 = vpop.eup %3893 }
0x1f21   :  { %v2389_v30 = vsel %vm235_vm2, %v3894_v29, 0.0 }
0x1f22   :  { %2390 = vadd.xlane.f32.xlu0 %v2389_v30 }
0x1f28   :  { %v3896_v31 = vpop.eup %3895 }
0x1f29   :  { %v2503_v33 = vsel %vm235_vm2, %v3896_v31, 0.0 }
0x1f2a   :  { %2504 = vadd.xlane.f32.xlu1 %v2503_v33 }
0x1f38   :  { %2396 = vrot.lane.b32.xlu0 %v4741_v60, %s4134_s12 }
0x1f3b   :  { %2509 = vrot.lane.b32.xlu1 %v4741_v60, %s4135_s4 }
0x1f3c   :  { %2651 = vrot.lane.b32.xlu0 %v4732_v44, %s4139_s11 }
0x1f3f   :  { %2653 = vrot.lane.b32.xlu1 %v4741_v60, %s4139_s11 }
0x1f4e   :  { %v2312_v34 = vpop.f32.mrb[68].mxu0 }
0x1f4f   :  { %v4785_v35 = vadd.f32 %v2312_v34, %v4746_v51  ;;  %v3698_v36 = vpop.f32.mrb[69].mxu0  ;;  %v2329_v51 = vld [vmem:[%s4960_s10] sm:$0xf] }
0x1f50   :  { %v2315_v37 = vpop.f32.mrb[70].mxu0  ;;  %v2608_v54 = vsel %vm300_vm3, %v2329_v51, 0 }
0x1f51   :  { %v3699_v38 = vpop.f32.mrb[71].mxu0 }
0x1f52   :  { %v2331_v38 = vld [vmem:[%s4960_s10 + $0x8] sm:$0xf] }
0x1faf   :  { %v2391_v11 = vpop.xlane.xlu0 %2390 }
0x1fb0   :  { %3897 = vrcp.f32 %v2391_v11  ;;  %v2767_v11 = vsel %vm300_vm3, %v2331_v38, 0  ;;  %v3836_v38 = vld [vmem:[%s4968_s18 + $0x18] sm:$0xff]  }
0x1fb3   :  { %v2397_v39 = vpop.permute.xlu0 %2396 }
0x1fb4   :  { %v2402_v40 = vsel %vm300_vm3, %v2397_v39, 0 }
0x1fb5   :  { %3707 = vmatpush3.bf16.msra.mxu0 %v2402_v40 }
0x1fb6   :  { %3718 = vmatprep.subr.bf16.mxu0 %v4132_v0 }
0x1fb7   :  { %v2505_v42 = vpop.xlane.xlu1 %2504  ;;  %v2652_v6 = vpop.permute.xlu0 %2651 }
0x1fb8   :  { %3899 = vrcp.f32 %v2505_v42 }
0x1fba   :  { %v3898_v43 = vpop.eup %3897 }
0x1fbb   :  { %v2393_v45 = vmul.f32 %v3898_v43, %v3894_v29  ;;  %v2510_v46 = vpop.permute.xlu1 %2509 }
0x1fbc   :  { %v2515_v13 = vsel %vm300_vm3, %v2510_v46, 0 }
0x1fbd   :  { %v2394_v47 = vpack.c.bf16 %v2393_v45, %v2393_v45 }
0x1fbf   :  { %3709 = vmatmul.mubr.msk.bf16.vlgmr.msra.gmra.mrb[72].mxu0 %vm235_vm2, %v2394_v47  ;;  %v2654_v59 = vpop.permute.xlu1 %2653 }
0x1fc0   :  { %3719 = vmatpush3.bf16.msra.mxu0 %v2515_v13  ;;  %3720 = vmatprep.mubr.msk.bf16.mxu0 %vm4133_vm0, %v4132_v0  ;;  %v2659_v41 = vsel %vm235_vm2, %v2654_v59, 0 }
0x1fc1   :  { %3730 = vmatprep.subr.bf16.mxu0 %v4132_v0 }
0x1fc2   :  { %v3900_v48 = vpop.eup %3899 }
0x1fc3   :  { %v2507_v49 = vmul.f32 %v3900_v48, %v3896_v31 }
0x1fc5   :  { %v4794_v58 = vadd.f32 %v2507_v49, %v2393_v45  ;;  %v2508_v50 = vpack.c.bf16 %v2507_v49, %v2507_v49 }
0x1fc7   :  { %3721 = vmatmul.mubr.msk.bf16.vlgmr.msra.gmra.mrb[76].mxu0 %vm235_vm2, %v2508_v50 }
0x1fc8   :  { %3732 = vmatprep.mubr.msk.bf16.mxu0 %vm4133_vm0, %v4132_v0  ;;  %3731 = vmatpush3.bf16.msra.mxu0 %v2608_v54 }
0x1fc9   :  { %3742 = vmatprep.subr.bf16.mxu0 %v4132_v0 }
0x2092   :  { %v2438_v57 = vpop.f32.mrb[72].mxu0 }
0x2093   :  { %v2444_v12 = vpack.c.bf16 %v2438_v57, %v2438_v57  ;;  %v3710_v53 = vpop.f32.mrb[73].mxu0  ;;  %v3314_v57 = vld [vmem:[#allocation10] ss:$0 sm:$0xff] }
0x2094   :  { %v2441_v61 = vpop.f32.mrb[74].mxu0 }
0x2095   :  { %v3711_v62 = vpop.f32.mrb[75].mxu0  ;;  %3733 = vmatmul.mubr.msk.bf16.vlgmr.msra.gmra.mrb[80].mxu0 %vm235_vm2, %v2444_v12  ;;  %v2326_v61 = vadd.f32 %v3314_v57, %v4785_v35  ;;  %v2332_v35 = vld [vmem:[%s4960_s10 + $0xc] sm:$0xf]  ;;  %s4144_s10 = smov [#allocation15]  }
0x2096   :  { %3744 = vmatprep.mubr.msk.bf16.mxu0 %vm4133_vm0, %v4132_v0  ;;  %s3244_s0 = sshll.u32 %s4144_s10, 4  ;;  %s3245_s0 = int_to_ptr.vmem [resolvable:$true] %s3244_s0 }
0x2097   :  { %v2983_v62 = vsel %vm181_vm1, %v2326_v61, 0.0  ;;  %s4067_s13 = scalar_lea.vmem %s3245_s0, 256  ;;  %p4072_p1 = scmp.lt.s32.totalorder %s3245_s0, %s3245_s0 }
0x2098   :  { %p4068_p0 = scmp.ne.s32.totalorder %s3245_s0, %s4067_s13  ;;  %p4073_p2 = scmp.lt.s32.totalorder %s4067_s13, %s4067_s13 }
0x209a   :  { %v2551_v63 = vpop.f32.mrb[76].mxu0  ;;  %p4074_p3 = por %p4073_p2, %p4072_p1 }
0x209b   :  { %v2557_v1 = vpack.c.bf16 %v2551_v63, %v2551_v63  ;;  %v3722_v2 = vpop.f32.mrb[77].mxu0 }
0x209c   :  { %v2554_v3 = vpop.f32.mrb[78].mxu0  ;;  %p4075_p4 = pnand %p4074_p3, %p4068_p0 }
0x209d   :  { %v3723_v5 = vpop.f32.mrb[79].mxu0  ;;  %3727 = vmatmul.mubr.msk.bf16.vlgmr.msra.gmra.mrb[92].mxu1 %vm235_vm2, %v2557_v1 }
0x209e   :  { %3737 = vmatpush3.bf16.xpose.msra.mxu1 %v2659_v41  ;;  %3738 = vmatprep.mubr.msk.bf16.mxu1 %vm4133_vm0, %v4132_v0 }
0x209f   :  { %3748 = vmatprep.subr.bf16.mxu1 %v4132_v0 }
0x20a5   :  { %3739 = vmatmul.mubr.msk.bf16.vlgmr.msra.gmra.mrb[96].mxu1 %vm235_vm2, %v2652_v6 }
0x20a6   :  { %3750 = vmatprep.mubr.msk.bf16.mxu1 %vm4133_vm0, %v4132_v0  ;;  %3749 = vmatpush3.bf16.msra.mxu1 %v2767_v11  ;;  %v3837_v11 = vld [vmem:[%s4968_s18 + $0x20] sm:$0xff]  }
0x20a7   :  { %3760 = vmatprep.subr.bf16.mxu1 %v4132_v0 }
0x2168   :  { %v2644_v7 = vpop.f32.mrb[80].mxu0 }
0x2169   :  { %v3734_v8 = vpop.f32.mrb[81].mxu0 }
0x216a   :  { %v2647_v9 = vpop.f32.mrb[82].mxu0 }
0x216b   :  { %v3735_v10 = vpop.f32.mrb[83].mxu0  ;;  %v2927_v9 = vsel %vm300_vm3, %v2332_v35, 0 }
0x2170   :  { %v2598_v14 = vpop.f32.mrb[92].mxu1 }
0x2171   :  { %v4820_v15 = vadd.f32 %v2644_v7, %v2598_v14  ;;  %v3728_v16 = vpop.f32.mrb[93].mxu1 }
0x2172   :  { %v2601_v52 = vpop.f32.mrb[94].mxu1 }
0x2173   :  { %v3729_v17 = vpop.f32.mrb[95].mxu1 }
0x2178   :  { %v2695_v18 = vpop.f32.mrb[96].mxu1 }
0x2179   :  { %v2701_v19 = vmul.f32 0.35355338, %v2695_v18  ;;  %v3740_v20 = vpop.f32.mrb[97].mxu1 }
0x217a   :  { %v2698_v21 = vpop.f32.mrb[98].mxu1 }
0x217b   :  { %v3741_v22 = vpop.f32.mrb[99].mxu1  ;;  %v2702_v32 = vsel %vm235_vm2, %v2701_v19, -inf }
0x217c   :  { %2703 = vmax.xlane.f32.xlu1 %v2702_v32 }
0x218d   :  { %2813 = vrot.lane.b32.xlu1 %v4741_v60, %s4142_s9 }
0x2191   :  { %2811 = vrot.lane.b32.xlu1 %v4732_v44, %s4142_s9 }
0x2209   :  { %v2704_v4 = vpop.xlane.xlu1 %2703 }
0x220a   :  { %v2705_v23 = vsub.f32 %v2701_v19, %v2704_v4 }
0x220c   :  { %v2706_v24 = vmul.f32 1.442695, %v2705_v23 }
0x220d   :  { %v2814_v31 = vpop.permute.xlu1 %2813 }
0x220e   :  { %3901 = vpow2.f32 %v2706_v24  ;;  %v2819_v36 = vsel %vm235_vm2, %v2814_v31, 0  ;;  %v3831_v31 = vld [vmem:[%s4966_s16] sm:$0xff]  }
0x2211   :  { %v2812_v37 = vpop.permute.xlu1 %2811 }
0x2218   :  { %v3902_v25 = vpop.eup %3901 }
0x2219   :  { %v2708_v26 = vsel %vm235_vm2, %v3902_v25, 0.0 }
0x221a   :  { %2709 = vadd.xlane.f32.xlu0 %v2708_v26 }
0x2230   :  { %2714 = vrot.lane.b32.xlu0 %v4741_v60, %s4138_s5 }
0x22a7   :  { %v2710_v27 = vpop.xlane.xlu0 %2709 }
0x22a8   :  { %3903 = vrcp.f32 %v2710_v27 }
0x22ab   :  { %v2715_v28 = vpop.permute.xlu0 %2714 }
0x22ac   :  { %v2720_v29 = vsel %vm300_vm3, %v2715_v28, 0 }
0x22ad   :  { %3743 = vmatpush3.bf16.msra.mxu0 %v2720_v29 }
0x22ae   :  { %3754 = vmatprep.subr.bf16.mxu0 %v4132_v0 }
0x22b2   :  { %v3904_v44 = vpop.eup %3903 }
0x22b3   :  { %v2712_v30 = vmul.f32 %v3904_v44, %v3902_v25 }
0x22b5   :  { %v2810_v33 = vadd.f32 %v2712_v30, %v4794_v58  ;;  %v2713_v34 = vpack.c.bf16 %v2712_v30, %v2712_v30 }
0x22b7   :  { %3745 = vmatmul.mubr.msk.bf16.vlgmr.msra.gmra.mrb[84].mxu0 %vm235_vm2, %v2713_v34  ;;  %v3833_v34 = vld [vmem:[%s4968_s18] sm:$0xff]  }
0x22b8   :  { %3755 = vmatpush3.bf16.xpose.msra.mxu0 %v2819_v36  ;;  %3756 = vmatprep.mubr.msk.bf16.mxu0 %vm4133_vm0, %v4132_v0  ;;  %v3834_v36 = vld [vmem:[%s4968_s18 + $0x8] sm:$0xff]  }
0x22b9   :  { %3766 = vmatprep.subr.bf16.mxu0 %v4132_v0 }
0x22bf   :  { %3757 = vmatmul.mubr.msk.bf16.vlgmr.msra.gmra.mrb[88].mxu0 %vm235_vm2, %v2812_v37  ;;  %v3835_v37 = vld [vmem:[%s4968_s18 + $0x10] sm:$0xff]  }
0x22c0   :  { %3768 = vmatprep.mubr.msk.bf16.mxu0 %vm4133_vm0, %v4132_v0  ;;  %3767 = vmatpush3.bf16.msra.mxu0 %v2927_v9 }
0x22c1   :  { %3780 = vmatprep.subr.bf16.mxu0 %v4132_v0 }
0x238a   :  { %v2756_v39 = vpop.f32.mrb[84].mxu0 }
0x238b   :  { %v2762_v40 = vpack.c.bf16 %v2756_v39, %v2756_v39  ;;  %v3746_v42 = vpop.f32.mrb[85].mxu0  ;;  %v3838_v39 = vld [vmem:[%s4968_s18 + $0x28] sm:$0xff]  }
0x238c   :  { %v2759_v43 = vpop.f32.mrb[86].mxu0 }
0x238d   :  { %v3747_v45 = vpop.f32.mrb[87].mxu0  ;;  %3751 = vmatmul.mubr.msk.bf16.vlgmr.msra.gmra.mrb[100].mxu1 %vm235_vm2, %v2762_v40 }
0x238e   :  { %3762 = vmatprep.mubr.msk.bf16.mxu1 %vm4133_vm0, %v4132_v0 }
0x2392   :  { %v2855_v46 = vpop.f32.mrb[88].mxu0 }
0x2393   :  { %v2861_v47 = vmul.f32 0.35355338, %v2855_v46  ;;  %v3758_v13 = vpop.f32.mrb[89].mxu0 }
0x2394   :  { %v2858_v48 = vpop.f32.mrb[90].mxu0 }
0x2395   :  { %v3759_v49 = vpop.f32.mrb[91].mxu0  ;;  %v2862_v58 = vsel %vm235_vm2, %v2861_v47, -inf }
0x2396   :  { %2863 = vmax.xlane.f32.xlu0 %v2862_v58  ;;  %v3328_v49 = vld [vmem:[%s4964_s14] ss:$0 sm:$0xff] }
0x23ac   :  { %2874 = vrot.lane.b32.xlu0 %v4741_v60, %s4141_s8 }
0x2423   :  { %v2864_v50 = vpop.xlane.xlu0 %2863 }
0x2424   :  { %v2865_v51 = vsub.f32 %v2861_v47, %v2864_v50 }
0x2426   :  { %v2866_v54 = vmul.f32 1.442695, %v2865_v51 }
0x2427   :  { %v2875_v55 = vpop.permute.xlu0 %2874 }
0x2428   :  { %3905 = vpow2.f32 %v2866_v54  ;;  %v2880_v56 = vsel %vm300_vm3, %v2875_v55, 0  ;;  %v3329_v54 = vld [vmem:[%s4965_s15] ss:$0 sm:$0xff] }
0x2429   :  { %3761 = vmatpush3.bf16.msra.mxu1 %v2880_v56 }
0x242a   :  { %3772 = vmatprep.subr.bf16.mxu1 %v4132_v0 }
0x2432   :  { %v3906_v12 = vpop.eup %3905 }
0x2433   :  { %v2868_v53 = vsel %vm235_vm2, %v3906_v12, 0.0 }
0x2434   :  { %2869 = vadd.xlane.f32.xlu1 %v2868_v53  ;;  %v3839_v53 = vld [vmem:[%s4968_s18 + $0x30] sm:$0xff]  }
0x2438   :  { %2984 = vadd.xlane.f32.xlu1 %v2983_v62  ;;  %v3330_v62 = vld [vmem:[%s4967_s17] ss:$0 sm:$0xff] }
0x2460   :  { %v2803_v60 = vpop.f32.mrb[100].mxu1 }
0x2461   :  { %v2809_v59 = vadd.f32 %v2803_v60, %v4820_v15  ;;  %v3752_v63 = vpop.f32.mrb[101].mxu1 }
0x2462   :  { %v2806_v1 = vpop.f32.mrb[102].mxu1 }
0x2463   :  { %v3753_v2 = vpop.f32.mrb[103].mxu1 }
0x24c1   :  { %v2870_v3 = vpop.xlane.xlu1 %2869 }
0x24c2   :  { %3907 = vrcp.f32 %v2870_v3 }
0x24c5   :  { %v2985_v17 = vpop.xlane.xlu1 %2984 }
0x24c6   :  { %v2989_v18 = vmul.f32 0.03125, %v2985_v17 }
0x24c8   :  { %v2991_v20 = vsub.f32 %v2326_v61, %v2989_v18  ;;  %v3840_v61 = vld [vmem:[%s4968_s18 + $0x38] sm:$0xff]  }
0x24ca   :  { %v2993_v25 = vmul.f32 %v2991_v20, %v2991_v20 }
0x24cc   :  { %v3908_v41 = vpop.eup %3907  ;;  %v2995_v26 = vsel %vm181_vm1, %v2993_v25, 0.0 }
0x24cd   :  { %v2872_v5 = vmul.f32 %v3908_v41, %v3906_v12 }
0x24cf   :  { %v2873_v6 = vpack.c.bf16 %v2872_v5, %v2872_v5  ;;  %v2970_v7 = vadd.f32 %v2872_v5, %v2810_v33  ;;  %v3832_v33 = vld [vmem:[%s4966_s16 + $0x8] sm:$0xff]  }
0x24d1   :  { %3763 = vmatmul.mubr.msk.bf16.vlgmr.msra.gmra.mrb[104].mxu1 %vm235_vm2, %v2873_v6  ;;  %v2978_v8 = vmul.f32 0.25, %v2970_v7 }
0x24d2   :  { %3776 = vmatprep.mubr.msk.bf16.mxu1 %vm4133_vm0, %v4132_v0  ;;  %3773 = vmatpush3.bf16.msra.mxu1 %v3831_v31 }
0x24d3   :  { %2980 = vst.msk [vmem:[#allocation15 + $0x8] sm:$0xff] %vm235_vm2, %v2978_v8  ;;  %3774 = vmatprep.subr.bf16.mxu1 %v4132_v0 }
0x24d6   :  { %3775 = vmatpush3.bf16.msra.mxu1 %v3832_v33 }
0x25a4   :  { %v2916_v10 = vpop.f32.mrb[104].mxu1 }
0x25a5   :  { %v2922_v14 = vpack.c.bf16 %v2916_v10, %v2916_v10  ;;  %v3764_v15 = vpop.f32.mrb[105].mxu1 }
0x25a6   :  { %v2919_v16 = vpop.f32.mrb[106].mxu1 }
0x25a7   :  { %v3765_v52 = vpop.f32.mrb[107].mxu1  ;;  %3769 = vmatmul.mubr.msk.bf16.vlgmr.msra.gmra.mrb[92].mxu0 %vm235_vm2, %v2922_v14 }
0x25a8   :  { %3796 = vmatprep.mubr.msk.bf16.mxu0 %vm4133_vm0, %v4132_v0  ;;  %3781 = vmatpush3.bf16.msra.mxu0 %v3833_v34 }
0x25a9   :  { %3782 = vmatprep.subr.bf16.mxu0 %v4132_v0 }
0x25ac   :  { %3783 = vmatpush3.bf16.msra.mxu0 %v3834_v36 }
0x25ad   :  { %3784 = vmatprep.subr.bf16.mxu0 %v4132_v0 }
0x25b0   :  { %3785 = vmatpush3.bf16.msra.mxu0 %v3835_v37 }
0x25b1   :  { %3786 = vmatprep.subr.bf16.mxu0 %v4132_v0 }
0x25b4   :  { %3787 = vmatpush3.bf16.msra.mxu0 %v3836_v38 }
0x25b5   :  { %3788 = vmatprep.subr.bf16.mxu0 %v4132_v0 }
0x25b8   :  { %3789 = vmatpush3.bf16.msra.mxu0 %v3837_v11 }
0x25b9   :  { %3790 = vmatprep.subr.bf16.mxu0 %v4132_v0 }
0x25bc   :  { %3791 = vmatpush3.bf16.msra.mxu0 %v3838_v39 }
0x25bd   :  { %3792 = vmatprep.subr.bf16.mxu0 %v4132_v0 }
0x25c0   :  { %3793 = vmatpush3.bf16.msra.mxu0 %v3839_v53 }
0x25c1   :  { %3794 = vmatprep.subr.bf16.mxu0 %v4132_v0 }
0x25c4   :  { %3795 = vmatpush3.bf16.msra.mxu0 %v3840_v61 }
0x267a   :  { %v2963_v19 = vpop.f32.mrb[92].mxu0 }
0x267b   :  { %v2969_v21 = vadd.f32 %v2963_v19, %v2809_v59  ;;  %v3770_v22 = vpop.f32.mrb[93].mxu0 }
0x267c   :  { %v2966_v32 = vpop.f32.mrb[94].mxu0 }
0x267d   :  { %v3771_v4 = vpop.f32.mrb[95].mxu0  ;;  %v2977_v23 = vadd.f32 %v3314_v57, %v2969_v21 }
0x267f   :  { %v2986_v24 = vsel %vm181_vm1, %v2977_v23, 0.0 }
0x2680   :  { %2987 = vadd.xlane.f32.xlu1 %v2986_v24 }
0x2684   :  { %2996 = vadd.xlane.f32.xlu1 %v2995_v26 }
0x270d   :  { %v2988_v27 = vpop.xlane.xlu1 %2987 }
0x270e   :  { %v2990_v28 = vmul.f32 0.03125, %v2988_v27 }
0x2710   :  { %v2992_v29 = vsub.f32 %v2977_v23, %v2990_v28 }
0x2711   :  { %v2997_v40 = vpop.xlane.xlu1 %2996 }
0x2712   :  { %v2994_v44 = vmul.f32 %v2992_v29, %v2992_v29  ;;  %v3001_v42 = vmul.f32 0.03125, %v2997_v40 }
0x2714   :  { %v2998_v30 = vsel %vm181_vm1, %v2994_v44, 0.0  ;;  %v3003_v43 = vadd.f32 1e-05, %v3001_v42 }
0x2715   :  { %2999 = vadd.xlane.f32.xlu1 %v2998_v30 }
0x2716   :  { %3909 = vrsqrt.f32 %v3003_v43 }
0x2720   :  { %v3910_v13 = vpop.eup %3909 }
0x2721   :  { %v3007_v48 = vmul.f32 %v3910_v13, %v2991_v20 }
0x2723   :  { %v3015_v50 = vmul.f32 %v3328_v49, %v3007_v48 }
0x2725   :  { %v3023_v56 = vadd.f32 %v3329_v54, %v3015_v50 }
0x27a2   :  { %v3000_v45 = vpop.xlane.xlu1 %2999 }
0x27a3   :  { %v3002_v46 = vmul.f32 0.03125, %v3000_v45 }
0x27a5   :  { %v3004_v47 = vadd.f32 1e-05, %v3002_v46 }
0x27a7   :  { %3911 = vrsqrt.f32 %v3004_v47 }
0x27b1   :  { %v3912_v58 = vpop.eup %3911 }
0x27b2   :  { %v3008_v51 = vmul.f32 %v3912_v58, %v2992_v29 }
0x27b4   :  { %v3016_v55 = vmul.f32 %v3328_v49, %v3008_v51 }
0x27b6   :  { %v3024_v57 = vadd.f32 %v3329_v54, %v3016_v55 }
0x27b8   :  { %v3047_v12 = vpack.c.bf16 %v3024_v57, %v3023_v56 }
0x27ba   :  { %3777 = vmatmul.mubr.msk.bf16.vlgmr.msra.gmra.mrb[108].mxu1 %vm181_vm1, %v3047_v12 }
0x288d   :  { %v3103_v60 = vpop.f32.mrb[108].mxu1 }
0x288e   :  { %v3104_v59 = vadd.f32 %v3330_v62, %v3103_v60  ;;  %v3778_v63 = vpop.f32.mrb[109].mxu1 }
0x288f   :  { %v3106_v1 = vpop.f32.mrb[110].mxu1 }
0x2890   :  { %v3107_v2 = vadd.f32 %v3330_v62, %v3106_v1  ;;  %v3779_v3 = vpop.f32.mrb[111].mxu1  ;;  %v3110_v41 = vmax.f32 %v3104_v59, 0.0 }
0x2892   :  { %v3111_v5 = vmax.f32 %v3107_v2, 0.0 }
0x2894   :  { %v3112_v6 = vpack.c.bf16 %v3111_v5, %v3110_v41 }
0x2896   :  { %3797 = vmatmul.mubr.bf16.vlgmr.msra.gmra.mrb[96].mxu0 %v3112_v6 }
0x2897   :  { %4078 = shalt.err (!%p4075_p4)
}
0x2898   :  { %s4079_s23 = scalar_lea.hbm %s4971_s21, 256 }
0x2899   :  { %p4080_p5 = scmp.ne.s32.totalorder %s4971_s21, %s4079_s23  ;;  %p4083_p6 = scmp.lt.u32.totalorder %s4079_s23, %s4971_s21 }
0x289b   :  { %p4085_p7 = pnand %p4083_p6, %p4080_p5 }
0x289d   :  { %4088 = shalt.err (!%p4085_p7)
}
0x289e   :  { %s4145_s2 = smov 128   ;;  %s4146_s26 = smov 8   ;;  %v3334_v0 = vld [vmem:[%s4969_s19] ss:$0 sm:$0xff]  ;;  %vm3225_vm4 = vcmask 1040384   ;;  %vm3227_vm5 = vcmask 254976  }
0x289f   :  { %3250 = dma.vmem_to_hbm [thread:$0]  %s3245_s0, 256, %s4971_s21, [#allocation16], %s4145_s2, %s4145_s2, %s4146_s26  }
0x28a0   :  { %s4147_s19 = smov [#allocation14]  }
0x28a1   :  { %s3235_s21 = sshll.u32 %s4147_s19, 4  ;;  %s3236_s21 = int_to_ptr.vmem [resolvable:$true] %s3235_s21 }
0x28a2   :  { %s4089_s27 = scalar_lea.vmem %s3236_s21, 32  ;;  %p4094_p9 = scmp.lt.s32.totalorder %s3236_s21, %s3236_s21 }
0x28a3   :  { %p4090_p8 = scmp.ne.s32.totalorder %s3236_s21, %s4089_s27  ;;  %p4095_p10 = scmp.lt.s32.totalorder %s4089_s27, %s4089_s27 }
0x28a5   :  { %p4096_p11 = por %p4095_p10, %p4094_p9 }
0x28a7   :  { %p4097_p12 = pnand %p4096_p11, %p4090_p8 }
0x2969   :  { %v3201_v7 = vpop.f32.mrb[96].mxu0 }
0x296a   :  { %v3202_v8 = vadd.f32 %v3334_v0, %v3201_v7  ;;  %v3798_v35 = vpop.f32.mrb[97].mxu0 }
0x296b   :  { %v3204_v9 = vpop.f32.mrb[98].mxu0 }
0x296c   :  { %v3208_v10 = vsel %vm181_vm1, %v3202_v8, 0.0  ;;  %v3205_v14 = vadd.f32 %v3334_v0, %v3204_v9  ;;  %v3799_v15 = vpop.f32.mrb[99].mxu0 }
0x296d   :  { %v3209_v16 = vrot.slane %v3208_v10, 4 }
0x296e   :  { %v3217_v52 = vsel %vm181_vm1, %v3205_v14, 0.0 }
0x296f   :  { %v3210_v17 = vadd.f32 %v3209_v16, %v3208_v10  ;;  %v3218_v18 = vrot.slane %v3217_v52, 4 }
0x2971   :  { %v3211_v19 = vrot.slane %v3210_v17, 2  ;;  %v3219_v20 = vadd.f32 %v3218_v18, %v3217_v52 }
0x2973   :  { %v3212_v21 = vadd.f32 %v3211_v19, %v3210_v17  ;;  %v3220_v22 = vrot.slane %v3219_v20, 2 }
0x2975   :  { %v3213_v32 = vrot.slane %v3212_v21, 1  ;;  %v3221_v4 = vadd.f32 %v3220_v22, %v3219_v20 }
0x2977   :  { %v3214_v23 = vadd.f32 %v3213_v32, %v3212_v21  ;;  %v3222_v24 = vrot.slane %v3221_v4, 1 }
0x2979   :  { %v3223_v25 = vadd.f32 %v3222_v24, %v3221_v4  ;;  %v3216_v26 = vmul.f32 0.125, %v3214_v23 }
0x297b   :  { %v3224_v27 = vmul.f32 0.125, %v3223_v25 }
0x297d   :  { %v3226_v28 = vsel %vm3225_vm4, %v3216_v26, %v3224_v27 }
0x297e   :  { %3228 = vst.msk [vmem:[#allocation14] sm:$0x3] %vm3227_vm5, %v3226_v28 }
0x297f   :  { %4100 = shalt.err (!%p4097_p12)
}
0x2980   :  { %s4101_s4 = scalar_lea.hbm %s4970_s20, 32 }
0x2981   :  { %p4102_p13 = scmp.ne.s32.totalorder %s4970_s20, %s4101_s4  ;;  %p4105_p0 = scmp.lt.u32.totalorder %s4101_s4, %s4970_s20 }
0x2983   :  { %p4107_p1 = pnand %p4105_p0, %p4102_p13 }
0x2985   :  { %4110 = shalt.err (!%p4107_p1)
}
0x2986   :  { %3238 = dma.vmem_to_hbm [thread:$0]  %s3236_s21, 32, %s4970_s20, [#allocation4]  }
0x2987   :  { %4119 = dma.done.wait [#allocation4], 32  }
0x2988   :  { %4120 = vsyncadd [#allocation4], 4294967264 }
0x2989   :  { %4121 = dma.done.wait [#allocation16], 256  }
0x298a   :  { %4122 = vsyncadd [#allocation16], 4294967040 }
0x298b   :  { %3257 = vsyncpa [#allocation3], 1 }
0x298c   :  { %3258 = vsyncpa [#allocation6], 1 }
0x298d   :  { %3259 = vsyncpa [#allocation9], 1 }
0x298e   :  { %3260 = vsyncpa [#allocation12], 1 }
0x298f   :  { %3261 = vsyncpa [#allocation4], 1 }
0x2990   :  { %3262 = vsyncpa [#allocation16], 1 }

</bundles_post_ra>
